<compile_context>
chip_gen: v5e
topology: v5e:2x2
jax: 0.10.0
libtpu: 0.0.40
codegen_flags: <defaults>
</compile_context>

<pallas_src>
import numpy as np
import jax
import jax.numpy as jnp
from jax import lax
from jax.experimental import pallas as pl
from jax.experimental.pallas import tpu as pltpu


# ----------------------------------------------------------------------------
# Fused Pallas kernel: bidirectional LSTM -> bidirectional GRU
# ----------------------------------------------------------------------------
def fused_lstm_gru_kernel(
        x_ref,                                            # (T*Bp, E) bf16
        wih_lf_ref, wih_lb_ref, whh_lf_ref, whh_lb_ref,   # LSTM weights (bf16)
        b_lf_ref, b_lb_ref,                               # LSTM biases (f32)
        wih_gft_ref, wih_gfb_ref, wih_gbt_ref, wih_gbb_ref,  # GRU in-weights
        whh_gf_ref, whh_gb_ref,                           # GRU hh-weights
        b_gf_ref, b_gb_ref, bhn_f_ref, bhn_b_ref,         # GRU biases
        of_ref, ob_ref,                                   # outputs (T,Bp,H) f32
        gin_lf_ref, gin_lb_ref,                           # LSTM gate scratch
        lstm_f_ref, lstm_b_ref,                           # LSTM hidden scratch
        gi_gf_ref, gi_gb_ref):                            # GRU gate scratch
    f32 = jnp.float32
    bf16 = jnp.bfloat16

    T, Bp, GL = gin_lf_ref.shape
    H = GL // 4
    GG = 3 * H
    unroll = True if T <= 16 else 8

    # ---- Prologue: LSTM input projections, one flattened GEMM per dir ------
    x_flat = x_ref[...]                                   # (T*Bp, E) bf16
    gin_lf_ref[...] = (jnp.dot(x_flat, wih_lf_ref[...],
                               preferred_element_type=f32)
                       + b_lf_ref[...]).reshape(T, Bp, GL)
    gin_lb_ref[...] = (jnp.dot(x_flat, wih_lb_ref[...],
                               preferred_element_type=f32)
                       + b_lb_ref[...]).reshape(T, Bp, GL)

    # ---- LSTM recurrence: forward & backward chains interleaved ------------
    def lstm_cell(gates, c):
        i = jax.nn.sigmoid(gates[:, 0 * H:1 * H])
        f = jax.nn.sigmoid(gates[:, 1 * H:2 * H])
        g = jnp.tanh(gates[:, 2 * H:3 * H])
        o = jax.nn.sigmoid(gates[:, 3 * H:4 * H])
        c_new = f * c + i * g
        return o * jnp.tanh(c_new), c_new

    def lstm_body(s, carry):
        h_f, c_f, h_b, c_b = carry
        t_b = T - 1 - s
        gh_f = jnp.dot(h_f.astype(bf16), whh_lf_ref[...],
                       preferred_element_type=f32)
        gh_b = jnp.dot(h_b.astype(bf16), whh_lb_ref[...],
                       preferred_element_type=f32)
        h_f, c_f = lstm_cell(gin_lf_ref[s] + gh_f, c_f)
        h_b, c_b = lstm_cell(gin_lb_ref[t_b] + gh_b, c_b)
        lstm_f_ref[s] = h_f
        lstm_b_ref[t_b] = h_b
        return (h_f, c_f, h_b, c_b)

    zero = jnp.zeros((Bp, H), f32)
    lax.fori_loop(0, T, lstm_body, (zero, zero, zero, zero), unroll=unroll)

    # ---- GRU input projections (LSTM output stays resident in VMEM) --------
    # gi(dir) = lstm_fwd @ W_top(dir) + lstm_bwd @ W_bot(dir) + bias; the
    # vertical weight split avoids materializing a concatenated (T,B,2H) buf.
    lf_flat = lstm_f_ref[...].reshape(T * Bp, H).astype(bf16)
    lb_flat = lstm_b_ref[...].reshape(T * Bp, H).astype(bf16)
    gi_gf_ref[...] = (jnp.dot(lf_flat, wih_gft_ref[...],
                              preferred_element_type=f32)
                      + jnp.dot(lb_flat, wih_gfb_ref[...],
                                preferred_element_type=f32)
                      + b_gf_ref[...]).reshape(T, Bp, GG)
    gi_gb_ref[...] = (jnp.dot(lf_flat, wih_gbt_ref[...],
                              preferred_element_type=f32)
                      + jnp.dot(lb_flat, wih_gbb_ref[...],
                                preferred_element_type=f32)
                      + b_gb_ref[...]).reshape(T, Bp, GG)

    # Hoisted broadcasts (JAX does not CSE broadcast_in_dim inside loops).
    bhn_f = jnp.broadcast_to(bhn_f_ref[...], (Bp, H))
    bhn_b = jnp.broadcast_to(bhn_b_ref[...], (Bp, H))

    # ---- GRU recurrence: forward & backward chains interleaved -------------
    def gru_cell(gi, gh, bhn, h):
        # gi already carries b_ir+b_hr, b_iz+b_hz, b_in; b_hn stays inside
        # r*(...) (PyTorch semantics).
        r = jax.nn.sigmoid(gi[:, 0 * H:1 * H] + gh[:, 0 * H:1 * H])
        z = jax.nn.sigmoid(gi[:, 1 * H:2 * H] + gh[:, 1 * H:2 * H])
        n = jnp.tanh(gi[:, 2 * H:3 * H] + r * (gh[:, 2 * H:3 * H] + bhn))
        return (1.0 - z) * n + z * h

    def gru_body(s, carry):
        h_f, h_b = carry
        t_b = T - 1 - s
        gh_f = jnp.dot(h_f.astype(bf16), whh_gf_ref[...],
                       preferred_element_type=f32)
        gh_b = jnp.dot(h_b.astype(bf16), whh_gb_ref[...],
                       preferred_element_type=f32)
        h_f = gru_cell(gi_gf_ref[s], gh_f, bhn_f, h_f)
        h_b = gru_cell(gi_gb_ref[t_b], gh_b, bhn_b, h_b)
        of_ref[s] = h_f
        ob_ref[t_b] = h_b
        return (h_f, h_b)

    lax.fori_loop(0, T, gru_body, (zero, zero), unroll=unroll)


# ----------------------------------------------------------------------------
# Wrapper around pallas_call
# ----------------------------------------------------------------------------
def _vmem_spec():
    return pl.BlockSpec(memory_space=pltpu.MemorySpace.VMEM)


def _vmem_limit_bytes(T, Bp, E, H):
    """Size the scoped-VMEM limit from actual shapes, per generation."""
    need = (T * Bp * E * 2                          # x (bf16)
            + 2 * T * Bp * 4 * H * 4                # LSTM gate scratch (f32)
            + 2 * T * Bp * H * 4                    # LSTM hidden scratch (f32)
            + 2 * T * Bp * 3 * H * 4                # GRU gate scratch (f32)
            + 2 * T * Bp * H * 4                    # outputs (f32)
            + 2 * (E * 4 * H + H * 4 * H + 2 * H * 3 * H + H * 3 * H) * 2
            + 2 * (4 * H + 3 * H + H) * 4)
    cap = 128 * 1024 * 1024
    try:
        cap = int(pltpu.get_tpu_info().vmem_capacity_bytes)
    except Exception:
        pass
    return int(min(max(2 * need + (4 << 20), 32 << 20), int(cap * 0.8)))


def recurrent_net_forward(seq_btf, kp):
    """seq_btf: (B, T, E) float32 -> (B, T, 2H) float32 (batch_first)."""
    B, T, E = seq_btf.shape
    H = kp["whh_lf"].shape[0]

    # Pad batch to the sublane tile so vregs / MXU input rows are not empty.
    Bp = max(8, ((B + 7) // 8) * 8)
    x = seq_btf
    if Bp != B:
        x = jnp.pad(x, ((0, Bp - B), (0, 0), (0, 0)))
    # time-major, flattened for the prologue GEMMs, bf16 MXU operand
    x = jnp.transpose(x, (1, 0, 2)).reshape(T * Bp, E).astype(jnp.bfloat16)

    o_f, o_b = pl.pallas_call(
        fused_lstm_gru_kernel,
        out_shape=(jax.ShapeDtypeStruct((T, Bp, H), jnp.float32),
                   jax.ShapeDtypeStruct((T, Bp, H), jnp.float32)),
        in_specs=[_vmem_spec() for _ in range(17)],
        out_specs=(_vmem_spec(), _vmem_spec()),
        scratch_shapes=[
            pltpu.VMEM((T, Bp, 4 * H), jnp.float32),   # LSTM fwd gates (+bias)
            pltpu.VMEM((T, Bp, 4 * H), jnp.float32),   # LSTM bwd gates (+bias)
            pltpu.VMEM((T, Bp, H), jnp.float32),       # LSTM fwd hidden
            pltpu.VMEM((T, Bp, H), jnp.float32),       # LSTM bwd hidden
            pltpu.VMEM((T, Bp, 3 * H), jnp.float32),   # GRU fwd gates (+bias)
            pltpu.VMEM((T, Bp, 3 * H), jnp.float32),   # GRU bwd gates (+bias)
        ],
        compiler_params=pltpu.CompilerParams(
            vmem_limit_bytes=_vmem_limit_bytes(T, Bp, E, H)),
    )(x,
      kp["wih_lf"], kp["wih_lb"], kp["whh_lf"], kp["whh_lb"],
      kp["b_lf"], kp["b_lb"],
      kp["wih_gft"], kp["wih_gfb"], kp["wih_gbt"], kp["wih_gbb"],
      kp["whh_gf"], kp["whh_gb"], kp["b_gf"], kp["b_gb"],
      kp["bhn_f"], kp["bhn_b"])

    # Lane-dense per-direction outputs; concat + un-pad in the wrapper.
    out = jnp.concatenate([o_f, o_b], axis=-1)          # (T, Bp, 2H)
    return jnp.transpose(out, (1, 0, 2))[:B]            # (B, T, 2H)


# ----------------------------------------------------------------------------
# Parameter construction (mirrors nn.LSTM / nn.GRU init) and kernel packing
# ----------------------------------------------------------------------------
def _xavier_uniform(key, shape):
    fan_out, fan_in = shape
    bound = float(np.sqrt(6.0 / (fan_in + fan_out)))
    return jax.random.uniform(key, shape, jnp.float32, -bound, bound)


def _orthogonal(key, shape):
    return jax.nn.initializers.orthogonal()(key, shape, jnp.float32)


def _make_direction(key, in_dim, hidden_dim, n_gates):
    k = jax.random.split(key, 4)
    b_bound = 1.0 / float(np.sqrt(hidden_dim))
    return {
        "w_ih": _xavier_uniform(k[0], (n_gates * hidden_dim, in_dim)),
        "w_hh": _orthogonal(k[1], (n_gates * hidden_dim, hidden_dim)),
        "b_ih": jax.random.uniform(k[2], (n_gates * hidden_dim,), jnp.float32,
                                   -b_bound, b_bound),
        "b_hh": jax.random.uniform(k[3], (n_gates * hidden_dim,), jnp.float32,
                                   -b_bound, b_bound),
    }


def init_raw_params(key, embed_dim, hidden_dim):
    k = jax.random.split(key, 4)
    return {
        "lstm_f": _make_direction(k[0], embed_dim, hidden_dim, 4),
        "lstm_b": _make_direction(k[1], embed_dim, hidden_dim, 4),
        "gru_f": _make_direction(k[2], 2 * hidden_dim, hidden_dim, 3),
        "gru_b": _make_direction(k[3], 2 * hidden_dim, hidden_dim, 3),
    }


def pack_params(raw, hidden_dim):
    """Pre-transpose / split per direction / pre-sum biases; bf16 MXU weights."""
    H = hidden_dim
    bf16 = jnp.bfloat16
    lf, lb = raw["lstm_f"], raw["lstm_b"]
    gf, gb = raw["gru_f"], raw["gru_b"]

    def gru_in_bias(d):
        # Fold b_hr, b_hz into the precomputed input-side bias; keep b_in here
        # and b_hn separate (it sits inside r*(...) in the cell).
        return jnp.concatenate([d["b_ih"][:2 * H] + d["b_hh"][:2 * H],
                                d["b_ih"][2 * H:3 * H]]).reshape(1, 3 * H)

    wih_gf = gf["w_ih"].T      # (2H, 3H): top rows hit lstm_fwd, bottom lstm_bwd
    wih_gb = gb["w_ih"].T

    return {
        "wih_lf": lf["w_ih"].T.astype(bf16),           # (E, 4H)
        "wih_lb": lb["w_ih"].T.astype(bf16),
        "whh_lf": lf["w_hh"].T.astype(bf16),           # (H, 4H)
        "whh_lb": lb["w_hh"].T.astype(bf16),
        "b_lf": (lf["b_ih"] + lf["b_hh"]).reshape(1, 4 * H),
        "b_lb": (lb["b_ih"] + lb["b_hh"]).reshape(1, 4 * H),
        "wih_gft": wih_gf[:H, :].astype(bf16),         # (H, 3H)
        "wih_gfb": wih_gf[H:, :].astype(bf16),
        "wih_gbt": wih_gb[:H, :].astype(bf16),
        "wih_gbb": wih_gb[H:, :].astype(bf16),
        "whh_gf": gf["w_hh"].T.astype(bf16),           # (H, 3H)
        "whh_gb": gb["w_hh"].T.astype(bf16),
        "b_gf": gru_in_bias(gf),
        "b_gb": gru_in_bias(gb),
        "bhn_f": gf["b_hh"][2 * H:3 * H].reshape(1, H),
        "bhn_b": gb["b_hh"][2 * H:3 * H].reshape(1, H),
    }


# ----------------------------------------------------------------------------
# Pure-JAX reference (built from raw PyTorch-shaped params; same bf16-operand
# precision choices as the kernel)
# ----------------------------------------------------------------------------
def _lstm_dir_ref(x_tbf, d, reverse):
    H = d["w_hh"].shape[1]
    B = x_tbf.shape[1]
    wih = d["w_ih"].T.astype(jnp.bfloat16)
    whh = d["w_hh"].T.astype(jnp.bfloat16)
    b = (d["b_ih"] + d["b_hh"])[None, :]

    def step(carry, x_t):
        h, c = carry
        gates = (jnp.dot(x_t.astype(jnp.bfloat16), wih,
                         preferred_element_type=jnp.float32)
                 + jnp.dot(h.astype(jnp.bfloat16), whh,
                           preferred_element_type=jnp.float32) + b)
        i = jax.nn.sigmoid(gates[:, 0 * H:1 * H])
        f = jax.nn.sigmoid(gates[:, 1 * H:2 * H])
        g = jnp.tanh(gates[:, 2 * H:3 * H])
        o = jax.nn.sigmoid(gates[:, 3 * H:4 * H])
        c = f * c + i * g
        h = o * jnp.tanh(c)
        return (h, c), h

    h0 = jnp.zeros((B, H), jnp.float32)
    _, out = lax.scan(step, (h0, h0), x_tbf, reverse=reverse)
    return out


def _gru_dir_ref(x_tbf, d, reverse):
    H = d["w_hh"].shape[1]
    B = x_tbf.shape[1]
    wih = d["w_ih"].T.astype(jnp.bfloat16)
    whh = d["w_hh"].T.astype(jnp.bfloat16)
    b_ih = d["b_ih"][None, :]
    b_hh = d["b_hh"][None, :]

    def step(h, x_t):
        gi = jnp.dot(x_t.astype(jnp.bfloat16), wih,
                     preferred_element_type=jnp.float32) + b_ih
        gh = jnp.dot(h.astype(jnp.bfloat16), whh,
                     preferred_element_type=jnp.float32) + b_hh
        r = jax.nn.sigmoid(gi[:, 0 * H:1 * H] + gh[:, 0 * H:1 * H])
        z = jax.nn.sigmoid(gi[:, 1 * H:2 * H] + gh[:, 1 * H:2 * H])
        n = jnp.tanh(gi[:, 2 * H:3 * H] + r * gh[:, 2 * H:3 * H])
        h = (1.0 - z) * n + z * h
        return h, h

    h0 = jnp.zeros((B, H), jnp.float32)
    _, out = lax.scan(step, h0, x_tbf, reverse=reverse)
    return out


def reference_forward(seq_btf, raw):
    x = jnp.transpose(seq_btf, (1, 0, 2))
    o_lstm = jnp.concatenate(
        [_lstm_dir_ref(x, raw["lstm_f"], False),
         _lstm_dir_ref(x, raw["lstm_b"], True)], axis=-1)
    o_gru = jnp.concatenate(
        [_gru_dir_ref(o_lstm, raw["gru_f"], False),
         _gru_dir_ref(o_lstm, raw["gru_b"], True)], axis=-1)
    return jnp.transpose(o_gru, (1, 0, 2))


# ----------------------------------------------------------------------------
if __name__ == "__main__":
    B, T, E, H = 4, 8, 32, 32   # batch, seq_len, embed_dim, hidden_dim

    key = jax.random.PRNGKey(0)
    k_in, k_p = jax.random.split(key)
    seq = jax.random.normal(k_in, (B, T, E), jnp.float32)
    raw_params = init_raw_params(k_p, E, H)
    kernel_params = pack_params(raw_params, H)

    out = jax.block_until_ready(jax.jit(recurrent_net_forward)(seq, kernel_params))
    assert out.shape == (B, T, 2 * H), out.shape

    ref = jax.block_until_ready(reference_forward(seq, raw_params))
    np.testing.assert_allclose(np.asarray(out), np.asarray(ref),
                               rtol=2e-2, atol=2e-2)

    print("KERNEL_OK")
</pallas_src>

<mosaic_0001>
module attributes {stable_mosaic.version = 11 : i64} {
  func.func @fused_lstm_gru_kernel(%arg0: memref<64x32xbf16, #tpu.memory_space<vmem>>, %arg1: memref<32x128xbf16, #tpu.memory_space<vmem>>, %arg2: memref<32x128xbf16, #tpu.memory_space<vmem>>, %arg3: memref<32x128xbf16, #tpu.memory_space<vmem>>, %arg4: memref<32x128xbf16, #tpu.memory_space<vmem>>, %arg5: memref<1x128xf32, #tpu.memory_space<vmem>>, %arg6: memref<1x128xf32, #tpu.memory_space<vmem>>, %arg7: memref<32x96xbf16, #tpu.memory_space<vmem>>, %arg8: memref<32x96xbf16, #tpu.memory_space<vmem>>, %arg9: memref<32x96xbf16, #tpu.memory_space<vmem>>, %arg10: memref<32x96xbf16, #tpu.memory_space<vmem>>, %arg11: memref<32x96xbf16, #tpu.memory_space<vmem>>, %arg12: memref<32x96xbf16, #tpu.memory_space<vmem>>, %arg13: memref<1x96xf32, #tpu.memory_space<vmem>>, %arg14: memref<1x96xf32, #tpu.memory_space<vmem>>, %arg15: memref<1x32xf32, #tpu.memory_space<vmem>>, %arg16: memref<1x32xf32, #tpu.memory_space<vmem>>, %arg17: memref<8x8x32xf32, #tpu.memory_space<vmem>>, %arg18: memref<8x8x32xf32, #tpu.memory_space<vmem>>, %arg19: memref<8x8x128xf32, #tpu.memory_space<vmem>>, %arg20: memref<8x8x128xf32, #tpu.memory_space<vmem>>, %arg21: memref<8x8x32xf32, #tpu.memory_space<vmem>>, %arg22: memref<8x8x32xf32, #tpu.memory_space<vmem>>, %arg23: memref<8x8x96xf32, #tpu.memory_space<vmem>>, %arg24: memref<8x8x96xf32, #tpu.memory_space<vmem>>) attributes {dimension_semantics = [], scalar_prefetch = 0 : i64, scratch_operands = 6 : i64, tpu.core_type = #tpu.core_type<tc>} {
    %c0 = arith.constant 0 : index
    %c0_0 = arith.constant 0 : index
    %0 = vector.load %arg0[%c0, %c0_0] : memref<64x32xbf16, #tpu.memory_space<vmem>>, vector<64x32xbf16>
    %c0_1 = arith.constant 0 : index
    %c0_2 = arith.constant 0 : index
    %1 = vector.load %arg1[%c0_1, %c0_2] : memref<32x128xbf16, #tpu.memory_space<vmem>>, vector<32x128xbf16>
    %cst = arith.constant dense<0.000000e+00> : vector<64x128xf32>
    %2 = tpu.matmul %0, %1, %cst {dimension_numbers = #tpu.dot_dimension_numbers<[1], [0], [0], [1], [0, 0, 1, 1], [], []>} : vector<64x32xbf16>, vector<32x128xbf16>, vector<64x128xf32> -> vector<64x128xf32>
    %c0_3 = arith.constant 0 : index
    %c0_4 = arith.constant 0 : index
    %3 = vector.load %arg5[%c0_3, %c0_4] : memref<1x128xf32, #tpu.memory_space<vmem>>, vector<1x128xf32>
    %4 = vector.broadcast %3 : vector<1x128xf32> to vector<64x128xf32>
    %5 = arith.addf %2, %4 : vector<64x128xf32>
    %6 = vector.shape_cast %5 : vector<64x128xf32> to vector<8x8x128xf32>
    %c0_5 = arith.constant 0 : index
    %c0_6 = arith.constant 0 : index
    %c0_7 = arith.constant 0 : index
    %7 = vector.load %arg19[%c0_5, %c0_6, %c0_7] : memref<8x8x128xf32, #tpu.memory_space<vmem>>, vector<8x8x128xf32>
    tpu.vector_store %arg19[%c0_5, %c0_6, %c0_7], %6 {strides = array<i32>} : memref<8x8x128xf32, #tpu.memory_space<vmem>>, vector<8x8x128xf32>,
    %c0_8 = arith.constant 0 : index
    %c0_9 = arith.constant 0 : index
    %8 = vector.load %arg2[%c0_8, %c0_9] : memref<32x128xbf16, #tpu.memory_space<vmem>>, vector<32x128xbf16>
    %cst_10 = arith.constant dense<0.000000e+00> : vector<64x128xf32>
    %9 = tpu.matmul %0, %8, %cst_10 {dimension_numbers = #tpu.dot_dimension_numbers<[1], [0], [0], [1], [0, 0, 1, 1], [], []>} : vector<64x32xbf16>, vector<32x128xbf16>, vector<64x128xf32> -> vector<64x128xf32>
    %c0_11 = arith.constant 0 : index
    %c0_12 = arith.constant 0 : index
    %10 = vector.load %arg6[%c0_11, %c0_12] : memref<1x128xf32, #tpu.memory_space<vmem>>, vector<1x128xf32>
    %11 = vector.broadcast %10 : vector<1x128xf32> to vector<64x128xf32>
    %12 = arith.addf %9, %11 : vector<64x128xf32>
    %13 = vector.shape_cast %12 : vector<64x128xf32> to vector<8x8x128xf32>
    %c0_13 = arith.constant 0 : index
    %c0_14 = arith.constant 0 : index
    %c0_15 = arith.constant 0 : index
    %14 = vector.load %arg20[%c0_13, %c0_14, %c0_15] : memref<8x8x128xf32, #tpu.memory_space<vmem>>, vector<8x8x128xf32>
    tpu.vector_store %arg20[%c0_13, %c0_14, %c0_15], %13 {strides = array<i32>} : memref<8x8x128xf32, #tpu.memory_space<vmem>>, vector<8x8x128xf32>,
    %cst_16 = arith.constant 0.000000e+00 : f32
    %15 = vector.broadcast %cst_16 : f32 to vector<8x32xf32>
    %c0_i32 = arith.constant 0 : i32
    %c7_i32 = arith.constant 7 : i32
    %16 = arith.subi %c7_i32, %c0_i32 : i32
    %17 = arith.truncf %15 : vector<8x32xf32> to vector<8x32xbf16>
    %c0_17 = arith.constant 0 : index
    %c0_18 = arith.constant 0 : index
    %18 = vector.load %arg3[%c0_17, %c0_18] : memref<32x128xbf16, #tpu.memory_space<vmem>>, vector<32x128xbf16>
    %cst_19 = arith.constant dense<0.000000e+00> : vector<8x128xf32>
    %19 = tpu.matmul %17, %18, %cst_19 {dimension_numbers = #tpu.dot_dimension_numbers<[1], [0], [0], [1], [0, 0, 1, 1], [], []>} : vector<8x32xbf16>, vector<32x128xbf16>, vector<8x128xf32> -> vector<8x128xf32>
    %20 = arith.truncf %15 : vector<8x32xf32> to vector<8x32xbf16>
    %c0_20 = arith.constant 0 : index
    %c0_21 = arith.constant 0 : index
    %21 = vector.load %arg4[%c0_20, %c0_21] : memref<32x128xbf16, #tpu.memory_space<vmem>>, vector<32x128xbf16>
    %cst_22 = arith.constant dense<0.000000e+00> : vector<8x128xf32>
    %22 = tpu.matmul %20, %21, %cst_22 {dimension_numbers = #tpu.dot_dimension_numbers<[1], [0], [0], [1], [0, 0, 1, 1], [], []>} : vector<8x32xbf16>, vector<32x128xbf16>, vector<8x128xf32> -> vector<8x128xf32>
    %23 = arith.index_cast %c0_i32 : i32 to index
    %c0_23 = arith.constant 0 : index
    %c0_24 = arith.constant 0 : index
    %24 = vector.load %arg19[%23, %c0_23, %c0_24] : memref<8x8x128xf32, #tpu.memory_space<vmem>>, vector<1x8x128xf32>
    %25 = vector.shape_cast %24 : vector<1x8x128xf32> to vector<8x128xf32>
    %26 = arith.addf %25, %19 : vector<8x128xf32>
    %27 = vector.extract_strided_slice %26 {offsets = [0, 0], sizes = [8, 32], strides = [1, 1]} : vector<8x128xf32> to vector<8x32xf32>
    %28 = arith.negf %27 : vector<8x32xf32>
    %29 = math.exp %28 : vector<8x32xf32>
    %cst_25 = arith.constant 1.000000e+00 : f32
    %30 = vector.broadcast %cst_25 : f32 to vector<8x32xf32>
    %31 = arith.addf %30, %29 : vector<8x32xf32>
    %32 = arith.divf %30, %31 : vector<8x32xf32>
    %33 = vector.extract_strided_slice %26 {offsets = [0, 32], sizes = [8, 32], strides = [1, 1]} : vector<8x128xf32> to vector<8x32xf32>
    %34 = arith.negf %33 : vector<8x32xf32>
    %35 = math.exp %34 : vector<8x32xf32>
    %cst_26 = arith.constant 1.000000e+00 : f32
    %36 = vector.broadcast %cst_26 : f32 to vector<8x32xf32>
    %37 = arith.addf %36, %35 : vector<8x32xf32>
    %38 = arith.divf %36, %37 : vector<8x32xf32>
    %39 = vector.extract_strided_slice %26 {offsets = [0, 64], sizes = [8, 32], strides = [1, 1]} : vector<8x128xf32> to vector<8x32xf32>
    %40 = math.tanh %39 : vector<8x32xf32>
    %41 = vector.extract_strided_slice %26 {offsets = [0, 96], sizes = [8, 32], strides = [1, 1]} : vector<8x128xf32> to vector<8x32xf32>
    %42 = arith.negf %41 : vector<8x32xf32>
    %43 = math.exp %42 : vector<8x32xf32>
    %cst_27 = arith.constant 1.000000e+00 : f32
    %44 = vector.broadcast %cst_27 : f32 to vector<8x32xf32>
    %45 = arith.addf %44, %43 : vector<8x32xf32>
    %46 = arith.divf %44, %45 : vector<8x32xf32>
    %47 = arith.mulf %38, %15 : vector<8x32xf32>
    %48 = arith.mulf %32, %40 : vector<8x32xf32>
    %49 = arith.addf %47, %48 : vector<8x32xf32>
    %50 = math.tanh %49 : vector<8x32xf32>
    %51 = arith.mulf %46, %50 : vector<8x32xf32>
    %52 = arith.index_cast %16 : i32 to index
    %c0_28 = arith.constant 0 : index
    %c0_29 = arith.constant 0 : index
    %53 = vector.load %arg20[%52, %c0_28, %c0_29] : memref<8x8x128xf32, #tpu.memory_space<vmem>>, vector<1x8x128xf32>
    %54 = vector.shape_cast %53 : vector<1x8x128xf32> to vector<8x128xf32>
    %55 = arith.addf %54, %22 : vector<8x128xf32>
    %56 = vector.extract_strided_slice %55 {offsets = [0, 0], sizes = [8, 32], strides = [1, 1]} : vector<8x128xf32> to vector<8x32xf32>
    %57 = arith.negf %56 : vector<8x32xf32>
    %58 = math.exp %57 : vector<8x32xf32>
    %cst_30 = arith.constant 1.000000e+00 : f32
    %59 = vector.broadcast %cst_30 : f32 to vector<8x32xf32>
    %60 = arith.addf %59, %58 : vector<8x32xf32>
    %61 = arith.divf %59, %60 : vector<8x32xf32>
    %62 = vector.extract_strided_slice %55 {offsets = [0, 32], sizes = [8, 32], strides = [1, 1]} : vector<8x128xf32> to vector<8x32xf32>
    %63 = arith.negf %62 : vector<8x32xf32>
    %64 = math.exp %63 : vector<8x32xf32>
    %cst_31 = arith.constant 1.000000e+00 : f32
    %65 = vector.broadcast %cst_31 : f32 to vector<8x32xf32>
    %66 = arith.addf %65, %64 : vector<8x32xf32>
    %67 = arith.divf %65, %66 : vector<8x32xf32>
    %68 = vector.extract_strided_slice %55 {offsets = [0, 64], sizes = [8, 32], strides = [1, 1]} : vector<8x128xf32> to vector<8x32xf32>
    %69 = math.tanh %68 : vector<8x32xf32>
    %70 = vector.extract_strided_slice %55 {offsets = [0, 96], sizes = [8, 32], strides = [1, 1]} : vector<8x128xf32> to vector<8x32xf32>
    %71 = arith.negf %70 : vector<8x32xf32>
    %72 = math.exp %71 : vector<8x32xf32>
    %cst_32 = arith.constant 1.000000e+00 : f32
    %73 = vector.broadcast %cst_32 : f32 to vector<8x32xf32>
    %74 = arith.addf %73, %72 : vector<8x32xf32>
    %75 = arith.divf %73, %74 : vector<8x32xf32>
    %76 = arith.mulf %67, %15 : vector<8x32xf32>
    %77 = arith.mulf %61, %69 : vector<8x32xf32>
    %78 = arith.addf %76, %77 : vector<8x32xf32>
    %79 = math.tanh %78 : vector<8x32xf32>
    %80 = arith.mulf %75, %79 : vector<8x32xf32>
    %81 = arith.index_cast %c0_i32 : i32 to index
    %c0_33 = arith.constant 0 : index
    %c0_34 = arith.constant 0 : index
    %82 = vector.load %arg21[%81, %c0_33, %c0_34] : memref<8x8x32xf32, #tpu.memory_space<vmem>>, vector<1x8x32xf32>
    %83 = vector.shape_cast %82 : vector<1x8x32xf32> to vector<8x32xf32>
    %84 = vector.shape_cast %51 : vector<8x32xf32> to vector<1x8x32xf32>
    tpu.vector_store %arg21[%81, %c0_33, %c0_34], %84 {strides = array<i32>} : memref<8x8x32xf32, #tpu.memory_space<vmem>>, vector<1x8x32xf32>,
    %85 = arith.index_cast %16 : i32 to index
    %c0_35 = arith.constant 0 : index
    %c0_36 = arith.constant 0 : index
    %86 = vector.load %arg22[%85, %c0_35, %c0_36] : memref<8x8x32xf32, #tpu.memory_space<vmem>>, vector<1x8x32xf32>
    %87 = vector.shape_cast %86 : vector<1x8x32xf32> to vector<8x32xf32>
    %88 = vector.shape_cast %80 : vector<8x32xf32> to vector<1x8x32xf32>
    tpu.vector_store %arg22[%85, %c0_35, %c0_36], %88 {strides = array<i32>} : memref<8x8x32xf32, #tpu.memory_space<vmem>>, vector<1x8x32xf32>,
    %c1_i32 = arith.constant 1 : i32
    %c7_i32_37 = arith.constant 7 : i32
    %89 = arith.subi %c7_i32_37, %c1_i32 : i32
    %90 = arith.truncf %51 : vector<8x32xf32> to vector<8x32xbf16>
    %c0_38 = arith.constant 0 : index
    %c0_39 = arith.constant 0 : index
    %91 = vector.load %arg3[%c0_38, %c0_39] : memref<32x128xbf16, #tpu.memory_space<vmem>>, vector<32x128xbf16>
    %cst_40 = arith.constant dense<0.000000e+00> : vector<8x128xf32>
    %92 = tpu.matmul %90, %91, %cst_40 {dimension_numbers = #tpu.dot_dimension_numbers<[1], [0], [0], [1], [0, 0, 1, 1], [], []>} : vector<8x32xbf16>, vector<32x128xbf16>, vector<8x128xf32> -> vector<8x128xf32>
    %93 = arith.truncf %80 : vector<8x32xf32> to vector<8x32xbf16>
    %c0_41 = arith.constant 0 : index
    %c0_42 = arith.constant 0 : index
    %94 = vector.load %arg4[%c0_41, %c0_42] : memref<32x128xbf16, #tpu.memory_space<vmem>>, vector<32x128xbf16>
    %cst_43 = arith.constant dense<0.000000e+00> : vector<8x128xf32>
    %95 = tpu.matmul %93, %94, %cst_43 {dimension_numbers = #tpu.dot_dimension_numbers<[1], [0], [0], [1], [0, 0, 1, 1], [], []>} : vector<8x32xbf16>, vector<32x128xbf16>, vector<8x128xf32> -> vector<8x128xf32>
    %96 = arith.index_cast %c1_i32 : i32 to index
    %c0_44 = arith.constant 0 : index
    %c0_45 = arith.constant 0 : index
    %97 = vector.load %arg19[%96, %c0_44, %c0_45] : memref<8x8x128xf32, #tpu.memory_space<vmem>>, vector<1x8x128xf32>
    %98 = vector.shape_cast %97 : vector<1x8x128xf32> to vector<8x128xf32>
    %99 = arith.addf %98, %92 : vector<8x128xf32>
    %100 = vector.extract_strided_slice %99 {offsets = [0, 0], sizes = [8, 32], strides = [1, 1]} : vector<8x128xf32> to vector<8x32xf32>
    %101 = arith.negf %100 : vector<8x32xf32>
    %102 = math.exp %101 : vector<8x32xf32>
    %cst_46 = arith.constant 1.000000e+00 : f32
    %103 = vector.broadcast %cst_46 : f32 to vector<8x32xf32>
    %104 = arith.addf %103, %102 : vector<8x32xf32>
    %105 = arith.divf %103, %104 : vector<8x32xf32>
    %106 = vector.extract_strided_slice %99 {offsets = [0, 32], sizes = [8, 32], strides = [1, 1]} : vector<8x128xf32> to vector<8x32xf32>
    %107 = arith.negf %106 : vector<8x32xf32>
    %108 = math.exp %107 : vector<8x32xf32>
    %cst_47 = arith.constant 1.000000e+00 : f32
    %109 = vector.broadcast %cst_47 : f32 to vector<8x32xf32>
    %110 = arith.addf %109, %108 : vector<8x32xf32>
    %111 = arith.divf %109, %110 : vector<8x32xf32>
    %112 = vector.extract_strided_slice %99 {offsets = [0, 64], sizes = [8, 32], strides = [1, 1]} : vector<8x128xf32> to vector<8x32xf32>
    %113 = math.tanh %112 : vector<8x32xf32>
    %114 = vector.extract_strided_slice %99 {offsets = [0, 96], sizes = [8, 32], strides = [1, 1]} : vector<8x128xf32> to vector<8x32xf32>
    %115 = arith.negf %114 : vector<8x32xf32>
    %116 = math.exp %115 : vector<8x32xf32>
    %cst_48 = arith.constant 1.000000e+00 : f32
    %117 = vector.broadcast %cst_48 : f32 to vector<8x32xf32>
    %118 = arith.addf %117, %116 : vector<8x32xf32>
    %119 = arith.divf %117, %118 : vector<8x32xf32>
    %120 = arith.mulf %111, %49 : vector<8x32xf32>
    %121 = arith.mulf %105, %113 : vector<8x32xf32>
    %122 = arith.addf %120, %121 : vector<8x32xf32>
    %123 = math.tanh %122 : vector<8x32xf32>
    %124 = arith.mulf %119, %123 : vector<8x32xf32>
    %125 = arith.index_cast %89 : i32 to index
    %c0_49 = arith.constant 0 : index
    %c0_50 = arith.constant 0 : index
    %126 = vector.load %arg20[%125, %c0_49, %c0_50] : memref<8x8x128xf32, #tpu.memory_space<vmem>>, vector<1x8x128xf32>
    %127 = vector.shape_cast %126 : vector<1x8x128xf32> to vector<8x128xf32>
    %128 = arith.addf %127, %95 : vector<8x128xf32>
    %129 = vector.extract_strided_slice %128 {offsets = [0, 0], sizes = [8, 32], strides = [1, 1]} : vector<8x128xf32> to vector<8x32xf32>
    %130 = arith.negf %129 : vector<8x32xf32>
    %131 = math.exp %130 : vector<8x32xf32>
    %cst_51 = arith.constant 1.000000e+00 : f32
    %132 = vector.broadcast %cst_51 : f32 to vector<8x32xf32>
    %133 = arith.addf %132, %131 : vector<8x32xf32>
    %134 = arith.divf %132, %133 : vector<8x32xf32>
    %135 = vector.extract_strided_slice %128 {offsets = [0, 32], sizes = [8, 32], strides = [1, 1]} : vector<8x128xf32> to vector<8x32xf32>
    %136 = arith.negf %135 : vector<8x32xf32>
    %137 = math.exp %136 : vector<8x32xf32>
    %cst_52 = arith.constant 1.000000e+00 : f32
    %138 = vector.broadcast %cst_52 : f32 to vector<8x32xf32>
    %139 = arith.addf %138, %137 : vector<8x32xf32>
    %140 = arith.divf %138, %139 : vector<8x32xf32>
    %141 = vector.extract_strided_slice %128 {offsets = [0, 64], sizes = [8, 32], strides = [1, 1]} : vector<8x128xf32> to vector<8x32xf32>
    %142 = math.tanh %141 : vector<8x32xf32>
    %143 = vector.extract_strided_slice %128 {offsets = [0, 96], sizes = [8, 32], strides = [1, 1]} : vector<8x128xf32> to vector<8x32xf32>
    %144 = arith.negf %143 : vector<8x32xf32>
    %145 = math.exp %144 : vector<8x32xf32>
    %cst_53 = arith.constant 1.000000e+00 : f32
    %146 = vector.broadcast %cst_53 : f32 to vector<8x32xf32>
    %147 = arith.addf %146, %145 : vector<8x32xf32>
    %148 = arith.divf %146, %147 : vector<8x32xf32>
    %149 = arith.mulf %140, %78 : vector<8x32xf32>
    %150 = arith.mulf %134, %142 : vector<8x32xf32>
    %151 = arith.addf %149, %150 : vector<8x32xf32>
    %152 = math.tanh %151 : vector<8x32xf32>
    %153 = arith.mulf %148, %152 : vector<8x32xf32>
    %154 = arith.index_cast %c1_i32 : i32 to index
    %c0_54 = arith.constant 0 : index
    %c0_55 = arith.constant 0 : index
    %155 = vector.load %arg21[%154, %c0_54, %c0_55] : memref<8x8x32xf32, #tpu.memory_space<vmem>>, vector<1x8x32xf32>
    %156 = vector.shape_cast %155 : vector<1x8x32xf32> to vector<8x32xf32>
    %157 = vector.shape_cast %124 : vector<8x32xf32> to vector<1x8x32xf32>
    tpu.vector_store %arg21[%154, %c0_54, %c0_55], %157 {strides = array<i32>} : memref<8x8x32xf32, #tpu.memory_space<vmem>>, vector<1x8x32xf32>,
    %158 = arith.index_cast %89 : i32 to index
    %c0_56 = arith.constant 0 : index
    %c0_57 = arith.constant 0 : index
    %159 = vector.load %arg22[%158, %c0_56, %c0_57] : memref<8x8x32xf32, #tpu.memory_space<vmem>>, vector<1x8x32xf32>
    %160 = vector.shape_cast %159 : vector<1x8x32xf32> to vector<8x32xf32>
    %161 = vector.shape_cast %153 : vector<8x32xf32> to vector<1x8x32xf32>
    tpu.vector_store %arg22[%158, %c0_56, %c0_57], %161 {strides = array<i32>} : memref<8x8x32xf32, #tpu.memory_space<vmem>>, vector<1x8x32xf32>,
    %c2_i32 = arith.constant 2 : i32
    %c7_i32_58 = arith.constant 7 : i32
    %162 = arith.subi %c7_i32_58, %c2_i32 : i32
    %163 = arith.truncf %124 : vector<8x32xf32> to vector<8x32xbf16>
    %c0_59 = arith.constant 0 : index
    %c0_60 = arith.constant 0 : index
    %164 = vector.load %arg3[%c0_59, %c0_60] : memref<32x128xbf16, #tpu.memory_space<vmem>>, vector<32x128xbf16>
    %cst_61 = arith.constant dense<0.000000e+00> : vector<8x128xf32>
    %165 = tpu.matmul %163, %164, %cst_61 {dimension_numbers = #tpu.dot_dimension_numbers<[1], [0], [0], [1], [0, 0, 1, 1], [], []>} : vector<8x32xbf16>, vector<32x128xbf16>, vector<8x128xf32> -> vector<8x128xf32>
    %166 = arith.truncf %153 : vector<8x32xf32> to vector<8x32xbf16>
    %c0_62 = arith.constant 0 : index
    %c0_63 = arith.constant 0 : index
    %167 = vector.load %arg4[%c0_62, %c0_63] : memref<32x128xbf16, #tpu.memory_space<vmem>>, vector<32x128xbf16>
    %cst_64 = arith.constant dense<0.000000e+00> : vector<8x128xf32>
    %168 = tpu.matmul %166, %167, %cst_64 {dimension_numbers = #tpu.dot_dimension_numbers<[1], [0], [0], [1], [0, 0, 1, 1], [], []>} : vector<8x32xbf16>, vector<32x128xbf16>, vector<8x128xf32> -> vector<8x128xf32>
    %169 = arith.index_cast %c2_i32 : i32 to index
    %c0_65 = arith.constant 0 : index
    %c0_66 = arith.constant 0 : index
    %170 = vector.load %arg19[%169, %c0_65, %c0_66] : memref<8x8x128xf32, #tpu.memory_space<vmem>>, vector<1x8x128xf32>
    %171 = vector.shape_cast %170 : vector<1x8x128xf32> to vector<8x128xf32>
    %172 = arith.addf %171, %165 : vector<8x128xf32>
    %173 = vector.extract_strided_slice %172 {offsets = [0, 0], sizes = [8, 32], strides = [1, 1]} : vector<8x128xf32> to vector<8x32xf32>
    %174 = arith.negf %173 : vector<8x32xf32>
    %175 = math.exp %174 : vector<8x32xf32>
    %cst_67 = arith.constant 1.000000e+00 : f32
    %176 = vector.broadcast %cst_67 : f32 to vector<8x32xf32>
    %177 = arith.addf %176, %175 : vector<8x32xf32>
    %178 = arith.divf %176, %177 : vector<8x32xf32>
    %179 = vector.extract_strided_slice %172 {offsets = [0, 32], sizes = [8, 32], strides = [1, 1]} : vector<8x128xf32> to vector<8x32xf32>
    %180 = arith.negf %179 : vector<8x32xf32>
    %181 = math.exp %180 : vector<8x32xf32>
    %cst_68 = arith.constant 1.000000e+00 : f32
    %182 = vector.broadcast %cst_68 : f32 to vector<8x32xf32>
    %183 = arith.addf %182, %181 : vector<8x32xf32>
    %184 = arith.divf %182, %183 : vector<8x32xf32>
    %185 = vector.extract_strided_slice %172 {offsets = [0, 64], sizes = [8, 32], strides = [1, 1]} : vector<8x128xf32> to vector<8x32xf32>
    %186 = math.tanh %185 : vector<8x32xf32>
    %187 = vector.extract_strided_slice %172 {offsets = [0, 96], sizes = [8, 32], strides = [1, 1]} : vector<8x128xf32> to vector<8x32xf32>
    %188 = arith.negf %187 : vector<8x32xf32>
    %189 = math.exp %188 : vector<8x32xf32>
    %cst_69 = arith.constant 1.000000e+00 : f32
    %190 = vector.broadcast %cst_69 : f32 to vector<8x32xf32>
    %191 = arith.addf %190, %189 : vector<8x32xf32>
    %192 = arith.divf %190, %191 : vector<8x32xf32>
    %193 = arith.mulf %184, %122 : vector<8x32xf32>
    %194 = arith.mulf %178, %186 : vector<8x32xf32>
    %195 = arith.addf %193, %194 : vector<8x32xf32>
    %196 = math.tanh %195 : vector<8x32xf32>
    %197 = arith.mulf %192, %196 : vector<8x32xf32>
    %198 = arith.index_cast %162 : i32 to index
    %c0_70 = arith.constant 0 : index
    %c0_71 = arith.constant 0 : index
    %199 = vector.load %arg20[%198, %c0_70, %c0_71] : memref<8x8x128xf32, #tpu.memory_space<vmem>>, vector<1x8x128xf32>
    %200 = vector.shape_cast %199 : vector<1x8x128xf32> to vector<8x128xf32>
    %201 = arith.addf %200, %168 : vector<8x128xf32>
    %202 = vector.extract_strided_slice %201 {offsets = [0, 0], sizes = [8, 32], strides = [1, 1]} : vector<8x128xf32> to vector<8x32xf32>
    %203 = arith.negf %202 : vector<8x32xf32>
    %204 = math.exp %203 : vector<8x32xf32>
    %cst_72 = arith.constant 1.000000e+00 : f32
    %205 = vector.broadcast %cst_72 : f32 to vector<8x32xf32>
    %206 = arith.addf %205, %204 : vector<8x32xf32>
    %207 = arith.divf %205, %206 : vector<8x32xf32>
    %208 = vector.extract_strided_slice %201 {offsets = [0, 32], sizes = [8, 32], strides = [1, 1]} : vector<8x128xf32> to vector<8x32xf32>
    %209 = arith.negf %208 : vector<8x32xf32>
    %210 = math.exp %209 : vector<8x32xf32>
    %cst_73 = arith.constant 1.000000e+00 : f32
    %211 = vector.broadcast %cst_73 : f32 to vector<8x32xf32>
    %212 = arith.addf %211, %210 : vector<8x32xf32>
    %213 = arith.divf %211, %212 : vector<8x32xf32>
    %214 = vector.extract_strided_slice %201 {offsets = [0, 64], sizes = [8, 32], strides = [1, 1]} : vector<8x128xf32> to vector<8x32xf32>
    %215 = math.tanh %214 : vector<8x32xf32>
    %216 = vector.extract_strided_slice %201 {offsets = [0, 96], sizes = [8, 32], strides = [1, 1]} : vector<8x128xf32> to vector<8x32xf32>
    %217 = arith.negf %216 : vector<8x32xf32>
    %218 = math.exp %217 : vector<8x32xf32>
    %cst_74 = arith.constant 1.000000e+00 : f32
    %219 = vector.broadcast %cst_74 : f32 to vector<8x32xf32>
    %220 = arith.addf %219, %218 : vector<8x32xf32>
    %221 = arith.divf %219, %220 : vector<8x32xf32>
    %222 = arith.mulf %213, %151 : vector<8x32xf32>
    %223 = arith.mulf %207, %215 : vector<8x32xf32>
    %224 = arith.addf %222, %223 : vector<8x32xf32>
    %225 = math.tanh %224 : vector<8x32xf32>
    %226 = arith.mulf %221, %225 : vector<8x32xf32>
    %227 = arith.index_cast %c2_i32 : i32 to index
    %c0_75 = arith.constant 0 : index
    %c0_76 = arith.constant 0 : index
    %228 = vector.load %arg21[%227, %c0_75, %c0_76] : memref<8x8x32xf32, #tpu.memory_space<vmem>>, vector<1x8x32xf32>
    %229 = vector.shape_cast %228 : vector<1x8x32xf32> to vector<8x32xf32>
    %230 = vector.shape_cast %197 : vector<8x32xf32> to vector<1x8x32xf32>
    tpu.vector_store %arg21[%227, %c0_75, %c0_76], %230 {strides = array<i32>} : memref<8x8x32xf32, #tpu.memory_space<vmem>>, vector<1x8x32xf32>,
    %231 = arith.index_cast %162 : i32 to index
    %c0_77 = arith.constant 0 : index
    %c0_78 = arith.constant 0 : index
    %232 = vector.load %arg22[%231, %c0_77, %c0_78] : memref<8x8x32xf32, #tpu.memory_space<vmem>>, vector<1x8x32xf32>
    %233 = vector.shape_cast %232 : vector<1x8x32xf32> to vector<8x32xf32>
    %234 = vector.shape_cast %226 : vector<8x32xf32> to vector<1x8x32xf32>
    tpu.vector_store %arg22[%231, %c0_77, %c0_78], %234 {strides = array<i32>} : memref<8x8x32xf32, #tpu.memory_space<vmem>>, vector<1x8x32xf32>,
    %c3_i32 = arith.constant 3 : i32
    %c7_i32_79 = arith.constant 7 : i32
    %235 = arith.subi %c7_i32_79, %c3_i32 : i32
    %236 = arith.truncf %197 : vector<8x32xf32> to vector<8x32xbf16>
    %c0_80 = arith.constant 0 : index
    %c0_81 = arith.constant 0 : index
    %237 = vector.load %arg3[%c0_80, %c0_81] : memref<32x128xbf16, #tpu.memory_space<vmem>>, vector<32x128xbf16>
    %cst_82 = arith.constant dense<0.000000e+00> : vector<8x128xf32>
    %238 = tpu.matmul %236, %237, %cst_82 {dimension_numbers = #tpu.dot_dimension_numbers<[1], [0], [0], [1], [0, 0, 1, 1], [], []>} : vector<8x32xbf16>, vector<32x128xbf16>, vector<8x128xf32> -> vector<8x128xf32>
    %239 = arith.truncf %226 : vector<8x32xf32> to vector<8x32xbf16>
    %c0_83 = arith.constant 0 : index
    %c0_84 = arith.constant 0 : index
    %240 = vector.load %arg4[%c0_83, %c0_84] : memref<32x128xbf16, #tpu.memory_space<vmem>>, vector<32x128xbf16>
    %cst_85 = arith.constant dense<0.000000e+00> : vector<8x128xf32>
    %241 = tpu.matmul %239, %240, %cst_85 {dimension_numbers = #tpu.dot_dimension_numbers<[1], [0], [0], [1], [0, 0, 1, 1], [], []>} : vector<8x32xbf16>, vector<32x128xbf16>, vector<8x128xf32> -> vector<8x128xf32>
    %242 = arith.index_cast %c3_i32 : i32 to index
    %c0_86 = arith.constant 0 : index
    %c0_87 = arith.constant 0 : index
    %243 = vector.load %arg19[%242, %c0_86, %c0_87] : memref<8x8x128xf32, #tpu.memory_space<vmem>>, vector<1x8x128xf32>
    %244 = vector.shape_cast %243 : vector<1x8x128xf32> to vector<8x128xf32>
    %245 = arith.addf %244, %238 : vector<8x128xf32>
    %246 = vector.extract_strided_slice %245 {offsets = [0, 0], sizes = [8, 32], strides = [1, 1]} : vector<8x128xf32> to vector<8x32xf32>
    %247 = arith.negf %246 : vector<8x32xf32>
    %248 = math.exp %247 : vector<8x32xf32>
    %cst_88 = arith.constant 1.000000e+00 : f32
    %249 = vector.broadcast %cst_88 : f32 to vector<8x32xf32>
    %250 = arith.addf %249, %248 : vector<8x32xf32>
    %251 = arith.divf %249, %250 : vector<8x32xf32>
    %252 = vector.extract_strided_slice %245 {offsets = [0, 32], sizes = [8, 32], strides = [1, 1]} : vector<8x128xf32> to vector<8x32xf32>
    %253 = arith.negf %252 : vector<8x32xf32>
    %254 = math.exp %253 : vector<8x32xf32>
    %cst_89 = arith.constant 1.000000e+00 : f32
    %255 = vector.broadcast %cst_89 : f32 to vector<8x32xf32>
    %256 = arith.addf %255, %254 : vector<8x32xf32>
    %257 = arith.divf %255, %256 : vector<8x32xf32>
    %258 = vector.extract_strided_slice %245 {offsets = [0, 64], sizes = [8, 32], strides = [1, 1]} : vector<8x128xf32> to vector<8x32xf32>
    %259 = math.tanh %258 : vector<8x32xf32>
    %260 = vector.extract_strided_slice %245 {offsets = [0, 96], sizes = [8, 32], strides = [1, 1]} : vector<8x128xf32> to vector<8x32xf32>
    %261 = arith.negf %260 : vector<8x32xf32>
    %262 = math.exp %261 : vector<8x32xf32>
    %cst_90 = arith.constant 1.000000e+00 : f32
    %263 = vector.broadcast %cst_90 : f32 to vector<8x32xf32>
    %264 = arith.addf %263, %262 : vector<8x32xf32>
    %265 = arith.divf %263, %264 : vector<8x32xf32>
    %266 = arith.mulf %257, %195 : vector<8x32xf32>
    %267 = arith.mulf %251, %259 : vector<8x32xf32>
    %268 = arith.addf %266, %267 : vector<8x32xf32>
    %269 = math.tanh %268 : vector<8x32xf32>
    %270 = arith.mulf %265, %269 : vector<8x32xf32>
    %271 = arith.index_cast %235 : i32 to index
    %c0_91 = arith.constant 0 : index
    %c0_92 = arith.constant 0 : index
    %272 = vector.load %arg20[%271, %c0_91, %c0_92] : memref<8x8x128xf32, #tpu.memory_space<vmem>>, vector<1x8x128xf32>
    %273 = vector.shape_cast %272 : vector<1x8x128xf32> to vector<8x128xf32>
    %274 = arith.addf %273, %241 : vector<8x128xf32>
    %275 = vector.extract_strided_slice %274 {offsets = [0, 0], sizes = [8, 32], strides = [1, 1]} : vector<8x128xf32> to vector<8x32xf32>
    %276 = arith.negf %275 : vector<8x32xf32>
    %277 = math.exp %276 : vector<8x32xf32>
    %cst_93 = arith.constant 1.000000e+00 : f32
    %278 = vector.broadcast %cst_93 : f32 to vector<8x32xf32>
    %279 = arith.addf %278, %277 : vector<8x32xf32>
    %280 = arith.divf %278, %279 : vector<8x32xf32>
    %281 = vector.extract_strided_slice %274 {offsets = [0, 32], sizes = [8, 32], strides = [1, 1]} : vector<8x128xf32> to vector<8x32xf32>
    %282 = arith.negf %281 : vector<8x32xf32>
    %283 = math.exp %282 : vector<8x32xf32>
    %cst_94 = arith.constant 1.000000e+00 : f32
    %284 = vector.broadcast %cst_94 : f32 to vector<8x32xf32>
    %285 = arith.addf %284, %283 : vector<8x32xf32>
    %286 = arith.divf %284, %285 : vector<8x32xf32>
    %287 = vector.extract_strided_slice %274 {offsets = [0, 64], sizes = [8, 32], strides = [1, 1]} : vector<8x128xf32> to vector<8x32xf32>
    %288 = math.tanh %287 : vector<8x32xf32>
    %289 = vector.extract_strided_slice %274 {offsets = [0, 96], sizes = [8, 32], strides = [1, 1]} : vector<8x128xf32> to vector<8x32xf32>
    %290 = arith.negf %289 : vector<8x32xf32>
    %291 = math.exp %290 : vector<8x32xf32>
    %cst_95 = arith.constant 1.000000e+00 : f32
    %292 = vector.broadcast %cst_95 : f32 to vector<8x32xf32>
    %293 = arith.addf %292, %291 : vector<8x32xf32>
    %294 = arith.divf %292, %293 : vector<8x32xf32>
    %295 = arith.mulf %286, %224 : vector<8x32xf32>
    %296 = arith.mulf %280, %288 : vector<8x32xf32>
    %297 = arith.addf %295, %296 : vector<8x32xf32>
    %298 = math.tanh %297 : vector<8x32xf32>
    %299 = arith.mulf %294, %298 : vector<8x32xf32>
    %300 = arith.index_cast %c3_i32 : i32 to index
    %c0_96 = arith.constant 0 : index
    %c0_97 = arith.constant 0 : index
    %301 = vector.load %arg21[%300, %c0_96, %c0_97] : memref<8x8x32xf32, #tpu.memory_space<vmem>>, vector<1x8x32xf32>
    %302 = vector.shape_cast %301 : vector<1x8x32xf32> to vector<8x32xf32>
    %303 = vector.shape_cast %270 : vector<8x32xf32> to vector<1x8x32xf32>
    tpu.vector_store %arg21[%300, %c0_96, %c0_97], %303 {strides = array<i32>} : memref<8x8x32xf32, #tpu.memory_space<vmem>>, vector<1x8x32xf32>,
    %304 = arith.index_cast %235 : i32 to index
    %c0_98 = arith.constant 0 : index
    %c0_99 = arith.constant 0 : index
    %305 = vector.load %arg22[%304, %c0_98, %c0_99] : memref<8x8x32xf32, #tpu.memory_space<vmem>>, vector<1x8x32xf32>
    %306 = vector.shape_cast %305 : vector<1x8x32xf32> to vector<8x32xf32>
    %307 = vector.shape_cast %299 : vector<8x32xf32> to vector<1x8x32xf32>
    tpu.vector_store %arg22[%304, %c0_98, %c0_99], %307 {strides = array<i32>} : memref<8x8x32xf32, #tpu.memory_space<vmem>>, vector<1x8x32xf32>,
    %c4_i32 = arith.constant 4 : i32
    %c7_i32_100 = arith.constant 7 : i32
    %308 = arith.subi %c7_i32_100, %c4_i32 : i32
    %309 = arith.truncf %270 : vector<8x32xf32> to vector<8x32xbf16>
    %c0_101 = arith.constant 0 : index
    %c0_102 = arith.constant 0 : index
    %310 = vector.load %arg3[%c0_101, %c0_102] : memref<32x128xbf16, #tpu.memory_space<vmem>>, vector<32x128xbf16>
    %cst_103 = arith.constant dense<0.000000e+00> : vector<8x128xf32>
    %311 = tpu.matmul %309, %310, %cst_103 {dimension_numbers = #tpu.dot_dimension_numbers<[1], [0], [0], [1], [0, 0, 1, 1], [], []>} : vector<8x32xbf16>, vector<32x128xbf16>, vector<8x128xf32> -> vector<8x128xf32>
    %312 = arith.truncf %299 : vector<8x32xf32> to vector<8x32xbf16>
    %c0_104 = arith.constant 0 : index
    %c0_105 = arith.constant 0 : index
    %313 = vector.load %arg4[%c0_104, %c0_105] : memref<32x128xbf16, #tpu.memory_space<vmem>>, vector<32x128xbf16>
    %cst_106 = arith.constant dense<0.000000e+00> : vector<8x128xf32>
    %314 = tpu.matmul %312, %313, %cst_106 {dimension_numbers = #tpu.dot_dimension_numbers<[1], [0], [0], [1], [0, 0, 1, 1], [], []>} : vector<8x32xbf16>, vector<32x128xbf16>, vector<8x128xf32> -> vector<8x128xf32>
    %315 = arith.index_cast %c4_i32 : i32 to index
    %c0_107 = arith.constant 0 : index
    %c0_108 = arith.constant 0 : index
    %316 = vector.load %arg19[%315, %c0_107, %c0_108] : memref<8x8x128xf32, #tpu.memory_space<vmem>>, vector<1x8x128xf32>
    %317 = vector.shape_cast %316 : vector<1x8x128xf32> to vector<8x128xf32>
    %318 = arith.addf %317, %311 : vector<8x128xf32>
    %319 = vector.extract_strided_slice %318 {offsets = [0, 0], sizes = [8, 32], strides = [1, 1]} : vector<8x128xf32> to vector<8x32xf32>
    %320 = arith.negf %319 : vector<8x32xf32>
    %321 = math.exp %320 : vector<8x32xf32>
    %cst_109 = arith.constant 1.000000e+00 : f32
    %322 = vector.broadcast %cst_109 : f32 to vector<8x32xf32>
    %323 = arith.addf %322, %321 : vector<8x32xf32>
    %324 = arith.divf %322, %323 : vector<8x32xf32>
    %325 = vector.extract_strided_slice %318 {offsets = [0, 32], sizes = [8, 32], strides = [1, 1]} : vector<8x128xf32> to vector<8x32xf32>
    %326 = arith.negf %325 : vector<8x32xf32>
    %327 = math.exp %326 : vector<8x32xf32>
    %cst_110 = arith.constant 1.000000e+00 : f32
    %328 = vector.broadcast %cst_110 : f32 to vector<8x32xf32>
    %329 = arith.addf %328, %327 : vector<8x32xf32>
    %330 = arith.divf %328, %329 : vector<8x32xf32>
    %331 = vector.extract_strided_slice %318 {offsets = [0, 64], sizes = [8, 32], strides = [1, 1]} : vector<8x128xf32> to vector<8x32xf32>
    %332 = math.tanh %331 : vector<8x32xf32>
    %333 = vector.extract_strided_slice %318 {offsets = [0, 96], sizes = [8, 32], strides = [1, 1]} : vector<8x128xf32> to vector<8x32xf32>
    %334 = arith.negf %333 : vector<8x32xf32>
    %335 = math.exp %334 : vector<8x32xf32>
    %cst_111 = arith.constant 1.000000e+00 : f32
    %336 = vector.broadcast %cst_111 : f32 to vector<8x32xf32>
    %337 = arith.addf %336, %335 : vector<8x32xf32>
    %338 = arith.divf %336, %337 : vector<8x32xf32>
    %339 = arith.mulf %330, %268 : vector<8x32xf32>
    %340 = arith.mulf %324, %332 : vector<8x32xf32>
    %341 = arith.addf %339, %340 : vector<8x32xf32>
    %342 = math.tanh %341 : vector<8x32xf32>
    %343 = arith.mulf %338, %342 : vector<8x32xf32>
    %344 = arith.index_cast %308 : i32 to index
    %c0_112 = arith.constant 0 : index
    %c0_113 = arith.constant 0 : index
    %345 = vector.load %arg20[%344, %c0_112, %c0_113] : memref<8x8x128xf32, #tpu.memory_space<vmem>>, vector<1x8x128xf32>
    %346 = vector.shape_cast %345 : vector<1x8x128xf32> to vector<8x128xf32>
    %347 = arith.addf %346, %314 : vector<8x128xf32>
    %348 = vector.extract_strided_slice %347 {offsets = [0, 0], sizes = [8, 32], strides = [1, 1]} : vector<8x128xf32> to vector<8x32xf32>
    %349 = arith.negf %348 : vector<8x32xf32>
    %350 = math.exp %349 : vector<8x32xf32>
    %cst_114 = arith.constant 1.000000e+00 : f32
    %351 = vector.broadcast %cst_114 : f32 to vector<8x32xf32>
    %352 = arith.addf %351, %350 : vector<8x32xf32>
    %353 = arith.divf %351, %352 : vector<8x32xf32>
    %354 = vector.extract_strided_slice %347 {offsets = [0, 32], sizes = [8, 32], strides = [1, 1]} : vector<8x128xf32> to vector<8x32xf32>
    %355 = arith.negf %354 : vector<8x32xf32>
    %356 = math.exp %355 : vector<8x32xf32>
    %cst_115 = arith.constant 1.000000e+00 : f32
    %357 = vector.broadcast %cst_115 : f32 to vector<8x32xf32>
    %358 = arith.addf %357, %356 : vector<8x32xf32>
    %359 = arith.divf %357, %358 : vector<8x32xf32>
    %360 = vector.extract_strided_slice %347 {offsets = [0, 64], sizes = [8, 32], strides = [1, 1]} : vector<8x128xf32> to vector<8x32xf32>
    %361 = math.tanh %360 : vector<8x32xf32>
    %362 = vector.extract_strided_slice %347 {offsets = [0, 96], sizes = [8, 32], strides = [1, 1]} : vector<8x128xf32> to vector<8x32xf32>
    %363 = arith.negf %362 : vector<8x32xf32>
    %364 = math.exp %363 : vector<8x32xf32>
    %cst_116 = arith.constant 1.000000e+00 : f32
    %365 = vector.broadcast %cst_116 : f32 to vector<8x32xf32>
    %366 = arith.addf %365, %364 : vector<8x32xf32>
    %367 = arith.divf %365, %366 : vector<8x32xf32>
    %368 = arith.mulf %359, %297 : vector<8x32xf32>
    %369 = arith.mulf %353, %361 : vector<8x32xf32>
    %370 = arith.addf %368, %369 : vector<8x32xf32>
    %371 = math.tanh %370 : vector<8x32xf32>
    %372 = arith.mulf %367, %371 : vector<8x32xf32>
    %373 = arith.index_cast %c4_i32 : i32 to index
    %c0_117 = arith.constant 0 : index
    %c0_118 = arith.constant 0 : index
    %374 = vector.load %arg21[%373, %c0_117, %c0_118] : memref<8x8x32xf32, #tpu.memory_space<vmem>>, vector<1x8x32xf32>
    %375 = vector.shape_cast %374 : vector<1x8x32xf32> to vector<8x32xf32>
    %376 = vector.shape_cast %343 : vector<8x32xf32> to vector<1x8x32xf32>
    tpu.vector_store %arg21[%373, %c0_117, %c0_118], %376 {strides = array<i32>} : memref<8x8x32xf32, #tpu.memory_space<vmem>>, vector<1x8x32xf32>,
    %377 = arith.index_cast %308 : i32 to index
    %c0_119 = arith.constant 0 : index
    %c0_120 = arith.constant 0 : index
    %378 = vector.load %arg22[%377, %c0_119, %c0_120] : memref<8x8x32xf32, #tpu.memory_space<vmem>>, vector<1x8x32xf32>
    %379 = vector.shape_cast %378 : vector<1x8x32xf32> to vector<8x32xf32>
    %380 = vector.shape_cast %372 : vector<8x32xf32> to vector<1x8x32xf32>
    tpu.vector_store %arg22[%377, %c0_119, %c0_120], %380 {strides = array<i32>} : memref<8x8x32xf32, #tpu.memory_space<vmem>>, vector<1x8x32xf32>,
    %c5_i32 = arith.constant 5 : i32
    %c7_i32_121 = arith.constant 7 : i32
    %381 = arith.subi %c7_i32_121, %c5_i32 : i32
    %382 = arith.truncf %343 : vector<8x32xf32> to vector<8x32xbf16>
    %c0_122 = arith.constant 0 : index
    %c0_123 = arith.constant 0 : index
    %383 = vector.load %arg3[%c0_122, %c0_123] : memref<32x128xbf16, #tpu.memory_space<vmem>>, vector<32x128xbf16>
    %cst_124 = arith.constant dense<0.000000e+00> : vector<8x128xf32>
    %384 = tpu.matmul %382, %383, %cst_124 {dimension_numbers = #tpu.dot_dimension_numbers<[1], [0], [0], [1], [0, 0, 1, 1], [], []>} : vector<8x32xbf16>, vector<32x128xbf16>, vector<8x128xf32> -> vector<8x128xf32>
    %385 = arith.truncf %372 : vector<8x32xf32> to vector<8x32xbf16>
    %c0_125 = arith.constant 0 : index
    %c0_126 = arith.constant 0 : index
    %386 = vector.load %arg4[%c0_125, %c0_126] : memref<32x128xbf16, #tpu.memory_space<vmem>>, vector<32x128xbf16>
    %cst_127 = arith.constant dense<0.000000e+00> : vector<8x128xf32>
    %387 = tpu.matmul %385, %386, %cst_127 {dimension_numbers = #tpu.dot_dimension_numbers<[1], [0], [0], [1], [0, 0, 1, 1], [], []>} : vector<8x32xbf16>, vector<32x128xbf16>, vector<8x128xf32> -> vector<8x128xf32>
    %388 = arith.index_cast %c5_i32 : i32 to index
    %c0_128 = arith.constant 0 : index
    %c0_129 = arith.constant 0 : index
    %389 = vector.load %arg19[%388, %c0_128, %c0_129] : memref<8x8x128xf32, #tpu.memory_space<vmem>>, vector<1x8x128xf32>
    %390 = vector.shape_cast %389 : vector<1x8x128xf32> to vector<8x128xf32>
    %391 = arith.addf %390, %384 : vector<8x128xf32>
    %392 = vector.extract_strided_slice %391 {offsets = [0, 0], sizes = [8, 32], strides = [1, 1]} : vector<8x128xf32> to vector<8x32xf32>
    %393 = arith.negf %392 : vector<8x32xf32>
    %394 = math.exp %393 : vector<8x32xf32>
    %cst_130 = arith.constant 1.000000e+00 : f32
    %395 = vector.broadcast %cst_130 : f32 to vector<8x32xf32>
    %396 = arith.addf %395, %394 : vector<8x32xf32>
    %397 = arith.divf %395, %396 : vector<8x32xf32>
    %398 = vector.extract_strided_slice %391 {offsets = [0, 32], sizes = [8, 32], strides = [1, 1]} : vector<8x128xf32> to vector<8x32xf32>
    %399 = arith.negf %398 : vector<8x32xf32>
    %400 = math.exp %399 : vector<8x32xf32>
    %cst_131 = arith.constant 1.000000e+00 : f32
    %401 = vector.broadcast %cst_131 : f32 to vector<8x32xf32>
    %402 = arith.addf %401, %400 : vector<8x32xf32>
    %403 = arith.divf %401, %402 : vector<8x32xf32>
    %404 = vector.extract_strided_slice %391 {offsets = [0, 64], sizes = [8, 32], strides = [1, 1]} : vector<8x128xf32> to vector<8x32xf32>
    %405 = math.tanh %404 : vector<8x32xf32>
    %406 = vector.extract_strided_slice %391 {offsets = [0, 96], sizes = [8, 32], strides = [1, 1]} : vector<8x128xf32> to vector<8x32xf32>
    %407 = arith.negf %406 : vector<8x32xf32>
    %408 = math.exp %407 : vector<8x32xf32>
    %cst_132 = arith.constant 1.000000e+00 : f32
    %409 = vector.broadcast %cst_132 : f32 to vector<8x32xf32>
    %410 = arith.addf %409, %408 : vector<8x32xf32>
    %411 = arith.divf %409, %410 : vector<8x32xf32>
    %412 = arith.mulf %403, %341 : vector<8x32xf32>
    %413 = arith.mulf %397, %405 : vector<8x32xf32>
    %414 = arith.addf %412, %413 : vector<8x32xf32>
    %415 = math.tanh %414 : vector<8x32xf32>
    %416 = arith.mulf %411, %415 : vector<8x32xf32>
    %417 = arith.index_cast %381 : i32 to index
    %c0_133 = arith.constant 0 : index
    %c0_134 = arith.constant 0 : index
    %418 = vector.load %arg20[%417, %c0_133, %c0_134] : memref<8x8x128xf32, #tpu.memory_space<vmem>>, vector<1x8x128xf32>
    %419 = vector.shape_cast %418 : vector<1x8x128xf32> to vector<8x128xf32>
    %420 = arith.addf %419, %387 : vector<8x128xf32>
    %421 = vector.extract_strided_slice %420 {offsets = [0, 0], sizes = [8, 32], strides = [1, 1]} : vector<8x128xf32> to vector<8x32xf32>
    %422 = arith.negf %421 : vector<8x32xf32>
    %423 = math.exp %422 : vector<8x32xf32>
    %cst_135 = arith.constant 1.000000e+00 : f32
    %424 = vector.broadcast %cst_135 : f32 to vector<8x32xf32>
    %425 = arith.addf %424, %423 : vector<8x32xf32>
    %426 = arith.divf %424, %425 : vector<8x32xf32>
    %427 = vector.extract_strided_slice %420 {offsets = [0, 32], sizes = [8, 32], strides = [1, 1]} : vector<8x128xf32> to vector<8x32xf32>
    %428 = arith.negf %427 : vector<8x32xf32>
    %429 = math.exp %428 : vector<8x32xf32>
    %cst_136 = arith.constant 1.000000e+00 : f32
    %430 = vector.broadcast %cst_136 : f32 to vector<8x32xf32>
    %431 = arith.addf %430, %429 : vector<8x32xf32>
    %432 = arith.divf %430, %431 : vector<8x32xf32>
    %433 = vector.extract_strided_slice %420 {offsets = [0, 64], sizes = [8, 32], strides = [1, 1]} : vector<8x128xf32> to vector<8x32xf32>
    %434 = math.tanh %433 : vector<8x32xf32>
    %435 = vector.extract_strided_slice %420 {offsets = [0, 96], sizes = [8, 32], strides = [1, 1]} : vector<8x128xf32> to vector<8x32xf32>
    %436 = arith.negf %435 : vector<8x32xf32>
    %437 = math.exp %436 : vector<8x32xf32>
    %cst_137 = arith.constant 1.000000e+00 : f32
    %438 = vector.broadcast %cst_137 : f32 to vector<8x32xf32>
    %439 = arith.addf %438, %437 : vector<8x32xf32>
    %440 = arith.divf %438, %439 : vector<8x32xf32>
    %441 = arith.mulf %432, %370 : vector<8x32xf32>
    %442 = arith.mulf %426, %434 : vector<8x32xf32>
    %443 = arith.addf %441, %442 : vector<8x32xf32>
    %444 = math.tanh %443 : vector<8x32xf32>
    %445 = arith.mulf %440, %444 : vector<8x32xf32>
    %446 = arith.index_cast %c5_i32 : i32 to index
    %c0_138 = arith.constant 0 : index
    %c0_139 = arith.constant 0 : index
    %447 = vector.load %arg21[%446, %c0_138, %c0_139] : memref<8x8x32xf32, #tpu.memory_space<vmem>>, vector<1x8x32xf32>
    %448 = vector.shape_cast %447 : vector<1x8x32xf32> to vector<8x32xf32>
    %449 = vector.shape_cast %416 : vector<8x32xf32> to vector<1x8x32xf32>
    tpu.vector_store %arg21[%446, %c0_138, %c0_139], %449 {strides = array<i32>} : memref<8x8x32xf32, #tpu.memory_space<vmem>>, vector<1x8x32xf32>,
    %450 = arith.index_cast %381 : i32 to index
    %c0_140 = arith.constant 0 : index
    %c0_141 = arith.constant 0 : index
    %451 = vector.load %arg22[%450, %c0_140, %c0_141] : memref<8x8x32xf32, #tpu.memory_space<vmem>>, vector<1x8x32xf32>
    %452 = vector.shape_cast %451 : vector<1x8x32xf32> to vector<8x32xf32>
    %453 = vector.shape_cast %445 : vector<8x32xf32> to vector<1x8x32xf32>
    tpu.vector_store %arg22[%450, %c0_140, %c0_141], %453 {strides = array<i32>} : memref<8x8x32xf32, #tpu.memory_space<vmem>>, vector<1x8x32xf32>,
    %c6_i32 = arith.constant 6 : i32
    %c7_i32_142 = arith.constant 7 : i32
    %454 = arith.subi %c7_i32_142, %c6_i32 : i32
    %455 = arith.truncf %416 : vector<8x32xf32> to vector<8x32xbf16>
    %c0_143 = arith.constant 0 : index
    %c0_144 = arith.constant 0 : index
    %456 = vector.load %arg3[%c0_143, %c0_144] : memref<32x128xbf16, #tpu.memory_space<vmem>>, vector<32x128xbf16>
    %cst_145 = arith.constant dense<0.000000e+00> : vector<8x128xf32>
    %457 = tpu.matmul %455, %456, %cst_145 {dimension_numbers = #tpu.dot_dimension_numbers<[1], [0], [0], [1], [0, 0, 1, 1], [], []>} : vector<8x32xbf16>, vector<32x128xbf16>, vector<8x128xf32> -> vector<8x128xf32>
    %458 = arith.truncf %445 : vector<8x32xf32> to vector<8x32xbf16>
    %c0_146 = arith.constant 0 : index
    %c0_147 = arith.constant 0 : index
    %459 = vector.load %arg4[%c0_146, %c0_147] : memref<32x128xbf16, #tpu.memory_space<vmem>>, vector<32x128xbf16>
    %cst_148 = arith.constant dense<0.000000e+00> : vector<8x128xf32>
    %460 = tpu.matmul %458, %459, %cst_148 {dimension_numbers = #tpu.dot_dimension_numbers<[1], [0], [0], [1], [0, 0, 1, 1], [], []>} : vector<8x32xbf16>, vector<32x128xbf16>, vector<8x128xf32> -> vector<8x128xf32>
    %461 = arith.index_cast %c6_i32 : i32 to index
    %c0_149 = arith.constant 0 : index
    %c0_150 = arith.constant 0 : index
    %462 = vector.load %arg19[%461, %c0_149, %c0_150] : memref<8x8x128xf32, #tpu.memory_space<vmem>>, vector<1x8x128xf32>
    %463 = vector.shape_cast %462 : vector<1x8x128xf32> to vector<8x128xf32>
    %464 = arith.addf %463, %457 : vector<8x128xf32>
    %465 = vector.extract_strided_slice %464 {offsets = [0, 0], sizes = [8, 32], strides = [1, 1]} : vector<8x128xf32> to vector<8x32xf32>
    %466 = arith.negf %465 : vector<8x32xf32>
    %467 = math.exp %466 : vector<8x32xf32>
    %cst_151 = arith.constant 1.000000e+00 : f32
    %468 = vector.broadcast %cst_151 : f32 to vector<8x32xf32>
    %469 = arith.addf %468, %467 : vector<8x32xf32>
    %470 = arith.divf %468, %469 : vector<8x32xf32>
    %471 = vector.extract_strided_slice %464 {offsets = [0, 32], sizes = [8, 32], strides = [1, 1]} : vector<8x128xf32> to vector<8x32xf32>
    %472 = arith.negf %471 : vector<8x32xf32>
    %473 = math.exp %472 : vector<8x32xf32>
    %cst_152 = arith.constant 1.000000e+00 : f32
    %474 = vector.broadcast %cst_152 : f32 to vector<8x32xf32>
    %475 = arith.addf %474, %473 : vector<8x32xf32>
    %476 = arith.divf %474, %475 : vector<8x32xf32>
    %477 = vector.extract_strided_slice %464 {offsets = [0, 64], sizes = [8, 32], strides = [1, 1]} : vector<8x128xf32> to vector<8x32xf32>
    %478 = math.tanh %477 : vector<8x32xf32>
    %479 = vector.extract_strided_slice %464 {offsets = [0, 96], sizes = [8, 32], strides = [1, 1]} : vector<8x128xf32> to vector<8x32xf32>
    %480 = arith.negf %479 : vector<8x32xf32>
    %481 = math.exp %480 : vector<8x32xf32>
    %cst_153 = arith.constant 1.000000e+00 : f32
    %482 = vector.broadcast %cst_153 : f32 to vector<8x32xf32>
    %483 = arith.addf %482, %481 : vector<8x32xf32>
    %484 = arith.divf %482, %483 : vector<8x32xf32>
    %485 = arith.mulf %476, %414 : vector<8x32xf32>
    %486 = arith.mulf %470, %478 : vector<8x32xf32>
    %487 = arith.addf %485, %486 : vector<8x32xf32>
    %488 = math.tanh %487 : vector<8x32xf32>
    %489 = arith.mulf %484, %488 : vector<8x32xf32>
    %490 = arith.index_cast %454 : i32 to index
    %c0_154 = arith.constant 0 : index
    %c0_155 = arith.constant 0 : index
    %491 = vector.load %arg20[%490, %c0_154, %c0_155] : memref<8x8x128xf32, #tpu.memory_space<vmem>>, vector<1x8x128xf32>
    %492 = vector.shape_cast %491 : vector<1x8x128xf32> to vector<8x128xf32>
    %493 = arith.addf %492, %460 : vector<8x128xf32>
    %494 = vector.extract_strided_slice %493 {offsets = [0, 0], sizes = [8, 32], strides = [1, 1]} : vector<8x128xf32> to vector<8x32xf32>
    %495 = arith.negf %494 : vector<8x32xf32>
    %496 = math.exp %495 : vector<8x32xf32>
    %cst_156 = arith.constant 1.000000e+00 : f32
    %497 = vector.broadcast %cst_156 : f32 to vector<8x32xf32>
    %498 = arith.addf %497, %496 : vector<8x32xf32>
    %499 = arith.divf %497, %498 : vector<8x32xf32>
    %500 = vector.extract_strided_slice %493 {offsets = [0, 32], sizes = [8, 32], strides = [1, 1]} : vector<8x128xf32> to vector<8x32xf32>
    %501 = arith.negf %500 : vector<8x32xf32>
    %502 = math.exp %501 : vector<8x32xf32>
    %cst_157 = arith.constant 1.000000e+00 : f32
    %503 = vector.broadcast %cst_157 : f32 to vector<8x32xf32>
    %504 = arith.addf %503, %502 : vector<8x32xf32>
    %505 = arith.divf %503, %504 : vector<8x32xf32>
    %506 = vector.extract_strided_slice %493 {offsets = [0, 64], sizes = [8, 32], strides = [1, 1]} : vector<8x128xf32> to vector<8x32xf32>
    %507 = math.tanh %506 : vector<8x32xf32>
    %508 = vector.extract_strided_slice %493 {offsets = [0, 96], sizes = [8, 32], strides = [1, 1]} : vector<8x128xf32> to vector<8x32xf32>
    %509 = arith.negf %508 : vector<8x32xf32>
    %510 = math.exp %509 : vector<8x32xf32>
    %cst_158 = arith.constant 1.000000e+00 : f32
    %511 = vector.broadcast %cst_158 : f32 to vector<8x32xf32>
    %512 = arith.addf %511, %510 : vector<8x32xf32>
    %513 = arith.divf %511, %512 : vector<8x32xf32>
    %514 = arith.mulf %505, %443 : vector<8x32xf32>
    %515 = arith.mulf %499, %507 : vector<8x32xf32>
    %516 = arith.addf %514, %515 : vector<8x32xf32>
    %517 = math.tanh %516 : vector<8x32xf32>
    %518 = arith.mulf %513, %517 : vector<8x32xf32>
    %519 = arith.index_cast %c6_i32 : i32 to index
    %c0_159 = arith.constant 0 : index
    %c0_160 = arith.constant 0 : index
    %520 = vector.load %arg21[%519, %c0_159, %c0_160] : memref<8x8x32xf32, #tpu.memory_space<vmem>>, vector<1x8x32xf32>
    %521 = vector.shape_cast %520 : vector<1x8x32xf32> to vector<8x32xf32>
    %522 = vector.shape_cast %489 : vector<8x32xf32> to vector<1x8x32xf32>
    tpu.vector_store %arg21[%519, %c0_159, %c0_160], %522 {strides = array<i32>} : memref<8x8x32xf32, #tpu.memory_space<vmem>>, vector<1x8x32xf32>,
    %523 = arith.index_cast %454 : i32 to index
    %c0_161 = arith.constant 0 : index
    %c0_162 = arith.constant 0 : index
    %524 = vector.load %arg22[%523, %c0_161, %c0_162] : memref<8x8x32xf32, #tpu.memory_space<vmem>>, vector<1x8x32xf32>
    %525 = vector.shape_cast %524 : vector<1x8x32xf32> to vector<8x32xf32>
    %526 = vector.shape_cast %518 : vector<8x32xf32> to vector<1x8x32xf32>
    tpu.vector_store %arg22[%523, %c0_161, %c0_162], %526 {strides = array<i32>} : memref<8x8x32xf32, #tpu.memory_space<vmem>>, vector<1x8x32xf32>,
    %c7_i32_163 = arith.constant 7 : i32
    %c7_i32_164 = arith.constant 7 : i32
    %527 = arith.subi %c7_i32_164, %c7_i32_163 : i32
    %528 = arith.truncf %489 : vector<8x32xf32> to vector<8x32xbf16>
    %c0_165 = arith.constant 0 : index
    %c0_166 = arith.constant 0 : index
    %529 = vector.load %arg3[%c0_165, %c0_166] : memref<32x128xbf16, #tpu.memory_space<vmem>>, vector<32x128xbf16>
    %cst_167 = arith.constant dense<0.000000e+00> : vector<8x128xf32>
    %530 = tpu.matmul %528, %529, %cst_167 {dimension_numbers = #tpu.dot_dimension_numbers<[1], [0], [0], [1], [0, 0, 1, 1], [], []>} : vector<8x32xbf16>, vector<32x128xbf16>, vector<8x128xf32> -> vector<8x128xf32>
    %531 = arith.truncf %518 : vector<8x32xf32> to vector<8x32xbf16>
    %c0_168 = arith.constant 0 : index
    %c0_169 = arith.constant 0 : index
    %532 = vector.load %arg4[%c0_168, %c0_169] : memref<32x128xbf16, #tpu.memory_space<vmem>>, vector<32x128xbf16>
    %cst_170 = arith.constant dense<0.000000e+00> : vector<8x128xf32>
    %533 = tpu.matmul %531, %532, %cst_170 {dimension_numbers = #tpu.dot_dimension_numbers<[1], [0], [0], [1], [0, 0, 1, 1], [], []>} : vector<8x32xbf16>, vector<32x128xbf16>, vector<8x128xf32> -> vector<8x128xf32>
    %534 = arith.index_cast %c7_i32_163 : i32 to index
    %c0_171 = arith.constant 0 : index
    %c0_172 = arith.constant 0 : index
    %535 = vector.load %arg19[%534, %c0_171, %c0_172] : memref<8x8x128xf32, #tpu.memory_space<vmem>>, vector<1x8x128xf32>
    %536 = vector.shape_cast %535 : vector<1x8x128xf32> to vector<8x128xf32>
    %537 = arith.addf %536, %530 : vector<8x128xf32>
    %538 = vector.extract_strided_slice %537 {offsets = [0, 0], sizes = [8, 32], strides = [1, 1]} : vector<8x128xf32> to vector<8x32xf32>
    %539 = arith.negf %538 : vector<8x32xf32>
    %540 = math.exp %539 : vector<8x32xf32>
    %cst_173 = arith.constant 1.000000e+00 : f32
    %541 = vector.broadcast %cst_173 : f32 to vector<8x32xf32>
    %542 = arith.addf %541, %540 : vector<8x32xf32>
    %543 = arith.divf %541, %542 : vector<8x32xf32>
    %544 = vector.extract_strided_slice %537 {offsets = [0, 32], sizes = [8, 32], strides = [1, 1]} : vector<8x128xf32> to vector<8x32xf32>
    %545 = arith.negf %544 : vector<8x32xf32>
    %546 = math.exp %545 : vector<8x32xf32>
    %cst_174 = arith.constant 1.000000e+00 : f32
    %547 = vector.broadcast %cst_174 : f32 to vector<8x32xf32>
    %548 = arith.addf %547, %546 : vector<8x32xf32>
    %549 = arith.divf %547, %548 : vector<8x32xf32>
    %550 = vector.extract_strided_slice %537 {offsets = [0, 64], sizes = [8, 32], strides = [1, 1]} : vector<8x128xf32> to vector<8x32xf32>
    %551 = math.tanh %550 : vector<8x32xf32>
    %552 = vector.extract_strided_slice %537 {offsets = [0, 96], sizes = [8, 32], strides = [1, 1]} : vector<8x128xf32> to vector<8x32xf32>
    %553 = arith.negf %552 : vector<8x32xf32>
    %554 = math.exp %553 : vector<8x32xf32>
    %cst_175 = arith.constant 1.000000e+00 : f32
    %555 = vector.broadcast %cst_175 : f32 to vector<8x32xf32>
    %556 = arith.addf %555, %554 : vector<8x32xf32>
    %557 = arith.divf %555, %556 : vector<8x32xf32>
    %558 = arith.mulf %549, %487 : vector<8x32xf32>
    %559 = arith.mulf %543, %551 : vector<8x32xf32>
    %560 = arith.addf %558, %559 : vector<8x32xf32>
    %561 = math.tanh %560 : vector<8x32xf32>
    %562 = arith.mulf %557, %561 : vector<8x32xf32>
    %563 = arith.index_cast %527 : i32 to index
    %c0_176 = arith.constant 0 : index
    %c0_177 = arith.constant 0 : index
    %564 = vector.load %arg20[%563, %c0_176, %c0_177] : memref<8x8x128xf32, #tpu.memory_space<vmem>>, vector<1x8x128xf32>
    %565 = vector.shape_cast %564 : vector<1x8x128xf32> to vector<8x128xf32>
    %566 = arith.addf %565, %533 : vector<8x128xf32>
    %567 = vector.extract_strided_slice %566 {offsets = [0, 0], sizes = [8, 32], strides = [1, 1]} : vector<8x128xf32> to vector<8x32xf32>
    %568 = arith.negf %567 : vector<8x32xf32>
    %569 = math.exp %568 : vector<8x32xf32>
    %cst_178 = arith.constant 1.000000e+00 : f32
    %570 = vector.broadcast %cst_178 : f32 to vector<8x32xf32>
    %571 = arith.addf %570, %569 : vector<8x32xf32>
    %572 = arith.divf %570, %571 : vector<8x32xf32>
    %573 = vector.extract_strided_slice %566 {offsets = [0, 32], sizes = [8, 32], strides = [1, 1]} : vector<8x128xf32> to vector<8x32xf32>
    %574 = arith.negf %573 : vector<8x32xf32>
    %575 = math.exp %574 : vector<8x32xf32>
    %cst_179 = arith.constant 1.000000e+00 : f32
    %576 = vector.broadcast %cst_179 : f32 to vector<8x32xf32>
    %577 = arith.addf %576, %575 : vector<8x32xf32>
    %578 = arith.divf %576, %577 : vector<8x32xf32>
    %579 = vector.extract_strided_slice %566 {offsets = [0, 64], sizes = [8, 32], strides = [1, 1]} : vector<8x128xf32> to vector<8x32xf32>
    %580 = math.tanh %579 : vector<8x32xf32>
    %581 = vector.extract_strided_slice %566 {offsets = [0, 96], sizes = [8, 32], strides = [1, 1]} : vector<8x128xf32> to vector<8x32xf32>
    %582 = arith.negf %581 : vector<8x32xf32>
    %583 = math.exp %582 : vector<8x32xf32>
    %cst_180 = arith.constant 1.000000e+00 : f32
    %584 = vector.broadcast %cst_180 : f32 to vector<8x32xf32>
    %585 = arith.addf %584, %583 : vector<8x32xf32>
    %586 = arith.divf %584, %585 : vector<8x32xf32>
    %587 = arith.mulf %578, %516 : vector<8x32xf32>
    %588 = arith.mulf %572, %580 : vector<8x32xf32>
    %589 = arith.addf %587, %588 : vector<8x32xf32>
    %590 = math.tanh %589 : vector<8x32xf32>
    %591 = arith.mulf %586, %590 : vector<8x32xf32>
    %592 = arith.index_cast %c7_i32_163 : i32 to index
    %c0_181 = arith.constant 0 : index
    %c0_182 = arith.constant 0 : index
    %593 = vector.load %arg21[%592, %c0_181, %c0_182] : memref<8x8x32xf32, #tpu.memory_space<vmem>>, vector<1x8x32xf32>
    %594 = vector.shape_cast %593 : vector<1x8x32xf32> to vector<8x32xf32>
    %595 = vector.shape_cast %562 : vector<8x32xf32> to vector<1x8x32xf32>
    tpu.vector_store %arg21[%592, %c0_181, %c0_182], %595 {strides = array<i32>} : memref<8x8x32xf32, #tpu.memory_space<vmem>>, vector<1x8x32xf32>,
    %596 = arith.index_cast %527 : i32 to index
    %c0_183 = arith.constant 0 : index
    %c0_184 = arith.constant 0 : index
    %597 = vector.load %arg22[%596, %c0_183, %c0_184] : memref<8x8x32xf32, #tpu.memory_space<vmem>>, vector<1x8x32xf32>
    %598 = vector.shape_cast %597 : vector<1x8x32xf32> to vector<8x32xf32>
    %599 = vector.shape_cast %591 : vector<8x32xf32> to vector<1x8x32xf32>
    tpu.vector_store %arg22[%596, %c0_183, %c0_184], %599 {strides = array<i32>} : memref<8x8x32xf32, #tpu.memory_space<vmem>>, vector<1x8x32xf32>,
    %c8_i32 = arith.constant 8 : i32
    %c0_185 = arith.constant 0 : index
    %c0_186 = arith.constant 0 : index
    %c0_187 = arith.constant 0 : index
    %600 = vector.load %arg21[%c0_185, %c0_186, %c0_187] : memref<8x8x32xf32, #tpu.memory_space<vmem>>, vector<8x8x32xf32>
    %601 = vector.shape_cast %600 : vector<8x8x32xf32> to vector<64x32xf32>
    %602 = arith.truncf %601 : vector<64x32xf32> to vector<64x32xbf16>
    %c0_188 = arith.constant 0 : index
    %c0_189 = arith.constant 0 : index
    %c0_190 = arith.constant 0 : index
    %603 = vector.load %arg22[%c0_188, %c0_189, %c0_190] : memref<8x8x32xf32, #tpu.memory_space<vmem>>, vector<8x8x32xf32>
    %604 = vector.shape_cast %603 : vector<8x8x32xf32> to vector<64x32xf32>
    %605 = arith.truncf %604 : vector<64x32xf32> to vector<64x32xbf16>
    %c0_191 = arith.constant 0 : index
    %c0_192 = arith.constant 0 : index
    %606 = vector.load %arg7[%c0_191, %c0_192] : memref<32x96xbf16, #tpu.memory_space<vmem>>, vector<32x96xbf16>
    %cst_193 = arith.constant dense<0.000000e+00> : vector<64x96xf32>
    %607 = tpu.matmul %602, %606, %cst_193 {dimension_numbers = #tpu.dot_dimension_numbers<[1], [0], [0], [1], [0, 0, 1, 1], [], []>} : vector<64x32xbf16>, vector<32x96xbf16>, vector<64x96xf32> -> vector<64x96xf32>
    %c0_194 = arith.constant 0 : index
    %c0_195 = arith.constant 0 : index
    %608 = vector.load %arg8[%c0_194, %c0_195] : memref<32x96xbf16, #tpu.memory_space<vmem>>, vector<32x96xbf16>
    %cst_196 = arith.constant dense<0.000000e+00> : vector<64x96xf32>
    %609 = tpu.matmul %605, %608, %cst_196 {dimension_numbers = #tpu.dot_dimension_numbers<[1], [0], [0], [1], [0, 0, 1, 1], [], []>} : vector<64x32xbf16>, vector<32x96xbf16>, vector<64x96xf32> -> vector<64x96xf32>
    %610 = arith.addf %607, %609 : vector<64x96xf32>
    %c0_197 = arith.constant 0 : index
    %c0_198 = arith.constant 0 : index
    %611 = vector.load %arg13[%c0_197, %c0_198] : memref<1x96xf32, #tpu.memory_space<vmem>>, vector<1x96xf32>
    %612 = vector.broadcast %611 : vector<1x96xf32> to vector<64x96xf32>
    %613 = arith.addf %610, %612 : vector<64x96xf32>
    %614 = vector.shape_cast %613 : vector<64x96xf32> to vector<8x8x96xf32>
    %c0_199 = arith.constant 0 : index
    %c0_200 = arith.constant 0 : index
    %c0_201 = arith.constant 0 : index
    %615 = vector.load %arg23[%c0_199, %c0_200, %c0_201] : memref<8x8x96xf32, #tpu.memory_space<vmem>>, vector<8x8x96xf32>
    tpu.vector_store %arg23[%c0_199, %c0_200, %c0_201], %614 {strides = array<i32>} : memref<8x8x96xf32, #tpu.memory_space<vmem>>, vector<8x8x96xf32>,
    %c0_202 = arith.constant 0 : index
    %c0_203 = arith.constant 0 : index
    %616 = vector.load %arg9[%c0_202, %c0_203] : memref<32x96xbf16, #tpu.memory_space<vmem>>, vector<32x96xbf16>
    %cst_204 = arith.constant dense<0.000000e+00> : vector<64x96xf32>
    %617 = tpu.matmul %602, %616, %cst_204 {dimension_numbers = #tpu.dot_dimension_numbers<[1], [0], [0], [1], [0, 0, 1, 1], [], []>} : vector<64x32xbf16>, vector<32x96xbf16>, vector<64x96xf32> -> vector<64x96xf32>
    %c0_205 = arith.constant 0 : index
    %c0_206 = arith.constant 0 : index
    %618 = vector.load %arg10[%c0_205, %c0_206] : memref<32x96xbf16, #tpu.memory_space<vmem>>, vector<32x96xbf16>
    %cst_207 = arith.constant dense<0.000000e+00> : vector<64x96xf32>
    %619 = tpu.matmul %605, %618, %cst_207 {dimension_numbers = #tpu.dot_dimension_numbers<[1], [0], [0], [1], [0, 0, 1, 1], [], []>} : vector<64x32xbf16>, vector<32x96xbf16>, vector<64x96xf32> -> vector<64x96xf32>
    %620 = arith.addf %617, %619 : vector<64x96xf32>
    %c0_208 = arith.constant 0 : index
    %c0_209 = arith.constant 0 : index
    %621 = vector.load %arg14[%c0_208, %c0_209] : memref<1x96xf32, #tpu.memory_space<vmem>>, vector<1x96xf32>
    %622 = vector.broadcast %621 : vector<1x96xf32> to vector<64x96xf32>
    %623 = arith.addf %620, %622 : vector<64x96xf32>
    %624 = vector.shape_cast %623 : vector<64x96xf32> to vector<8x8x96xf32>
    %c0_210 = arith.constant 0 : index
    %c0_211 = arith.constant 0 : index
    %c0_212 = arith.constant 0 : index
    %625 = vector.load %arg24[%c0_210, %c0_211, %c0_212] : memref<8x8x96xf32, #tpu.memory_space<vmem>>, vector<8x8x96xf32>
    tpu.vector_store %arg24[%c0_210, %c0_211, %c0_212], %624 {strides = array<i32>} : memref<8x8x96xf32, #tpu.memory_space<vmem>>, vector<8x8x96xf32>,
    %c0_213 = arith.constant 0 : index
    %c0_214 = arith.constant 0 : index
    %626 = vector.load %arg15[%c0_213, %c0_214] : memref<1x32xf32, #tpu.memory_space<vmem>>, vector<1x32xf32>
    %627 = vector.shape_cast %626 : vector<1x32xf32> to vector<1x32xf32>
    %628 = vector.broadcast %627 : vector<1x32xf32> to vector<8x32xf32>
    %c0_215 = arith.constant 0 : index
    %c0_216 = arith.constant 0 : index
    %629 = vector.load %arg16[%c0_215, %c0_216] : memref<1x32xf32, #tpu.memory_space<vmem>>, vector<1x32xf32>
    %630 = vector.shape_cast %629 : vector<1x32xf32> to vector<1x32xf32>
    %631 = vector.broadcast %630 : vector<1x32xf32> to vector<8x32xf32>
    %c0_i32_217 = arith.constant 0 : i32
    %c7_i32_218 = arith.constant 7 : i32
    %632 = arith.subi %c7_i32_218, %c0_i32_217 : i32
    %633 = arith.truncf %15 : vector<8x32xf32> to vector<8x32xbf16>
    %c0_219 = arith.constant 0 : index
    %c0_220 = arith.constant 0 : index
    %634 = vector.load %arg11[%c0_219, %c0_220] : memref<32x96xbf16, #tpu.memory_space<vmem>>, vector<32x96xbf16>
    %cst_221 = arith.constant dense<0.000000e+00> : vector<8x96xf32>
    %635 = tpu.matmul %633, %634, %cst_221 {dimension_numbers = #tpu.dot_dimension_numbers<[1], [0], [0], [1], [0, 0, 1, 1], [], []>} : vector<8x32xbf16>, vector<32x96xbf16>, vector<8x96xf32> -> vector<8x96xf32>
    %636 = arith.truncf %15 : vector<8x32xf32> to vector<8x32xbf16>
    %c0_222 = arith.constant 0 : index
    %c0_223 = arith.constant 0 : index
    %637 = vector.load %arg12[%c0_222, %c0_223] : memref<32x96xbf16, #tpu.memory_space<vmem>>, vector<32x96xbf16>
    %cst_224 = arith.constant dense<0.000000e+00> : vector<8x96xf32>
    %638 = tpu.matmul %636, %637, %cst_224 {dimension_numbers = #tpu.dot_dimension_numbers<[1], [0], [0], [1], [0, 0, 1, 1], [], []>} : vector<8x32xbf16>, vector<32x96xbf16>, vector<8x96xf32> -> vector<8x96xf32>
    %639 = arith.index_cast %c0_i32_217 : i32 to index
    %c0_225 = arith.constant 0 : index
    %c0_226 = arith.constant 0 : index
    %640 = vector.load %arg23[%639, %c0_225, %c0_226] : memref<8x8x96xf32, #tpu.memory_space<vmem>>, vector<1x8x96xf32>
    %641 = vector.shape_cast %640 : vector<1x8x96xf32> to vector<8x96xf32>
    %642 = vector.extract_strided_slice %641 {offsets = [0, 0], sizes = [8, 32], strides = [1, 1]} : vector<8x96xf32> to vector<8x32xf32>
    %643 = vector.extract_strided_slice %635 {offsets = [0, 0], sizes = [8, 32], strides = [1, 1]} : vector<8x96xf32> to vector<8x32xf32>
    %644 = arith.addf %642, %643 : vector<8x32xf32>
    %645 = arith.negf %644 : vector<8x32xf32>
    %646 = math.exp %645 : vector<8x32xf32>
    %cst_227 = arith.constant 1.000000e+00 : f32
    %647 = vector.broadcast %cst_227 : f32 to vector<8x32xf32>
    %648 = arith.addf %647, %646 : vector<8x32xf32>
    %649 = arith.divf %647, %648 : vector<8x32xf32>
    %650 = vector.extract_strided_slice %641 {offsets = [0, 32], sizes = [8, 32], strides = [1, 1]} : vector<8x96xf32> to vector<8x32xf32>
    %651 = vector.extract_strided_slice %635 {offsets = [0, 32], sizes = [8, 32], strides = [1, 1]} : vector<8x96xf32> to vector<8x32xf32>
    %652 = arith.addf %650, %651 : vector<8x32xf32>
    %653 = arith.negf %652 : vector<8x32xf32>
    %654 = math.exp %653 : vector<8x32xf32>
    %cst_228 = arith.constant 1.000000e+00 : f32
    %655 = vector.broadcast %cst_228 : f32 to vector<8x32xf32>
    %656 = arith.addf %655, %654 : vector<8x32xf32>
    %657 = arith.divf %655, %656 : vector<8x32xf32>
    %658 = vector.extract_strided_slice %641 {offsets = [0, 64], sizes = [8, 32], strides = [1, 1]} : vector<8x96xf32> to vector<8x32xf32>
    %659 = vector.extract_strided_slice %635 {offsets = [0, 64], sizes = [8, 32], strides = [1, 1]} : vector<8x96xf32> to vector<8x32xf32>
    %660 = arith.addf %659, %628 : vector<8x32xf32>
    %661 = arith.mulf %649, %660 : vector<8x32xf32>
    %662 = arith.addf %658, %661 : vector<8x32xf32>
    %663 = math.tanh %662 : vector<8x32xf32>
    %cst_229 = arith.constant 1.000000e+00 : f32
    %664 = vector.broadcast %cst_229 : f32 to vector<8x32xf32>
    %665 = arith.subf %664, %657 : vector<8x32xf32>
    %666 = arith.mulf %665, %663 : vector<8x32xf32>
    %667 = arith.mulf %657, %15 : vector<8x32xf32>
    %668 = arith.addf %666, %667 : vector<8x32xf32>
    %669 = arith.index_cast %632 : i32 to index
    %c0_230 = arith.constant 0 : index
    %c0_231 = arith.constant 0 : index
    %670 = vector.load %arg24[%669, %c0_230, %c0_231] : memref<8x8x96xf32, #tpu.memory_space<vmem>>, vector<1x8x96xf32>
    %671 = vector.shape_cast %670 : vector<1x8x96xf32> to vector<8x96xf32>
    %672 = vector.extract_strided_slice %671 {offsets = [0, 0], sizes = [8, 32], strides = [1, 1]} : vector<8x96xf32> to vector<8x32xf32>
    %673 = vector.extract_strided_slice %638 {offsets = [0, 0], sizes = [8, 32], strides = [1, 1]} : vector<8x96xf32> to vector<8x32xf32>
    %674 = arith.addf %672, %673 : vector<8x32xf32>
    %675 = arith.negf %674 : vector<8x32xf32>
    %676 = math.exp %675 : vector<8x32xf32>
    %cst_232 = arith.constant 1.000000e+00 : f32
    %677 = vector.broadcast %cst_232 : f32 to vector<8x32xf32>
    %678 = arith.addf %677, %676 : vector<8x32xf32>
    %679 = arith.divf %677, %678 : vector<8x32xf32>
    %680 = vector.extract_strided_slice %671 {offsets = [0, 32], sizes = [8, 32], strides = [1, 1]} : vector<8x96xf32> to vector<8x32xf32>
    %681 = vector.extract_strided_slice %638 {offsets = [0, 32], sizes = [8, 32], strides = [1, 1]} : vector<8x96xf32> to vector<8x32xf32>
    %682 = arith.addf %680, %681 : vector<8x32xf32>
    %683 = arith.negf %682 : vector<8x32xf32>
    %684 = math.exp %683 : vector<8x32xf32>
    %cst_233 = arith.constant 1.000000e+00 : f32
    %685 = vector.broadcast %cst_233 : f32 to vector<8x32xf32>
    %686 = arith.addf %685, %684 : vector<8x32xf32>
    %687 = arith.divf %685, %686 : vector<8x32xf32>
    %688 = vector.extract_strided_slice %671 {offsets = [0, 64], sizes = [8, 32], strides = [1, 1]} : vector<8x96xf32> to vector<8x32xf32>
    %689 = vector.extract_strided_slice %638 {offsets = [0, 64], sizes = [8, 32], strides = [1, 1]} : vector<8x96xf32> to vector<8x32xf32>
    %690 = arith.addf %689, %631 : vector<8x32xf32>
    %691 = arith.mulf %679, %690 : vector<8x32xf32>
    %692 = arith.addf %688, %691 : vector<8x32xf32>
    %693 = math.tanh %692 : vector<8x32xf32>
    %cst_234 = arith.constant 1.000000e+00 : f32
    %694 = vector.broadcast %cst_234 : f32 to vector<8x32xf32>
    %695 = arith.subf %694, %687 : vector<8x32xf32>
    %696 = arith.mulf %695, %693 : vector<8x32xf32>
    %697 = arith.mulf %687, %15 : vector<8x32xf32>
    %698 = arith.addf %696, %697 : vector<8x32xf32>
    %699 = arith.index_cast %c0_i32_217 : i32 to index
    %c0_235 = arith.constant 0 : index
    %c0_236 = arith.constant 0 : index
    %700 = vector.load %arg17[%699, %c0_235, %c0_236] : memref<8x8x32xf32, #tpu.memory_space<vmem>>, vector<1x8x32xf32>
    %701 = vector.shape_cast %700 : vector<1x8x32xf32> to vector<8x32xf32>
    %702 = vector.shape_cast %668 : vector<8x32xf32> to vector<1x8x32xf32>
    tpu.vector_store %arg17[%699, %c0_235, %c0_236], %702 {strides = array<i32>} : memref<8x8x32xf32, #tpu.memory_space<vmem>>, vector<1x8x32xf32>,
    %703 = arith.index_cast %632 : i32 to index
    %c0_237 = arith.constant 0 : index
    %c0_238 = arith.constant 0 : index
    %704 = vector.load %arg18[%703, %c0_237, %c0_238] : memref<8x8x32xf32, #tpu.memory_space<vmem>>, vector<1x8x32xf32>
    %705 = vector.shape_cast %704 : vector<1x8x32xf32> to vector<8x32xf32>
    %706 = vector.shape_cast %698 : vector<8x32xf32> to vector<1x8x32xf32>
    tpu.vector_store %arg18[%703, %c0_237, %c0_238], %706 {strides = array<i32>} : memref<8x8x32xf32, #tpu.memory_space<vmem>>, vector<1x8x32xf32>,
    %c1_i32_239 = arith.constant 1 : i32
    %c7_i32_240 = arith.constant 7 : i32
    %707 = arith.subi %c7_i32_240, %c1_i32_239 : i32
    %708 = arith.truncf %668 : vector<8x32xf32> to vector<8x32xbf16>
    %c0_241 = arith.constant 0 : index
    %c0_242 = arith.constant 0 : index
    %709 = vector.load %arg11[%c0_241, %c0_242] : memref<32x96xbf16, #tpu.memory_space<vmem>>, vector<32x96xbf16>
    %cst_243 = arith.constant dense<0.000000e+00> : vector<8x96xf32>
    %710 = tpu.matmul %708, %709, %cst_243 {dimension_numbers = #tpu.dot_dimension_numbers<[1], [0], [0], [1], [0, 0, 1, 1], [], []>} : vector<8x32xbf16>, vector<32x96xbf16>, vector<8x96xf32> -> vector<8x96xf32>
    %711 = arith.truncf %698 : vector<8x32xf32> to vector<8x32xbf16>
    %c0_244 = arith.constant 0 : index
    %c0_245 = arith.constant 0 : index
    %712 = vector.load %arg12[%c0_244, %c0_245] : memref<32x96xbf16, #tpu.memory_space<vmem>>, vector<32x96xbf16>
    %cst_246 = arith.constant dense<0.000000e+00> : vector<8x96xf32>
    %713 = tpu.matmul %711, %712, %cst_246 {dimension_numbers = #tpu.dot_dimension_numbers<[1], [0], [0], [1], [0, 0, 1, 1], [], []>} : vector<8x32xbf16>, vector<32x96xbf16>, vector<8x96xf32> -> vector<8x96xf32>
    %714 = arith.index_cast %c1_i32_239 : i32 to index
    %c0_247 = arith.constant 0 : index
    %c0_248 = arith.constant 0 : index
    %715 = vector.load %arg23[%714, %c0_247, %c0_248] : memref<8x8x96xf32, #tpu.memory_space<vmem>>, vector<1x8x96xf32>
    %716 = vector.shape_cast %715 : vector<1x8x96xf32> to vector<8x96xf32>
    %717 = vector.extract_strided_slice %716 {offsets = [0, 0], sizes = [8, 32], strides = [1, 1]} : vector<8x96xf32> to vector<8x32xf32>
    %718 = vector.extract_strided_slice %710 {offsets = [0, 0], sizes = [8, 32], strides = [1, 1]} : vector<8x96xf32> to vector<8x32xf32>
    %719 = arith.addf %717, %718 : vector<8x32xf32>
    %720 = arith.negf %719 : vector<8x32xf32>
    %721 = math.exp %720 : vector<8x32xf32>
    %cst_249 = arith.constant 1.000000e+00 : f32
    %722 = vector.broadcast %cst_249 : f32 to vector<8x32xf32>
    %723 = arith.addf %722, %721 : vector<8x32xf32>
    %724 = arith.divf %722, %723 : vector<8x32xf32>
    %725 = vector.extract_strided_slice %716 {offsets = [0, 32], sizes = [8, 32], strides = [1, 1]} : vector<8x96xf32> to vector<8x32xf32>
    %726 = vector.extract_strided_slice %710 {offsets = [0, 32], sizes = [8, 32], strides = [1, 1]} : vector<8x96xf32> to vector<8x32xf32>
    %727 = arith.addf %725, %726 : vector<8x32xf32>
    %728 = arith.negf %727 : vector<8x32xf32>
    %729 = math.exp %728 : vector<8x32xf32>
    %cst_250 = arith.constant 1.000000e+00 : f32
    %730 = vector.broadcast %cst_250 : f32 to vector<8x32xf32>
    %731 = arith.addf %730, %729 : vector<8x32xf32>
    %732 = arith.divf %730, %731 : vector<8x32xf32>
    %733 = vector.extract_strided_slice %716 {offsets = [0, 64], sizes = [8, 32], strides = [1, 1]} : vector<8x96xf32> to vector<8x32xf32>
    %734 = vector.extract_strided_slice %710 {offsets = [0, 64], sizes = [8, 32], strides = [1, 1]} : vector<8x96xf32> to vector<8x32xf32>
    %735 = arith.addf %734, %628 : vector<8x32xf32>
    %736 = arith.mulf %724, %735 : vector<8x32xf32>
    %737 = arith.addf %733, %736 : vector<8x32xf32>
    %738 = math.tanh %737 : vector<8x32xf32>
    %cst_251 = arith.constant 1.000000e+00 : f32
    %739 = vector.broadcast %cst_251 : f32 to vector<8x32xf32>
    %740 = arith.subf %739, %732 : vector<8x32xf32>
    %741 = arith.mulf %740, %738 : vector<8x32xf32>
    %742 = arith.mulf %732, %668 : vector<8x32xf32>
    %743 = arith.addf %741, %742 : vector<8x32xf32>
    %744 = arith.index_cast %707 : i32 to index
    %c0_252 = arith.constant 0 : index
    %c0_253 = arith.constant 0 : index
    %745 = vector.load %arg24[%744, %c0_252, %c0_253] : memref<8x8x96xf32, #tpu.memory_space<vmem>>, vector<1x8x96xf32>
    %746 = vector.shape_cast %745 : vector<1x8x96xf32> to vector<8x96xf32>
    %747 = vector.extract_strided_slice %746 {offsets = [0, 0], sizes = [8, 32], strides = [1, 1]} : vector<8x96xf32> to vector<8x32xf32>
    %748 = vector.extract_strided_slice %713 {offsets = [0, 0], sizes = [8, 32], strides = [1, 1]} : vector<8x96xf32> to vector<8x32xf32>
    %749 = arith.addf %747, %748 : vector<8x32xf32>
    %750 = arith.negf %749 : vector<8x32xf32>
    %751 = math.exp %750 : vector<8x32xf32>
    %cst_254 = arith.constant 1.000000e+00 : f32
    %752 = vector.broadcast %cst_254 : f32 to vector<8x32xf32>
    %753 = arith.addf %752, %751 : vector<8x32xf32>
    %754 = arith.divf %752, %753 : vector<8x32xf32>
    %755 = vector.extract_strided_slice %746 {offsets = [0, 32], sizes = [8, 32], strides = [1, 1]} : vector<8x96xf32> to vector<8x32xf32>
    %756 = vector.extract_strided_slice %713 {offsets = [0, 32], sizes = [8, 32], strides = [1, 1]} : vector<8x96xf32> to vector<8x32xf32>
    %757 = arith.addf %755, %756 : vector<8x32xf32>
    %758 = arith.negf %757 : vector<8x32xf32>
    %759 = math.exp %758 : vector<8x32xf32>
    %cst_255 = arith.constant 1.000000e+00 : f32
    %760 = vector.broadcast %cst_255 : f32 to vector<8x32xf32>
    %761 = arith.addf %760, %759 : vector<8x32xf32>
    %762 = arith.divf %760, %761 : vector<8x32xf32>
    %763 = vector.extract_strided_slice %746 {offsets = [0, 64], sizes = [8, 32], strides = [1, 1]} : vector<8x96xf32> to vector<8x32xf32>
    %764 = vector.extract_strided_slice %713 {offsets = [0, 64], sizes = [8, 32], strides = [1, 1]} : vector<8x96xf32> to vector<8x32xf32>
    %765 = arith.addf %764, %631 : vector<8x32xf32>
    %766 = arith.mulf %754, %765 : vector<8x32xf32>
    %767 = arith.addf %763, %766 : vector<8x32xf32>
    %768 = math.tanh %767 : vector<8x32xf32>
    %cst_256 = arith.constant 1.000000e+00 : f32
    %769 = vector.broadcast %cst_256 : f32 to vector<8x32xf32>
    %770 = arith.subf %769, %762 : vector<8x32xf32>
    %771 = arith.mulf %770, %768 : vector<8x32xf32>
    %772 = arith.mulf %762, %698 : vector<8x32xf32>
    %773 = arith.addf %771, %772 : vector<8x32xf32>
    %774 = arith.index_cast %c1_i32_239 : i32 to index
    %c0_257 = arith.constant 0 : index
    %c0_258 = arith.constant 0 : index
    %775 = vector.load %arg17[%774, %c0_257, %c0_258] : memref<8x8x32xf32, #tpu.memory_space<vmem>>, vector<1x8x32xf32>
    %776 = vector.shape_cast %775 : vector<1x8x32xf32> to vector<8x32xf32>
    %777 = vector.shape_cast %743 : vector<8x32xf32> to vector<1x8x32xf32>
    tpu.vector_store %arg17[%774, %c0_257, %c0_258], %777 {strides = array<i32>} : memref<8x8x32xf32, #tpu.memory_space<vmem>>, vector<1x8x32xf32>,
    %778 = arith.index_cast %707 : i32 to index
    %c0_259 = arith.constant 0 : index
    %c0_260 = arith.constant 0 : index
    %779 = vector.load %arg18[%778, %c0_259, %c0_260] : memref<8x8x32xf32, #tpu.memory_space<vmem>>, vector<1x8x32xf32>
    %780 = vector.shape_cast %779 : vector<1x8x32xf32> to vector<8x32xf32>
    %781 = vector.shape_cast %773 : vector<8x32xf32> to vector<1x8x32xf32>
    tpu.vector_store %arg18[%778, %c0_259, %c0_260], %781 {strides = array<i32>} : memref<8x8x32xf32, #tpu.memory_space<vmem>>, vector<1x8x32xf32>,
    %c2_i32_261 = arith.constant 2 : i32
    %c7_i32_262 = arith.constant 7 : i32
    %782 = arith.subi %c7_i32_262, %c2_i32_261 : i32
    %783 = arith.truncf %743 : vector<8x32xf32> to vector<8x32xbf16>
    %c0_263 = arith.constant 0 : index
    %c0_264 = arith.constant 0 : index
    %784 = vector.load %arg11[%c0_263, %c0_264] : memref<32x96xbf16, #tpu.memory_space<vmem>>, vector<32x96xbf16>
    %cst_265 = arith.constant dense<0.000000e+00> : vector<8x96xf32>
    %785 = tpu.matmul %783, %784, %cst_265 {dimension_numbers = #tpu.dot_dimension_numbers<[1], [0], [0], [1], [0, 0, 1, 1], [], []>} : vector<8x32xbf16>, vector<32x96xbf16>, vector<8x96xf32> -> vector<8x96xf32>
    %786 = arith.truncf %773 : vector<8x32xf32> to vector<8x32xbf16>
    %c0_266 = arith.constant 0 : index
    %c0_267 = arith.constant 0 : index
    %787 = vector.load %arg12[%c0_266, %c0_267] : memref<32x96xbf16, #tpu.memory_space<vmem>>, vector<32x96xbf16>
    %cst_268 = arith.constant dense<0.000000e+00> : vector<8x96xf32>
    %788 = tpu.matmul %786, %787, %cst_268 {dimension_numbers = #tpu.dot_dimension_numbers<[1], [0], [0], [1], [0, 0, 1, 1], [], []>} : vector<8x32xbf16>, vector<32x96xbf16>, vector<8x96xf32> -> vector<8x96xf32>
    %789 = arith.index_cast %c2_i32_261 : i32 to index
    %c0_269 = arith.constant 0 : index
    %c0_270 = arith.constant 0 : index
    %790 = vector.load %arg23[%789, %c0_269, %c0_270] : memref<8x8x96xf32, #tpu.memory_space<vmem>>, vector<1x8x96xf32>
    %791 = vector.shape_cast %790 : vector<1x8x96xf32> to vector<8x96xf32>
    %792 = vector.extract_strided_slice %791 {offsets = [0, 0], sizes = [8, 32], strides = [1, 1]} : vector<8x96xf32> to vector<8x32xf32>
    %793 = vector.extract_strided_slice %785 {offsets = [0, 0], sizes = [8, 32], strides = [1, 1]} : vector<8x96xf32> to vector<8x32xf32>
    %794 = arith.addf %792, %793 : vector<8x32xf32>
    %795 = arith.negf %794 : vector<8x32xf32>
    %796 = math.exp %795 : vector<8x32xf32>
    %cst_271 = arith.constant 1.000000e+00 : f32
    %797 = vector.broadcast %cst_271 : f32 to vector<8x32xf32>
    %798 = arith.addf %797, %796 : vector<8x32xf32>
    %799 = arith.divf %797, %798 : vector<8x32xf32>
    %800 = vector.extract_strided_slice %791 {offsets = [0, 32], sizes = [8, 32], strides = [1, 1]} : vector<8x96xf32> to vector<8x32xf32>
    %801 = vector.extract_strided_slice %785 {offsets = [0, 32], sizes = [8, 32], strides = [1, 1]} : vector<8x96xf32> to vector<8x32xf32>
    %802 = arith.addf %800, %801 : vector<8x32xf32>
    %803 = arith.negf %802 : vector<8x32xf32>
    %804 = math.exp %803 : vector<8x32xf32>
    %cst_272 = arith.constant 1.000000e+00 : f32
    %805 = vector.broadcast %cst_272 : f32 to vector<8x32xf32>
    %806 = arith.addf %805, %804 : vector<8x32xf32>
    %807 = arith.divf %805, %806 : vector<8x32xf32>
    %808 = vector.extract_strided_slice %791 {offsets = [0, 64], sizes = [8, 32], strides = [1, 1]} : vector<8x96xf32> to vector<8x32xf32>
    %809 = vector.extract_strided_slice %785 {offsets = [0, 64], sizes = [8, 32], strides = [1, 1]} : vector<8x96xf32> to vector<8x32xf32>
    %810 = arith.addf %809, %628 : vector<8x32xf32>
    %811 = arith.mulf %799, %810 : vector<8x32xf32>
    %812 = arith.addf %808, %811 : vector<8x32xf32>
    %813 = math.tanh %812 : vector<8x32xf32>
    %cst_273 = arith.constant 1.000000e+00 : f32
    %814 = vector.broadcast %cst_273 : f32 to vector<8x32xf32>
    %815 = arith.subf %814, %807 : vector<8x32xf32>
    %816 = arith.mulf %815, %813 : vector<8x32xf32>
    %817 = arith.mulf %807, %743 : vector<8x32xf32>
    %818 = arith.addf %816, %817 : vector<8x32xf32>
    %819 = arith.index_cast %782 : i32 to index
    %c0_274 = arith.constant 0 : index
    %c0_275 = arith.constant 0 : index
    %820 = vector.load %arg24[%819, %c0_274, %c0_275] : memref<8x8x96xf32, #tpu.memory_space<vmem>>, vector<1x8x96xf32>
    %821 = vector.shape_cast %820 : vector<1x8x96xf32> to vector<8x96xf32>
    %822 = vector.extract_strided_slice %821 {offsets = [0, 0], sizes = [8, 32], strides = [1, 1]} : vector<8x96xf32> to vector<8x32xf32>
    %823 = vector.extract_strided_slice %788 {offsets = [0, 0], sizes = [8, 32], strides = [1, 1]} : vector<8x96xf32> to vector<8x32xf32>
    %824 = arith.addf %822, %823 : vector<8x32xf32>
    %825 = arith.negf %824 : vector<8x32xf32>
    %826 = math.exp %825 : vector<8x32xf32>
    %cst_276 = arith.constant 1.000000e+00 : f32
    %827 = vector.broadcast %cst_276 : f32 to vector<8x32xf32>
    %828 = arith.addf %827, %826 : vector<8x32xf32>
    %829 = arith.divf %827, %828 : vector<8x32xf32>
    %830 = vector.extract_strided_slice %821 {offsets = [0, 32], sizes = [8, 32], strides = [1, 1]} : vector<8x96xf32> to vector<8x32xf32>
    %831 = vector.extract_strided_slice %788 {offsets = [0, 32], sizes = [8, 32], strides = [1, 1]} : vector<8x96xf32> to vector<8x32xf32>
    %832 = arith.addf %830, %831 : vector<8x32xf32>
    %833 = arith.negf %832 : vector<8x32xf32>
    %834 = math.exp %833 : vector<8x32xf32>
    %cst_277 = arith.constant 1.000000e+00 : f32
    %835 = vector.broadcast %cst_277 : f32 to vector<8x32xf32>
    %836 = arith.addf %835, %834 : vector<8x32xf32>
    %837 = arith.divf %835, %836 : vector<8x32xf32>
    %838 = vector.extract_strided_slice %821 {offsets = [0, 64], sizes = [8, 32], strides = [1, 1]} : vector<8x96xf32> to vector<8x32xf32>
    %839 = vector.extract_strided_slice %788 {offsets = [0, 64], sizes = [8, 32], strides = [1, 1]} : vector<8x96xf32> to vector<8x32xf32>
    %840 = arith.addf %839, %631 : vector<8x32xf32>
    %841 = arith.mulf %829, %840 : vector<8x32xf32>
    %842 = arith.addf %838, %841 : vector<8x32xf32>
    %843 = math.tanh %842 : vector<8x32xf32>
    %cst_278 = arith.constant 1.000000e+00 : f32
    %844 = vector.broadcast %cst_278 : f32 to vector<8x32xf32>
    %845 = arith.subf %844, %837 : vector<8x32xf32>
    %846 = arith.mulf %845, %843 : vector<8x32xf32>
    %847 = arith.mulf %837, %773 : vector<8x32xf32>
    %848 = arith.addf %846, %847 : vector<8x32xf32>
    %849 = arith.index_cast %c2_i32_261 : i32 to index
    %c0_279 = arith.constant 0 : index
    %c0_280 = arith.constant 0 : index
    %850 = vector.load %arg17[%849, %c0_279, %c0_280] : memref<8x8x32xf32, #tpu.memory_space<vmem>>, vector<1x8x32xf32>
    %851 = vector.shape_cast %850 : vector<1x8x32xf32> to vector<8x32xf32>
    %852 = vector.shape_cast %818 : vector<8x32xf32> to vector<1x8x32xf32>
    tpu.vector_store %arg17[%849, %c0_279, %c0_280], %852 {strides = array<i32>} : memref<8x8x32xf32, #tpu.memory_space<vmem>>, vector<1x8x32xf32>,
    %853 = arith.index_cast %782 : i32 to index
    %c0_281 = arith.constant 0 : index
    %c0_282 = arith.constant 0 : index
    %854 = vector.load %arg18[%853, %c0_281, %c0_282] : memref<8x8x32xf32, #tpu.memory_space<vmem>>, vector<1x8x32xf32>
    %855 = vector.shape_cast %854 : vector<1x8x32xf32> to vector<8x32xf32>
    %856 = vector.shape_cast %848 : vector<8x32xf32> to vector<1x8x32xf32>
    tpu.vector_store %arg18[%853, %c0_281, %c0_282], %856 {strides = array<i32>} : memref<8x8x32xf32, #tpu.memory_space<vmem>>, vector<1x8x32xf32>,
    %c3_i32_283 = arith.constant 3 : i32
    %c7_i32_284 = arith.constant 7 : i32
    %857 = arith.subi %c7_i32_284, %c3_i32_283 : i32
    %858 = arith.truncf %818 : vector<8x32xf32> to vector<8x32xbf16>
    %c0_285 = arith.constant 0 : index
    %c0_286 = arith.constant 0 : index
    %859 = vector.load %arg11[%c0_285, %c0_286] : memref<32x96xbf16, #tpu.memory_space<vmem>>, vector<32x96xbf16>
    %cst_287 = arith.constant dense<0.000000e+00> : vector<8x96xf32>
    %860 = tpu.matmul %858, %859, %cst_287 {dimension_numbers = #tpu.dot_dimension_numbers<[1], [0], [0], [1], [0, 0, 1, 1], [], []>} : vector<8x32xbf16>, vector<32x96xbf16>, vector<8x96xf32> -> vector<8x96xf32>
    %861 = arith.truncf %848 : vector<8x32xf32> to vector<8x32xbf16>
    %c0_288 = arith.constant 0 : index
    %c0_289 = arith.constant 0 : index
    %862 = vector.load %arg12[%c0_288, %c0_289] : memref<32x96xbf16, #tpu.memory_space<vmem>>, vector<32x96xbf16>
    %cst_290 = arith.constant dense<0.000000e+00> : vector<8x96xf32>
    %863 = tpu.matmul %861, %862, %cst_290 {dimension_numbers = #tpu.dot_dimension_numbers<[1], [0], [0], [1], [0, 0, 1, 1], [], []>} : vector<8x32xbf16>, vector<32x96xbf16>, vector<8x96xf32> -> vector<8x96xf32>
    %864 = arith.index_cast %c3_i32_283 : i32 to index
    %c0_291 = arith.constant 0 : index
    %c0_292 = arith.constant 0 : index
    %865 = vector.load %arg23[%864, %c0_291, %c0_292] : memref<8x8x96xf32, #tpu.memory_space<vmem>>, vector<1x8x96xf32>
    %866 = vector.shape_cast %865 : vector<1x8x96xf32> to vector<8x96xf32>
    %867 = vector.extract_strided_slice %866 {offsets = [0, 0], sizes = [8, 32], strides = [1, 1]} : vector<8x96xf32> to vector<8x32xf32>
    %868 = vector.extract_strided_slice %860 {offsets = [0, 0], sizes = [8, 32], strides = [1, 1]} : vector<8x96xf32> to vector<8x32xf32>
    %869 = arith.addf %867, %868 : vector<8x32xf32>
    %870 = arith.negf %869 : vector<8x32xf32>
    %871 = math.exp %870 : vector<8x32xf32>
    %cst_293 = arith.constant 1.000000e+00 : f32
    %872 = vector.broadcast %cst_293 : f32 to vector<8x32xf32>
    %873 = arith.addf %872, %871 : vector<8x32xf32>
    %874 = arith.divf %872, %873 : vector<8x32xf32>
    %875 = vector.extract_strided_slice %866 {offsets = [0, 32], sizes = [8, 32], strides = [1, 1]} : vector<8x96xf32> to vector<8x32xf32>
    %876 = vector.extract_strided_slice %860 {offsets = [0, 32], sizes = [8, 32], strides = [1, 1]} : vector<8x96xf32> to vector<8x32xf32>
    %877 = arith.addf %875, %876 : vector<8x32xf32>
    %878 = arith.negf %877 : vector<8x32xf32>
    %879 = math.exp %878 : vector<8x32xf32>
    %cst_294 = arith.constant 1.000000e+00 : f32
    %880 = vector.broadcast %cst_294 : f32 to vector<8x32xf32>
    %881 = arith.addf %880, %879 : vector<8x32xf32>
    %882 = arith.divf %880, %881 : vector<8x32xf32>
    %883 = vector.extract_strided_slice %866 {offsets = [0, 64], sizes = [8, 32], strides = [1, 1]} : vector<8x96xf32> to vector<8x32xf32>
    %884 = vector.extract_strided_slice %860 {offsets = [0, 64], sizes = [8, 32], strides = [1, 1]} : vector<8x96xf32> to vector<8x32xf32>
    %885 = arith.addf %884, %628 : vector<8x32xf32>
    %886 = arith.mulf %874, %885 : vector<8x32xf32>
    %887 = arith.addf %883, %886 : vector<8x32xf32>
    %888 = math.tanh %887 : vector<8x32xf32>
    %cst_295 = arith.constant 1.000000e+00 : f32
    %889 = vector.broadcast %cst_295 : f32 to vector<8x32xf32>
    %890 = arith.subf %889, %882 : vector<8x32xf32>
    %891 = arith.mulf %890, %888 : vector<8x32xf32>
    %892 = arith.mulf %882, %818 : vector<8x32xf32>
    %893 = arith.addf %891, %892 : vector<8x32xf32>
    %894 = arith.index_cast %857 : i32 to index
    %c0_296 = arith.constant 0 : index
    %c0_297 = arith.constant 0 : index
    %895 = vector.load %arg24[%894, %c0_296, %c0_297] : memref<8x8x96xf32, #tpu.memory_space<vmem>>, vector<1x8x96xf32>
    %896 = vector.shape_cast %895 : vector<1x8x96xf32> to vector<8x96xf32>
    %897 = vector.extract_strided_slice %896 {offsets = [0, 0], sizes = [8, 32], strides = [1, 1]} : vector<8x96xf32> to vector<8x32xf32>
    %898 = vector.extract_strided_slice %863 {offsets = [0, 0], sizes = [8, 32], strides = [1, 1]} : vector<8x96xf32> to vector<8x32xf32>
    %899 = arith.addf %897, %898 : vector<8x32xf32>
    %900 = arith.negf %899 : vector<8x32xf32>
    %901 = math.exp %900 : vector<8x32xf32>
    %cst_298 = arith.constant 1.000000e+00 : f32
    %902 = vector.broadcast %cst_298 : f32 to vector<8x32xf32>
    %903 = arith.addf %902, %901 : vector<8x32xf32>
    %904 = arith.divf %902, %903 : vector<8x32xf32>
    %905 = vector.extract_strided_slice %896 {offsets = [0, 32], sizes = [8, 32], strides = [1, 1]} : vector<8x96xf32> to vector<8x32xf32>
    %906 = vector.extract_strided_slice %863 {offsets = [0, 32], sizes = [8, 32], strides = [1, 1]} : vector<8x96xf32> to vector<8x32xf32>
    %907 = arith.addf %905, %906 : vector<8x32xf32>
    %908 = arith.negf %907 : vector<8x32xf32>
    %909 = math.exp %908 : vector<8x32xf32>
    %cst_299 = arith.constant 1.000000e+00 : f32
    %910 = vector.broadcast %cst_299 : f32 to vector<8x32xf32>
    %911 = arith.addf %910, %909 : vector<8x32xf32>
    %912 = arith.divf %910, %911 : vector<8x32xf32>
    %913 = vector.extract_strided_slice %896 {offsets = [0, 64], sizes = [8, 32], strides = [1, 1]} : vector<8x96xf32> to vector<8x32xf32>
    %914 = vector.extract_strided_slice %863 {offsets = [0, 64], sizes = [8, 32], strides = [1, 1]} : vector<8x96xf32> to vector<8x32xf32>
    %915 = arith.addf %914, %631 : vector<8x32xf32>
    %916 = arith.mulf %904, %915 : vector<8x32xf32>
    %917 = arith.addf %913, %916 : vector<8x32xf32>
    %918 = math.tanh %917 : vector<8x32xf32>
    %cst_300 = arith.constant 1.000000e+00 : f32
    %919 = vector.broadcast %cst_300 : f32 to vector<8x32xf32>
    %920 = arith.subf %919, %912 : vector<8x32xf32>
    %921 = arith.mulf %920, %918 : vector<8x32xf32>
    %922 = arith.mulf %912, %848 : vector<8x32xf32>
    %923 = arith.addf %921, %922 : vector<8x32xf32>
    %924 = arith.index_cast %c3_i32_283 : i32 to index
    %c0_301 = arith.constant 0 : index
    %c0_302 = arith.constant 0 : index
    %925 = vector.load %arg17[%924, %c0_301, %c0_302] : memref<8x8x32xf32, #tpu.memory_space<vmem>>, vector<1x8x32xf32>
    %926 = vector.shape_cast %925 : vector<1x8x32xf32> to vector<8x32xf32>
    %927 = vector.shape_cast %893 : vector<8x32xf32> to vector<1x8x32xf32>
    tpu.vector_store %arg17[%924, %c0_301, %c0_302], %927 {strides = array<i32>} : memref<8x8x32xf32, #tpu.memory_space<vmem>>, vector<1x8x32xf32>,
    %928 = arith.index_cast %857 : i32 to index
    %c0_303 = arith.constant 0 : index
    %c0_304 = arith.constant 0 : index
    %929 = vector.load %arg18[%928, %c0_303, %c0_304] : memref<8x8x32xf32, #tpu.memory_space<vmem>>, vector<1x8x32xf32>
    %930 = vector.shape_cast %929 : vector<1x8x32xf32> to vector<8x32xf32>
    %931 = vector.shape_cast %923 : vector<8x32xf32> to vector<1x8x32xf32>
    tpu.vector_store %arg18[%928, %c0_303, %c0_304], %931 {strides = array<i32>} : memref<8x8x32xf32, #tpu.memory_space<vmem>>, vector<1x8x32xf32>,
    %c4_i32_305 = arith.constant 4 : i32
    %c7_i32_306 = arith.constant 7 : i32
    %932 = arith.subi %c7_i32_306, %c4_i32_305 : i32
    %933 = arith.truncf %893 : vector<8x32xf32> to vector<8x32xbf16>
    %c0_307 = arith.constant 0 : index
    %c0_308 = arith.constant 0 : index
    %934 = vector.load %arg11[%c0_307, %c0_308] : memref<32x96xbf16, #tpu.memory_space<vmem>>, vector<32x96xbf16>
    %cst_309 = arith.constant dense<0.000000e+00> : vector<8x96xf32>
    %935 = tpu.matmul %933, %934, %cst_309 {dimension_numbers = #tpu.dot_dimension_numbers<[1], [0], [0], [1], [0, 0, 1, 1], [], []>} : vector<8x32xbf16>, vector<32x96xbf16>, vector<8x96xf32> -> vector<8x96xf32>
    %936 = arith.truncf %923 : vector<8x32xf32> to vector<8x32xbf16>
    %c0_310 = arith.constant 0 : index
    %c0_311 = arith.constant 0 : index
    %937 = vector.load %arg12[%c0_310, %c0_311] : memref<32x96xbf16, #tpu.memory_space<vmem>>, vector<32x96xbf16>
    %cst_312 = arith.constant dense<0.000000e+00> : vector<8x96xf32>
    %938 = tpu.matmul %936, %937, %cst_312 {dimension_numbers = #tpu.dot_dimension_numbers<[1], [0], [0], [1], [0, 0, 1, 1], [], []>} : vector<8x32xbf16>, vector<32x96xbf16>, vector<8x96xf32> -> vector<8x96xf32>
    %939 = arith.index_cast %c4_i32_305 : i32 to index
    %c0_313 = arith.constant 0 : index
    %c0_314 = arith.constant 0 : index
    %940 = vector.load %arg23[%939, %c0_313, %c0_314] : memref<8x8x96xf32, #tpu.memory_space<vmem>>, vector<1x8x96xf32>
    %941 = vector.shape_cast %940 : vector<1x8x96xf32> to vector<8x96xf32>
    %942 = vector.extract_strided_slice %941 {offsets = [0, 0], sizes = [8, 32], strides = [1, 1]} : vector<8x96xf32> to vector<8x32xf32>
    %943 = vector.extract_strided_slice %935 {offsets = [0, 0], sizes = [8, 32], strides = [1, 1]} : vector<8x96xf32> to vector<8x32xf32>
    %944 = arith.addf %942, %943 : vector<8x32xf32>
    %945 = arith.negf %944 : vector<8x32xf32>
    %946 = math.exp %945 : vector<8x32xf32>
    %cst_315 = arith.constant 1.000000e+00 : f32
    %947 = vector.broadcast %cst_315 : f32 to vector<8x32xf32>
    %948 = arith.addf %947, %946 : vector<8x32xf32>
    %949 = arith.divf %947, %948 : vector<8x32xf32>
    %950 = vector.extract_strided_slice %941 {offsets = [0, 32], sizes = [8, 32], strides = [1, 1]} : vector<8x96xf32> to vector<8x32xf32>
    %951 = vector.extract_strided_slice %935 {offsets = [0, 32], sizes = [8, 32], strides = [1, 1]} : vector<8x96xf32> to vector<8x32xf32>
    %952 = arith.addf %950, %951 : vector<8x32xf32>
    %953 = arith.negf %952 : vector<8x32xf32>
    %954 = math.exp %953 : vector<8x32xf32>
    %cst_316 = arith.constant 1.000000e+00 : f32
    %955 = vector.broadcast %cst_316 : f32 to vector<8x32xf32>
    %956 = arith.addf %955, %954 : vector<8x32xf32>
    %957 = arith.divf %955, %956 : vector<8x32xf32>
    %958 = vector.extract_strided_slice %941 {offsets = [0, 64], sizes = [8, 32], strides = [1, 1]} : vector<8x96xf32> to vector<8x32xf32>
    %959 = vector.extract_strided_slice %935 {offsets = [0, 64], sizes = [8, 32], strides = [1, 1]} : vector<8x96xf32> to vector<8x32xf32>
    %960 = arith.addf %959, %628 : vector<8x32xf32>
    %961 = arith.mulf %949, %960 : vector<8x32xf32>
    %962 = arith.addf %958, %961 : vector<8x32xf32>
    %963 = math.tanh %962 : vector<8x32xf32>
    %cst_317 = arith.constant 1.000000e+00 : f32
    %964 = vector.broadcast %cst_317 : f32 to vector<8x32xf32>
    %965 = arith.subf %964, %957 : vector<8x32xf32>
    %966 = arith.mulf %965, %963 : vector<8x32xf32>
    %967 = arith.mulf %957, %893 : vector<8x32xf32>
    %968 = arith.addf %966, %967 : vector<8x32xf32>
    %969 = arith.index_cast %932 : i32 to index
    %c0_318 = arith.constant 0 : index
    %c0_319 = arith.constant 0 : index
    %970 = vector.load %arg24[%969, %c0_318, %c0_319] : memref<8x8x96xf32, #tpu.memory_space<vmem>>, vector<1x8x96xf32>
    %971 = vector.shape_cast %970 : vector<1x8x96xf32> to vector<8x96xf32>
    %972 = vector.extract_strided_slice %971 {offsets = [0, 0], sizes = [8, 32], strides = [1, 1]} : vector<8x96xf32> to vector<8x32xf32>
    %973 = vector.extract_strided_slice %938 {offsets = [0, 0], sizes = [8, 32], strides = [1, 1]} : vector<8x96xf32> to vector<8x32xf32>
    %974 = arith.addf %972, %973 : vector<8x32xf32>
    %975 = arith.negf %974 : vector<8x32xf32>
    %976 = math.exp %975 : vector<8x32xf32>
    %cst_320 = arith.constant 1.000000e+00 : f32
    %977 = vector.broadcast %cst_320 : f32 to vector<8x32xf32>
    %978 = arith.addf %977, %976 : vector<8x32xf32>
    %979 = arith.divf %977, %978 : vector<8x32xf32>
    %980 = vector.extract_strided_slice %971 {offsets = [0, 32], sizes = [8, 32], strides = [1, 1]} : vector<8x96xf32> to vector<8x32xf32>
    %981 = vector.extract_strided_slice %938 {offsets = [0, 32], sizes = [8, 32], strides = [1, 1]} : vector<8x96xf32> to vector<8x32xf32>
    %982 = arith.addf %980, %981 : vector<8x32xf32>
    %983 = arith.negf %982 : vector<8x32xf32>
    %984 = math.exp %983 : vector<8x32xf32>
    %cst_321 = arith.constant 1.000000e+00 : f32
    %985 = vector.broadcast %cst_321 : f32 to vector<8x32xf32>
    %986 = arith.addf %985, %984 : vector<8x32xf32>
    %987 = arith.divf %985, %986 : vector<8x32xf32>
    %988 = vector.extract_strided_slice %971 {offsets = [0, 64], sizes = [8, 32], strides = [1, 1]} : vector<8x96xf32> to vector<8x32xf32>
    %989 = vector.extract_strided_slice %938 {offsets = [0, 64], sizes = [8, 32], strides = [1, 1]} : vector<8x96xf32> to vector<8x32xf32>
    %990 = arith.addf %989, %631 : vector<8x32xf32>
    %991 = arith.mulf %979, %990 : vector<8x32xf32>
    %992 = arith.addf %988, %991 : vector<8x32xf32>
    %993 = math.tanh %992 : vector<8x32xf32>
    %cst_322 = arith.constant 1.000000e+00 : f32
    %994 = vector.broadcast %cst_322 : f32 to vector<8x32xf32>
    %995 = arith.subf %994, %987 : vector<8x32xf32>
    %996 = arith.mulf %995, %993 : vector<8x32xf32>
    %997 = arith.mulf %987, %923 : vector<8x32xf32>
    %998 = arith.addf %996, %997 : vector<8x32xf32>
    %999 = arith.index_cast %c4_i32_305 : i32 to index
    %c0_323 = arith.constant 0 : index
    %c0_324 = arith.constant 0 : index
    %1000 = vector.load %arg17[%999, %c0_323, %c0_324] : memref<8x8x32xf32, #tpu.memory_space<vmem>>, vector<1x8x32xf32>
    %1001 = vector.shape_cast %1000 : vector<1x8x32xf32> to vector<8x32xf32>
    %1002 = vector.shape_cast %968 : vector<8x32xf32> to vector<1x8x32xf32>
    tpu.vector_store %arg17[%999, %c0_323, %c0_324], %1002 {strides = array<i32>} : memref<8x8x32xf32, #tpu.memory_space<vmem>>, vector<1x8x32xf32>,
    %1003 = arith.index_cast %932 : i32 to index
    %c0_325 = arith.constant 0 : index
    %c0_326 = arith.constant 0 : index
    %1004 = vector.load %arg18[%1003, %c0_325, %c0_326] : memref<8x8x32xf32, #tpu.memory_space<vmem>>, vector<1x8x32xf32>
    %1005 = vector.shape_cast %1004 : vector<1x8x32xf32> to vector<8x32xf32>
    %1006 = vector.shape_cast %998 : vector<8x32xf32> to vector<1x8x32xf32>
    tpu.vector_store %arg18[%1003, %c0_325, %c0_326], %1006 {strides = array<i32>} : memref<8x8x32xf32, #tpu.memory_space<vmem>>, vector<1x8x32xf32>,
    %c5_i32_327 = arith.constant 5 : i32
    %c7_i32_328 = arith.constant 7 : i32
    %1007 = arith.subi %c7_i32_328, %c5_i32_327 : i32
    %1008 = arith.truncf %968 : vector<8x32xf32> to vector<8x32xbf16>
    %c0_329 = arith.constant 0 : index
    %c0_330 = arith.constant 0 : index
    %1009 = vector.load %arg11[%c0_329, %c0_330] : memref<32x96xbf16, #tpu.memory_space<vmem>>, vector<32x96xbf16>
    %cst_331 = arith.constant dense<0.000000e+00> : vector<8x96xf32>
    %1010 = tpu.matmul %1008, %1009, %cst_331 {dimension_numbers = #tpu.dot_dimension_numbers<[1], [0], [0], [1], [0, 0, 1, 1], [], []>} : vector<8x32xbf16>, vector<32x96xbf16>, vector<8x96xf32> -> vector<8x96xf32>
    %1011 = arith.truncf %998 : vector<8x32xf32> to vector<8x32xbf16>
    %c0_332 = arith.constant 0 : index
    %c0_333 = arith.constant 0 : index
    %1012 = vector.load %arg12[%c0_332, %c0_333] : memref<32x96xbf16, #tpu.memory_space<vmem>>, vector<32x96xbf16>
    %cst_334 = arith.constant dense<0.000000e+00> : vector<8x96xf32>
    %1013 = tpu.matmul %1011, %1012, %cst_334 {dimension_numbers = #tpu.dot_dimension_numbers<[1], [0], [0], [1], [0, 0, 1, 1], [], []>} : vector<8x32xbf16>, vector<32x96xbf16>, vector<8x96xf32> -> vector<8x96xf32>
    %1014 = arith.index_cast %c5_i32_327 : i32 to index
    %c0_335 = arith.constant 0 : index
    %c0_336 = arith.constant 0 : index
    %1015 = vector.load %arg23[%1014, %c0_335, %c0_336] : memref<8x8x96xf32, #tpu.memory_space<vmem>>, vector<1x8x96xf32>
    %1016 = vector.shape_cast %1015 : vector<1x8x96xf32> to vector<8x96xf32>
    %1017 = vector.extract_strided_slice %1016 {offsets = [0, 0], sizes = [8, 32], strides = [1, 1]} : vector<8x96xf32> to vector<8x32xf32>
    %1018 = vector.extract_strided_slice %1010 {offsets = [0, 0], sizes = [8, 32], strides = [1, 1]} : vector<8x96xf32> to vector<8x32xf32>
    %1019 = arith.addf %1017, %1018 : vector<8x32xf32>
    %1020 = arith.negf %1019 : vector<8x32xf32>
    %1021 = math.exp %1020 : vector<8x32xf32>
    %cst_337 = arith.constant 1.000000e+00 : f32
    %1022 = vector.broadcast %cst_337 : f32 to vector<8x32xf32>
    %1023 = arith.addf %1022, %1021 : vector<8x32xf32>
    %1024 = arith.divf %1022, %1023 : vector<8x32xf32>
    %1025 = vector.extract_strided_slice %1016 {offsets = [0, 32], sizes = [8, 32], strides = [1, 1]} : vector<8x96xf32> to vector<8x32xf32>
    %1026 = vector.extract_strided_slice %1010 {offsets = [0, 32], sizes = [8, 32], strides = [1, 1]} : vector<8x96xf32> to vector<8x32xf32>
    %1027 = arith.addf %1025, %1026 : vector<8x32xf32>
    %1028 = arith.negf %1027 : vector<8x32xf32>
    %1029 = math.exp %1028 : vector<8x32xf32>
    %cst_338 = arith.constant 1.000000e+00 : f32
    %1030 = vector.broadcast %cst_338 : f32 to vector<8x32xf32>
    %1031 = arith.addf %1030, %1029 : vector<8x32xf32>
    %1032 = arith.divf %1030, %1031 : vector<8x32xf32>
    %1033 = vector.extract_strided_slice %1016 {offsets = [0, 64], sizes = [8, 32], strides = [1, 1]} : vector<8x96xf32> to vector<8x32xf32>
    %1034 = vector.extract_strided_slice %1010 {offsets = [0, 64], sizes = [8, 32], strides = [1, 1]} : vector<8x96xf32> to vector<8x32xf32>
    %1035 = arith.addf %1034, %628 : vector<8x32xf32>
    %1036 = arith.mulf %1024, %1035 : vector<8x32xf32>
    %1037 = arith.addf %1033, %1036 : vector<8x32xf32>
    %1038 = math.tanh %1037 : vector<8x32xf32>
    %cst_339 = arith.constant 1.000000e+00 : f32
    %1039 = vector.broadcast %cst_339 : f32 to vector<8x32xf32>
    %1040 = arith.subf %1039, %1032 : vector<8x32xf32>
    %1041 = arith.mulf %1040, %1038 : vector<8x32xf32>
    %1042 = arith.mulf %1032, %968 : vector<8x32xf32>
    %1043 = arith.addf %1041, %1042 : vector<8x32xf32>
    %1044 = arith.index_cast %1007 : i32 to index
    %c0_340 = arith.constant 0 : index
    %c0_341 = arith.constant 0 : index
    %1045 = vector.load %arg24[%1044, %c0_340, %c0_341] : memref<8x8x96xf32, #tpu.memory_space<vmem>>, vector<1x8x96xf32>
    %1046 = vector.shape_cast %1045 : vector<1x8x96xf32> to vector<8x96xf32>
    %1047 = vector.extract_strided_slice %1046 {offsets = [0, 0], sizes = [8, 32], strides = [1, 1]} : vector<8x96xf32> to vector<8x32xf32>
    %1048 = vector.extract_strided_slice %1013 {offsets = [0, 0], sizes = [8, 32], strides = [1, 1]} : vector<8x96xf32> to vector<8x32xf32>
    %1049 = arith.addf %1047, %1048 : vector<8x32xf32>
    %1050 = arith.negf %1049 : vector<8x32xf32>
    %1051 = math.exp %1050 : vector<8x32xf32>
    %cst_342 = arith.constant 1.000000e+00 : f32
    %1052 = vector.broadcast %cst_342 : f32 to vector<8x32xf32>
    %1053 = arith.addf %1052, %1051 : vector<8x32xf32>
    %1054 = arith.divf %1052, %1053 : vector<8x32xf32>
    %1055 = vector.extract_strided_slice %1046 {offsets = [0, 32], sizes = [8, 32], strides = [1, 1]} : vector<8x96xf32> to vector<8x32xf32>
    %1056 = vector.extract_strided_slice %1013 {offsets = [0, 32], sizes = [8, 32], strides = [1, 1]} : vector<8x96xf32> to vector<8x32xf32>
    %1057 = arith.addf %1055, %1056 : vector<8x32xf32>
    %1058 = arith.negf %1057 : vector<8x32xf32>
    %1059 = math.exp %1058 : vector<8x32xf32>
    %cst_343 = arith.constant 1.000000e+00 : f32
    %1060 = vector.broadcast %cst_343 : f32 to vector<8x32xf32>
    %1061 = arith.addf %1060, %1059 : vector<8x32xf32>
    %1062 = arith.divf %1060, %1061 : vector<8x32xf32>
    %1063 = vector.extract_strided_slice %1046 {offsets = [0, 64], sizes = [8, 32], strides = [1, 1]} : vector<8x96xf32> to vector<8x32xf32>
    %1064 = vector.extract_strided_slice %1013 {offsets = [0, 64], sizes = [8, 32], strides = [1, 1]} : vector<8x96xf32> to vector<8x32xf32>
    %1065 = arith.addf %1064, %631 : vector<8x32xf32>
    %1066 = arith.mulf %1054, %1065 : vector<8x32xf32>
    %1067 = arith.addf %1063, %1066 : vector<8x32xf32>
    %1068 = math.tanh %1067 : vector<8x32xf32>
    %cst_344 = arith.constant 1.000000e+00 : f32
    %1069 = vector.broadcast %cst_344 : f32 to vector<8x32xf32>
    %1070 = arith.subf %1069, %1062 : vector<8x32xf32>
    %1071 = arith.mulf %1070, %1068 : vector<8x32xf32>
    %1072 = arith.mulf %1062, %998 : vector<8x32xf32>
    %1073 = arith.addf %1071, %1072 : vector<8x32xf32>
    %1074 = arith.index_cast %c5_i32_327 : i32 to index
    %c0_345 = arith.constant 0 : index
    %c0_346 = arith.constant 0 : index
    %1075 = vector.load %arg17[%1074, %c0_345, %c0_346] : memref<8x8x32xf32, #tpu.memory_space<vmem>>, vector<1x8x32xf32>
    %1076 = vector.shape_cast %1075 : vector<1x8x32xf32> to vector<8x32xf32>
    %1077 = vector.shape_cast %1043 : vector<8x32xf32> to vector<1x8x32xf32>
    tpu.vector_store %arg17[%1074, %c0_345, %c0_346], %1077 {strides = array<i32>} : memref<8x8x32xf32, #tpu.memory_space<vmem>>, vector<1x8x32xf32>,
    %1078 = arith.index_cast %1007 : i32 to index
    %c0_347 = arith.constant 0 : index
    %c0_348 = arith.constant 0 : index
    %1079 = vector.load %arg18[%1078, %c0_347, %c0_348] : memref<8x8x32xf32, #tpu.memory_space<vmem>>, vector<1x8x32xf32>
    %1080 = vector.shape_cast %1079 : vector<1x8x32xf32> to vector<8x32xf32>
    %1081 = vector.shape_cast %1073 : vector<8x32xf32> to vector<1x8x32xf32>
    tpu.vector_store %arg18[%1078, %c0_347, %c0_348], %1081 {strides = array<i32>} : memref<8x8x32xf32, #tpu.memory_space<vmem>>, vector<1x8x32xf32>,
    %c6_i32_349 = arith.constant 6 : i32
    %c7_i32_350 = arith.constant 7 : i32
    %1082 = arith.subi %c7_i32_350, %c6_i32_349 : i32
    %1083 = arith.truncf %1043 : vector<8x32xf32> to vector<8x32xbf16>
    %c0_351 = arith.constant 0 : index
    %c0_352 = arith.constant 0 : index
    %1084 = vector.load %arg11[%c0_351, %c0_352] : memref<32x96xbf16, #tpu.memory_space<vmem>>, vector<32x96xbf16>
    %cst_353 = arith.constant dense<0.000000e+00> : vector<8x96xf32>
    %1085 = tpu.matmul %1083, %1084, %cst_353 {dimension_numbers = #tpu.dot_dimension_numbers<[1], [0], [0], [1], [0, 0, 1, 1], [], []>} : vector<8x32xbf16>, vector<32x96xbf16>, vector<8x96xf32> -> vector<8x96xf32>
    %1086 = arith.truncf %1073 : vector<8x32xf32> to vector<8x32xbf16>
    %c0_354 = arith.constant 0 : index
    %c0_355 = arith.constant 0 : index
    %1087 = vector.load %arg12[%c0_354, %c0_355] : memref<32x96xbf16, #tpu.memory_space<vmem>>, vector<32x96xbf16>
    %cst_356 = arith.constant dense<0.000000e+00> : vector<8x96xf32>
    %1088 = tpu.matmul %1086, %1087, %cst_356 {dimension_numbers = #tpu.dot_dimension_numbers<[1], [0], [0], [1], [0, 0, 1, 1], [], []>} : vector<8x32xbf16>, vector<32x96xbf16>, vector<8x96xf32> -> vector<8x96xf32>
    %1089 = arith.index_cast %c6_i32_349 : i32 to index
    %c0_357 = arith.constant 0 : index
    %c0_358 = arith.constant 0 : index
    %1090 = vector.load %arg23[%1089, %c0_357, %c0_358] : memref<8x8x96xf32, #tpu.memory_space<vmem>>, vector<1x8x96xf32>
    %1091 = vector.shape_cast %1090 : vector<1x8x96xf32> to vector<8x96xf32>
    %1092 = vector.extract_strided_slice %1091 {offsets = [0, 0], sizes = [8, 32], strides = [1, 1]} : vector<8x96xf32> to vector<8x32xf32>
    %1093 = vector.extract_strided_slice %1085 {offsets = [0, 0], sizes = [8, 32], strides = [1, 1]} : vector<8x96xf32> to vector<8x32xf32>
    %1094 = arith.addf %1092, %1093 : vector<8x32xf32>
    %1095 = arith.negf %1094 : vector<8x32xf32>
    %1096 = math.exp %1095 : vector<8x32xf32>
    %cst_359 = arith.constant 1.000000e+00 : f32
    %1097 = vector.broadcast %cst_359 : f32 to vector<8x32xf32>
    %1098 = arith.addf %1097, %1096 : vector<8x32xf32>
    %1099 = arith.divf %1097, %1098 : vector<8x32xf32>
    %1100 = vector.extract_strided_slice %1091 {offsets = [0, 32], sizes = [8, 32], strides = [1, 1]} : vector<8x96xf32> to vector<8x32xf32>
    %1101 = vector.extract_strided_slice %1085 {offsets = [0, 32], sizes = [8, 32], strides = [1, 1]} : vector<8x96xf32> to vector<8x32xf32>
    %1102 = arith.addf %1100, %1101 : vector<8x32xf32>
    %1103 = arith.negf %1102 : vector<8x32xf32>
    %1104 = math.exp %1103 : vector<8x32xf32>
    %cst_360 = arith.constant 1.000000e+00 : f32
    %1105 = vector.broadcast %cst_360 : f32 to vector<8x32xf32>
    %1106 = arith.addf %1105, %1104 : vector<8x32xf32>
    %1107 = arith.divf %1105, %1106 : vector<8x32xf32>
    %1108 = vector.extract_strided_slice %1091 {offsets = [0, 64], sizes = [8, 32], strides = [1, 1]} : vector<8x96xf32> to vector<8x32xf32>
    %1109 = vector.extract_strided_slice %1085 {offsets = [0, 64], sizes = [8, 32], strides = [1, 1]} : vector<8x96xf32> to vector<8x32xf32>
    %1110 = arith.addf %1109, %628 : vector<8x32xf32>
    %1111 = arith.mulf %1099, %1110 : vector<8x32xf32>
    %1112 = arith.addf %1108, %1111 : vector<8x32xf32>
    %1113 = math.tanh %1112 : vector<8x32xf32>
    %cst_361 = arith.constant 1.000000e+00 : f32
    %1114 = vector.broadcast %cst_361 : f32 to vector<8x32xf32>
    %1115 = arith.subf %1114, %1107 : vector<8x32xf32>
    %1116 = arith.mulf %1115, %1113 : vector<8x32xf32>
    %1117 = arith.mulf %1107, %1043 : vector<8x32xf32>
    %1118 = arith.addf %1116, %1117 : vector<8x32xf32>
    %1119 = arith.index_cast %1082 : i32 to index
    %c0_362 = arith.constant 0 : index
    %c0_363 = arith.constant 0 : index
    %1120 = vector.load %arg24[%1119, %c0_362, %c0_363] : memref<8x8x96xf32, #tpu.memory_space<vmem>>, vector<1x8x96xf32>
    %1121 = vector.shape_cast %1120 : vector<1x8x96xf32> to vector<8x96xf32>
    %1122 = vector.extract_strided_slice %1121 {offsets = [0, 0], sizes = [8, 32], strides = [1, 1]} : vector<8x96xf32> to vector<8x32xf32>
    %1123 = vector.extract_strided_slice %1088 {offsets = [0, 0], sizes = [8, 32], strides = [1, 1]} : vector<8x96xf32> to vector<8x32xf32>
    %1124 = arith.addf %1122, %1123 : vector<8x32xf32>
    %1125 = arith.negf %1124 : vector<8x32xf32>
    %1126 = math.exp %1125 : vector<8x32xf32>
    %cst_364 = arith.constant 1.000000e+00 : f32
    %1127 = vector.broadcast %cst_364 : f32 to vector<8x32xf32>
    %1128 = arith.addf %1127, %1126 : vector<8x32xf32>
    %1129 = arith.divf %1127, %1128 : vector<8x32xf32>
    %1130 = vector.extract_strided_slice %1121 {offsets = [0, 32], sizes = [8, 32], strides = [1, 1]} : vector<8x96xf32> to vector<8x32xf32>
    %1131 = vector.extract_strided_slice %1088 {offsets = [0, 32], sizes = [8, 32], strides = [1, 1]} : vector<8x96xf32> to vector<8x32xf32>
    %1132 = arith.addf %1130, %1131 : vector<8x32xf32>
    %1133 = arith.negf %1132 : vector<8x32xf32>
    %1134 = math.exp %1133 : vector<8x32xf32>
    %cst_365 = arith.constant 1.000000e+00 : f32
    %1135 = vector.broadcast %cst_365 : f32 to vector<8x32xf32>
    %1136 = arith.addf %1135, %1134 : vector<8x32xf32>
    %1137 = arith.divf %1135, %1136 : vector<8x32xf32>
    %1138 = vector.extract_strided_slice %1121 {offsets = [0, 64], sizes = [8, 32], strides = [1, 1]} : vector<8x96xf32> to vector<8x32xf32>
    %1139 = vector.extract_strided_slice %1088 {offsets = [0, 64], sizes = [8, 32], strides = [1, 1]} : vector<8x96xf32> to vector<8x32xf32>
    %1140 = arith.addf %1139, %631 : vector<8x32xf32>
    %1141 = arith.mulf %1129, %1140 : vector<8x32xf32>
    %1142 = arith.addf %1138, %1141 : vector<8x32xf32>
    %1143 = math.tanh %1142 : vector<8x32xf32>
    %cst_366 = arith.constant 1.000000e+00 : f32
    %1144 = vector.broadcast %cst_366 : f32 to vector<8x32xf32>
    %1145 = arith.subf %1144, %1137 : vector<8x32xf32>
    %1146 = arith.mulf %1145, %1143 : vector<8x32xf32>
    %1147 = arith.mulf %1137, %1073 : vector<8x32xf32>
    %1148 = arith.addf %1146, %1147 : vector<8x32xf32>
    %1149 = arith.index_cast %c6_i32_349 : i32 to index
    %c0_367 = arith.constant 0 : index
    %c0_368 = arith.constant 0 : index
    %1150 = vector.load %arg17[%1149, %c0_367, %c0_368] : memref<8x8x32xf32, #tpu.memory_space<vmem>>, vector<1x8x32xf32>
    %1151 = vector.shape_cast %1150 : vector<1x8x32xf32> to vector<8x32xf32>
    %1152 = vector.shape_cast %1118 : vector<8x32xf32> to vector<1x8x32xf32>
    tpu.vector_store %arg17[%1149, %c0_367, %c0_368], %1152 {strides = array<i32>} : memref<8x8x32xf32, #tpu.memory_space<vmem>>, vector<1x8x32xf32>,
    %1153 = arith.index_cast %1082 : i32 to index
    %c0_369 = arith.constant 0 : index
    %c0_370 = arith.constant 0 : index
    %1154 = vector.load %arg18[%1153, %c0_369, %c0_370] : memref<8x8x32xf32, #tpu.memory_space<vmem>>, vector<1x8x32xf32>
    %1155 = vector.shape_cast %1154 : vector<1x8x32xf32> to vector<8x32xf32>
    %1156 = vector.shape_cast %1148 : vector<8x32xf32> to vector<1x8x32xf32>
    tpu.vector_store %arg18[%1153, %c0_369, %c0_370], %1156 {strides = array<i32>} : memref<8x8x32xf32, #tpu.memory_space<vmem>>, vector<1x8x32xf32>,
    %c7_i32_371 = arith.constant 7 : i32
    %c7_i32_372 = arith.constant 7 : i32
    %1157 = arith.subi %c7_i32_372, %c7_i32_371 : i32
    %1158 = arith.truncf %1118 : vector<8x32xf32> to vector<8x32xbf16>
    %c0_373 = arith.constant 0 : index
    %c0_374 = arith.constant 0 : index
    %1159 = vector.load %arg11[%c0_373, %c0_374] : memref<32x96xbf16, #tpu.memory_space<vmem>>, vector<32x96xbf16>
    %cst_375 = arith.constant dense<0.000000e+00> : vector<8x96xf32>
    %1160 = tpu.matmul %1158, %1159, %cst_375 {dimension_numbers = #tpu.dot_dimension_numbers<[1], [0], [0], [1], [0, 0, 1, 1], [], []>} : vector<8x32xbf16>, vector<32x96xbf16>, vector<8x96xf32> -> vector<8x96xf32>
    %1161 = arith.truncf %1148 : vector<8x32xf32> to vector<8x32xbf16>
    %c0_376 = arith.constant 0 : index
    %c0_377 = arith.constant 0 : index
    %1162 = vector.load %arg12[%c0_376, %c0_377] : memref<32x96xbf16, #tpu.memory_space<vmem>>, vector<32x96xbf16>
    %cst_378 = arith.constant dense<0.000000e+00> : vector<8x96xf32>
    %1163 = tpu.matmul %1161, %1162, %cst_378 {dimension_numbers = #tpu.dot_dimension_numbers<[1], [0], [0], [1], [0, 0, 1, 1], [], []>} : vector<8x32xbf16>, vector<32x96xbf16>, vector<8x96xf32> -> vector<8x96xf32>
    %1164 = arith.index_cast %c7_i32_371 : i32 to index
    %c0_379 = arith.constant 0 : index
    %c0_380 = arith.constant 0 : index
    %1165 = vector.load %arg23[%1164, %c0_379, %c0_380] : memref<8x8x96xf32, #tpu.memory_space<vmem>>, vector<1x8x96xf32>
    %1166 = vector.shape_cast %1165 : vector<1x8x96xf32> to vector<8x96xf32>
    %1167 = vector.extract_strided_slice %1166 {offsets = [0, 0], sizes = [8, 32], strides = [1, 1]} : vector<8x96xf32> to vector<8x32xf32>
    %1168 = vector.extract_strided_slice %1160 {offsets = [0, 0], sizes = [8, 32], strides = [1, 1]} : vector<8x96xf32> to vector<8x32xf32>
    %1169 = arith.addf %1167, %1168 : vector<8x32xf32>
    %1170 = arith.negf %1169 : vector<8x32xf32>
    %1171 = math.exp %1170 : vector<8x32xf32>
    %cst_381 = arith.constant 1.000000e+00 : f32
    %1172 = vector.broadcast %cst_381 : f32 to vector<8x32xf32>
    %1173 = arith.addf %1172, %1171 : vector<8x32xf32>
    %1174 = arith.divf %1172, %1173 : vector<8x32xf32>
    %1175 = vector.extract_strided_slice %1166 {offsets = [0, 32], sizes = [8, 32], strides = [1, 1]} : vector<8x96xf32> to vector<8x32xf32>
    %1176 = vector.extract_strided_slice %1160 {offsets = [0, 32], sizes = [8, 32], strides = [1, 1]} : vector<8x96xf32> to vector<8x32xf32>
    %1177 = arith.addf %1175, %1176 : vector<8x32xf32>
    %1178 = arith.negf %1177 : vector<8x32xf32>
    %1179 = math.exp %1178 : vector<8x32xf32>
    %cst_382 = arith.constant 1.000000e+00 : f32
    %1180 = vector.broadcast %cst_382 : f32 to vector<8x32xf32>
    %1181 = arith.addf %1180, %1179 : vector<8x32xf32>
    %1182 = arith.divf %1180, %1181 : vector<8x32xf32>
    %1183 = vector.extract_strided_slice %1166 {offsets = [0, 64], sizes = [8, 32], strides = [1, 1]} : vector<8x96xf32> to vector<8x32xf32>
    %1184 = vector.extract_strided_slice %1160 {offsets = [0, 64], sizes = [8, 32], strides = [1, 1]} : vector<8x96xf32> to vector<8x32xf32>
    %1185 = arith.addf %1184, %628 : vector<8x32xf32>
    %1186 = arith.mulf %1174, %1185 : vector<8x32xf32>
    %1187 = arith.addf %1183, %1186 : vector<8x32xf32>
    %1188 = math.tanh %1187 : vector<8x32xf32>
    %cst_383 = arith.constant 1.000000e+00 : f32
    %1189 = vector.broadcast %cst_383 : f32 to vector<8x32xf32>
    %1190 = arith.subf %1189, %1182 : vector<8x32xf32>
    %1191 = arith.mulf %1190, %1188 : vector<8x32xf32>
    %1192 = arith.mulf %1182, %1118 : vector<8x32xf32>
    %1193 = arith.addf %1191, %1192 : vector<8x32xf32>
    %1194 = arith.index_cast %1157 : i32 to index
    %c0_384 = arith.constant 0 : index
    %c0_385 = arith.constant 0 : index
    %1195 = vector.load %arg24[%1194, %c0_384, %c0_385] : memref<8x8x96xf32, #tpu.memory_space<vmem>>, vector<1x8x96xf32>
    %1196 = vector.shape_cast %1195 : vector<1x8x96xf32> to vector<8x96xf32>
    %1197 = vector.extract_strided_slice %1196 {offsets = [0, 0], sizes = [8, 32], strides = [1, 1]} : vector<8x96xf32> to vector<8x32xf32>
    %1198 = vector.extract_strided_slice %1163 {offsets = [0, 0], sizes = [8, 32], strides = [1, 1]} : vector<8x96xf32> to vector<8x32xf32>
    %1199 = arith.addf %1197, %1198 : vector<8x32xf32>
    %1200 = arith.negf %1199 : vector<8x32xf32>
    %1201 = math.exp %1200 : vector<8x32xf32>
    %cst_386 = arith.constant 1.000000e+00 : f32
    %1202 = vector.broadcast %cst_386 : f32 to vector<8x32xf32>
    %1203 = arith.addf %1202, %1201 : vector<8x32xf32>
    %1204 = arith.divf %1202, %1203 : vector<8x32xf32>
    %1205 = vector.extract_strided_slice %1196 {offsets = [0, 32], sizes = [8, 32], strides = [1, 1]} : vector<8x96xf32> to vector<8x32xf32>
    %1206 = vector.extract_strided_slice %1163 {offsets = [0, 32], sizes = [8, 32], strides = [1, 1]} : vector<8x96xf32> to vector<8x32xf32>
    %1207 = arith.addf %1205, %1206 : vector<8x32xf32>
    %1208 = arith.negf %1207 : vector<8x32xf32>
    %1209 = math.exp %1208 : vector<8x32xf32>
    %cst_387 = arith.constant 1.000000e+00 : f32
    %1210 = vector.broadcast %cst_387 : f32 to vector<8x32xf32>
    %1211 = arith.addf %1210, %1209 : vector<8x32xf32>
    %1212 = arith.divf %1210, %1211 : vector<8x32xf32>
    %1213 = vector.extract_strided_slice %1196 {offsets = [0, 64], sizes = [8, 32], strides = [1, 1]} : vector<8x96xf32> to vector<8x32xf32>
    %1214 = vector.extract_strided_slice %1163 {offsets = [0, 64], sizes = [8, 32], strides = [1, 1]} : vector<8x96xf32> to vector<8x32xf32>
    %1215 = arith.addf %1214, %631 : vector<8x32xf32>
    %1216 = arith.mulf %1204, %1215 : vector<8x32xf32>
    %1217 = arith.addf %1213, %1216 : vector<8x32xf32>
    %1218 = math.tanh %1217 : vector<8x32xf32>
    %cst_388 = arith.constant 1.000000e+00 : f32
    %1219 = vector.broadcast %cst_388 : f32 to vector<8x32xf32>
    %1220 = arith.subf %1219, %1212 : vector<8x32xf32>
    %1221 = arith.mulf %1220, %1218 : vector<8x32xf32>
    %1222 = arith.mulf %1212, %1148 : vector<8x32xf32>
    %1223 = arith.addf %1221, %1222 : vector<8x32xf32>
    %1224 = arith.index_cast %c7_i32_371 : i32 to index
    %c0_389 = arith.constant 0 : index
    %c0_390 = arith.constant 0 : index
    %1225 = vector.load %arg17[%1224, %c0_389, %c0_390] : memref<8x8x32xf32, #tpu.memory_space<vmem>>, vector<1x8x32xf32>
    %1226 = vector.shape_cast %1225 : vector<1x8x32xf32> to vector<8x32xf32>
    %1227 = vector.shape_cast %1193 : vector<8x32xf32> to vector<1x8x32xf32>
    tpu.vector_store %arg17[%1224, %c0_389, %c0_390], %1227 {strides = array<i32>} : memref<8x8x32xf32, #tpu.memory_space<vmem>>, vector<1x8x32xf32>,
    %1228 = arith.index_cast %1157 : i32 to index
    %c0_391 = arith.constant 0 : index
    %c0_392 = arith.constant 0 : index
    %1229 = vector.load %arg18[%1228, %c0_391, %c0_392] : memref<8x8x32xf32, #tpu.memory_space<vmem>>, vector<1x8x32xf32>
    %1230 = vector.shape_cast %1229 : vector<1x8x32xf32> to vector<8x32xf32>
    %1231 = vector.shape_cast %1223 : vector<8x32xf32> to vector<1x8x32xf32>
    tpu.vector_store %arg18[%1228, %c0_391, %c0_392], %1231 {strides = array<i32>} : memref<8x8x32xf32, #tpu.memory_space<vmem>>, vector<1x8x32xf32>,
    %c8_i32_393 = arith.constant 8 : i32
    return
  }
}

</mosaic_0001>

<bundles_post_ra>
// kernel: recurrent_net_forward.1
= control target key start
LH: loop header
LB: loop body
LE: loop exit
PB: predicated region body
PF: predicated region fallthrough
CT: control target
= control target key end

     0   :  { %s4966_s0 = inlined_call_operand.vmem [shape: bf16[64,32], index: 0, kind: input, shape index: {}]   ;;  %s4967_s1 = inlined_call_operand.vmem [shape: bf16[32,128], index: 1, kind: input, shape index: {}]   ;;  %s4968_s2 = inlined_call_operand.vmem [shape: bf16[32,128], index: 2, kind: input, shape index: {}]   ;;  %s4969_s3 = inlined_call_operand.vmem [shape: bf16[32,128], index: 3, kind: input, shape index: {}]   ;;  %s4970_s4 = inlined_call_operand.vmem [shape: bf16[32,128], index: 4, kind: input, shape index: {}]   ;;  %s4971_s5 = inlined_call_operand.vmem [shape: f32[1,128], index: 5, kind: input, shape index: {}]   ;;  %s4972_s6 = inlined_call_operand.hbm [shape: f32[1,128], index: 6, kind: input, shape index: {}]   ;;  %s4973_s7 = inlined_call_operand.vmem [shape: bf16[32,96], index: 7, kind: input, shape index: {}]   ;;  %s4974_s8 = inlined_call_operand.vmem [shape: bf16[32,96], index: 8, kind: input, shape index: {}]   ;;  %s4975_s9 = inlined_call_operand.vmem [shape: bf16[32,96], index: 9, kind: input, shape index: {}]   ;;  %s4976_s10 = inlined_call_operand.vmem [shape: bf16[32,96], index: 10, kind: input, shape index: {}]   ;;  %s4977_s11 = inlined_call_operand.vmem [shape: bf16[32,96], index: 11, kind: input, shape index: {}]   ;;  %s4978_s12 = inlined_call_operand.vmem [shape: bf16[32,96], index: 12, kind: input, shape index: {}]   ;;  %s4979_s13 = inlined_call_operand.hbm [shape: f32[1,96], index: 13, kind: input, shape index: {}]   ;;  %s4980_s14 = inlined_call_operand.hbm [shape: f32[1,96], index: 14, kind: input, shape index: {}]   ;;  %s4981_s15 = inlined_call_operand.vmem [shape: f32[1,32], index: 15, kind: input, shape index: {}]   ;;  %s4982_s16 = inlined_call_operand.vmem [shape: f32[1,32], index: 16, kind: input, shape index: {}]   ;;  %s4983_s17 = inlined_call_operand.vmem [shape: f32[8,8,32], index: 17, kind: output, shape index: {0}]   ;;  %s4984_s18 = inlined_call_operand.vmem [shape: f32[8,8,32], index: 18, kind: output, shape index: {1}]  }
   0x1   :  { %4988 = sst [smem:[#allocation15_spill]] %s4966_s0 }
   0x2   :  { %4989 = sst [smem:[#allocation16_spill]] %s4967_s1 }
   0x3   :  { %4990 = sst [smem:[#allocation17_spill]] %s4968_s2 }
   0x4   :  { %24 = vsyncpa [#allocation9], 0 }
   0x5   :  { %25 = vsyncpa [#allocation11], 0  ;;  %s66_s29 = sshll.u32 %s4979_s13, 4  ;;  %s3982_s30 = smov [#allocation10]   ;;  %s67_s29 = int_to_ptr.hbm [resolvable:$true] %s66_s29 }
   0x6   :  { %s68_s0 = sshll.u32 %s3982_s30, 4  ;;  %s43_s20 = sshll.u32 %s4972_s6, 4  ;;  %s69_s0 = int_to_ptr.vmem [resolvable:$true] %s68_s0  ;;  %s44_s20 = int_to_ptr.hbm [resolvable:$true] %s43_s20 }
   0x7   :  { %71 = dma.hbm_to_vmem [thread:$0]  %s67_s29, 16, %s69_s0, [#allocation11]  }
   0x8   :  { %s3983_s21 = smov [#allocation8]   ;;  %s77_s24 = sshll.u32 %s4980_s14, 4  ;;  %s78_s24 = int_to_ptr.hbm [resolvable:$true] %s77_s24 }
   0x9   :  { %s45_s22 = sshll.u32 %s3983_s21, 4  ;;  %s3984_s13 = smov [#allocation12]   ;;  %s46_s22 = int_to_ptr.vmem [resolvable:$true] %s45_s22 }
   0xa   :  { %48 = dma.hbm_to_vmem [thread:$0]  %s44_s20, 16, %s46_s22, [#allocation9]  }
   0xb   :  { %s79_s25 = sshll.u32 %s3984_s13, 4  ;;  %s80_s25 = int_to_ptr.vmem [resolvable:$true] %s79_s25 }
   0xc   :  { %82 = dma.hbm_to_vmem [thread:$0]  %s78_s24, 16, %s80_s25, [#allocation11]  }
   0xd   :  { %3978 = dma.done.wait [#allocation9], 16  }
   0xe   :  { %3979 = vsyncadd [#allocation9], 4294967280 }
   0xf   :  { %3980 = dma.done.wait [#allocation11], 32  }
  0x10   :  { %3981 = vsyncadd [#allocation11], 4294967264  ;;  %s4991_s27 = sld [smem:[#allocation17_spill]]  ;;  %v3596_v1 = vld [vmem:[%s4969_s3 + $0x8] sm:$0xff]  ;;  %v3595_v4 = vld [vmem:[%s4969_s3] sm:$0xff]  ;;  %vm148_vm0 = vcmask 261120  }
  0x11   :  { %s4992_s0 = sld [smem:[#allocation16_spill]]  ;;  %280 = vmatpush.bf16.msra.mxu2 %v3596_v1  ;;  %v3985_v7 = vmov 0   ;;  %v3598_v8 = vld [vmem:[%s4970_s4 + $0x8] sm:$0xff]  ;;  %v3597_v9 = vld [vmem:[%s4970_s4] sm:$0xff]  ;;  %s3986_s21 = smov 64  }
  0x12   :  { %s4993_s13 = sld [smem:[#allocation15_spill]]  ;;  %309 = vmatpush.bf16.msra.mxu3 %v3598_v8  ;;  %v4139_v13 = vld [vmem:[#allocation8] ss:$0 sm:$0xff]  ;;  %s3987_s22 = smov 32  }
  0x13   :  { %v4144_v14 = vld [vmem:[%s4971_s5] ss:$0 sm:$0xff] }
  0x15   :  { %281 = vmatpush.bf16.msra.mxu2 %v3595_v4 }
  0x16   :  { %v3594_v0 = vld [vmem:[%s4991_s27 + $0x8] sm:$0xff]  ;;  %v3593_v3 = vld [vmem:[%s4991_s27] sm:$0xff]  ;;  %310 = vmatpush.bf16.msra.mxu3 %v3597_v9 }
  0x17   :  { %v3592_v2 = vld [vmem:[%s4992_s0 + $0x8] sm:$0xff]  ;;  %224 = vmatpush.bf16.msra.mxu1 %v3594_v0  ;;  %v3591_v5 = vld [vmem:[%s4992_s0] sm:$0xff] }
  0x18   :  { %167 = vmatpush.bf16.msra.mxu0 %v3592_v2  ;;  %v3587_v6 = vld [vmem:[%s4993_s13] sm:$0xff]  ;;  %282 = vmatmul.bf16.vlgmr.msra.gmra.mxu2 %v3985_v7  ;;  %v3588_v10 = vld [vmem:[%s4993_s13 + $0x8] sm:$0xff]  ;;  %v3589_v11 = vld [vmem:[%s4993_s13 + $0x10] sm:$0xff] }
  0x19   :  { %311 = vmatmul.bf16.vlgmr.msra.gmra.mxu3 %v3985_v7  ;;  %v3590_v12 = vld [vmem:[%s4993_s13 + $0x18] sm:$0xff] }
  0x1b   :  { %225 = vmatpush.bf16.msra.mxu1 %v3593_v3 }
  0x1c   :  { %168 = vmatpush.bf16.msra.mxu0 %v3591_v5 }
  0x1e   :  { %3205 = vmatmul.msk.bf16.vlgmr.msra.gmra.mxu1 %vm148_vm0, %v3587_v6 }
  0x1f   :  { %3193 = vmatmul.msk.bf16.vlgmr.msra.gmra.mxu0 %vm148_vm0, %v3587_v6 }
  0x2e   :  { %3206 = vmatmul.msk.bf16.gmra.mxu1 %vm148_vm0, %v3588_v10 }
  0x2f   :  { %3194 = vmatmul.msk.bf16.gmra.mxu0 %vm148_vm0, %v3588_v10 }
  0x3e   :  { %3207 = vmatmul.msk.bf16.gmra.mxu1 %vm148_vm0, %v3589_v11 }
  0x3f   :  { %3195 = vmatmul.msk.bf16.gmra.mxu0 %vm148_vm0, %v3589_v11 }
  0x4e   :  { %3208 = vmatmul.msk.bf16.gmra.mxu1 %vm148_vm0, %v3590_v12 }
  0x4f   :  { %3196 = vmatmul.msk.bf16.gmra.mxu0 %vm148_vm0, %v3590_v12 }
  0x9b   :  { %v227_v15 = vpop.f32.mrf.mxu1  ;;  %v283_v19 = vpop.f32.mrf.mxu2 }
  0x9c   :  { %v4147_v16 = vadd.f32 %v4139_v13, %v227_v15  ;;  %v170_v17 = vpop.f32.mrf.mxu0  ;;  %v312_v26 = vpop.f32.mrf.mxu3 }
  0x9d   :  { %v171_v18 = vadd.f32 %v4144_v14, %v170_v17 }
  0x9f   :  { %v317_v20 = vadd.f32 %v283_v19, %v171_v18  ;;  %v3602_v19 = vld [vmem:[%s4970_s4 + $0x8] sm:$0xff] }
  0xa0   :  { %471 = vmatpush.bf16.msrb.mxu3 %v3602_v19 }
  0xa1   :  { %3680 = vtanh.f32 %v317_v20  ;;  %v3225_v39 = vmul.f32 -1.442695, %v317_v20  ;;  %v3600_v20 = vld [vmem:[%s4969_s3 + $0x8] sm:$0xff] }
  0xa2   :  { %435 = vmatpush.bf16.msrb.mxu2 %v3600_v20 }
  0xa3   :  { %v4150_v21 = vpop.f32.mrf.mxu1  ;;  %v285_v22 = vpop.f32.mrf.mxu2 }
  0xa4   :  { %v314_v28 = vpop.f32.mrf.mxu3 }
  0xa7   :  { %v3681_v23 = vpop.eup %3680 }
  0xa8   :  { %340 = vrot.lane.b32.xlu1 %v3681_v23, %s3986_s21  ;;  %v3601_v23 = vld [vmem:[%s4970_s4] sm:$0xff] }
  0xa9   :  { %472 = vmatpush.bf16.msrb.mxu3 %v3601_v23 }
  0xab   :  { %v232_v24 = vpop.f32.mrf.mxu1 }
  0xac   :  { %v4154_v25 = vadd.f32 %v4139_v13, %v232_v24  ;;  %v3599_v24 = vld [vmem:[%s4969_s3] sm:$0xff] }
  0xad   :  { %436 = vmatpush.bf16.msrb.mxu2 %v3599_v24 }
  0xb3   :  { %v4156_v27 = vpop.f32.mrf.mxu1 }
  0xbb   :  { %v237_v29 = vpop.f32.mrf.mxu1 }
  0xbc   :  { %v4159_v30 = vadd.f32 %v4139_v13, %v237_v29 }
  0xc3   :  { %v239_v31 = vpop.f32.mrf.mxu1 }
  0xc4   :  { %v4162_v32 = vadd.f32 %v4139_v13, %v239_v31 }
  0xcb   :  { %v242_v33 = vpop.f32.mrf.mxu1 }
  0xcc   :  { %v4165_v34 = vadd.f32 %v4139_v13, %v242_v33 }
  0xd3   :  { %v244_v35 = vpop.f32.mrf.mxu1 }
  0xd4   :  { %v245_v36 = vadd.f32 %v4139_v13, %v244_v35  ;;  %v172_v35 = vpop.f32.mrf.mxu0 }
  0xd6   :  { %v357_v37 = vadd.f32 %v312_v26, %v245_v36  ;;  %v173_v36 = vadd.f32 %v4144_v14, %v172_v35 }
  0xd8   :  { %3682 = vtanh.f32 %v357_v37  ;;  %v3226_v54 = vmul.f32 -1.442695, %v357_v37 }
  0xd9   :  { %3684 = vpow2.f32 %v3225_v39 }
  0xde   :  { %v3683_v38 = vpop.eup %3682 }
  0xdf   :  { %380 = vrot.lane.b32.xlu0 %v3683_v38, %s3986_s21  ;;  %v3685_v40 = vpop.eup %3684 }
  0xe0   :  { %v321_v41 = vadd.f32 1.0, %v3685_v40 }
  0xe2   :  { %3686 = vrcp.f32 %v321_v41  ;;  %vm327_vm1 = vweird.f32 %v321_v41  ;;  %v333_v46 = vand.u32 2147483648, %v321_v41  ;;  %v331_v48 = vand.u32 2147483647, %v321_v41 }
  0xe3   :  { %3688 = vpow2.f32 %v3226_v54 }
  0xe4   :  { %v334_v49 = vor.u32 1.1754944e-38, %v333_v46  ;;  %vm332_vm4 = vcmp.eq.f32.partialorder %v331_v48, 8.507059e+37 }
  0xe8   :  { %v3687_v42 = vpop.eup %3686 }
  0xe9   :  { %v323_v43 = vmul.f32 %v3687_v42, %v321_v41  ;;  %vm328_vm2 = vweird.f32 %v3687_v42  ;;  %v3689_v55 = vpop.eup %3688 }
  0xea   :  { %vm329_vm3 = vmor %vm327_vm1, %vm328_vm2  ;;  %v361_v56 = vadd.f32 1.0, %v3689_v55 }
  0xeb   :  { %v324_v44 = vsub.f32 1.0, %v323_v43 }
  0xec   :  { %3690 = vrcp.f32 %v361_v56  ;;  %v373_v62 = vand.u32 2147483648, %v361_v56  ;;  %vm367_vm6 = vweird.f32 %v361_v56  ;;  %v371_v63 = vand.u32 2147483647, %v361_v56 }
  0xed   :  { %v325_v45 = vmul.f32 %v3687_v42, %v324_v44 }
  0xee   :  { %v374_v1 = vor.u32 1.1754944e-38, %v373_v62  ;;  %vm372_vm8 = vcmp.eq.f32.partialorder %v371_v63, 8.507059e+37 }
  0xef   :  { %v326_v47 = vadd.f32 %v3687_v42, %v325_v45 }
  0xf1   :  { %v330_v50 = vsel %vm329_vm3, %v3687_v42, %v326_v47 }
  0xf2   :  { %v335_v52 = vsel %vm332_vm4, %v334_v49, %v330_v50  ;;  %v3691_v57 = vpop.eup %3690 }
  0xf3   :  { %v363_v58 = vmul.f32 %v3691_v57, %v361_v56  ;;  %vm368_vm5 = vweird.f32 %v3691_v57  ;;  %v338_v5 = vmul.f32 0.0, %v335_v52 }
  0xf4   :  { %vm369_vm7 = vmor %vm367_vm6, %vm368_vm5 }
  0xf5   :  { %v364_v59 = vsub.f32 1.0, %v363_v58 }
  0xf7   :  { %v365_v60 = vmul.f32 %v3691_v57, %v364_v59 }
  0xf9   :  { %v366_v61 = vadd.f32 %v3691_v57, %v365_v60 }
  0xfb   :  { %v370_v0 = vsel %vm369_vm7, %v3691_v57, %v366_v61 }
  0xfc   :  { %v375_v3 = vsel %vm372_vm8, %v374_v1, %v370_v0 }
  0xfd   :  { %v378_v10 = vmul.f32 0.0, %v375_v3 }
 0x11a   :  { %v341_v51 = vpop.permute.xlu1 %340 }
 0x11b   :  { %v343_v53 = vmul.f32 %v341_v51, %v335_v52 }
 0x11d   :  { %345 = vrot.lane.b32.xlu1 %v343_v53, %s3987_s22 }
 0x151   :  { %v381_v2 = vpop.permute.xlu0 %380 }
 0x152   :  { %v383_v4 = vmul.f32 %v381_v2, %v375_v3 }
 0x154   :  { %385 = vrot.lane.b32.xlu0 %v383_v4, %s3987_s22 }
 0x18f   :  { %v346_v6 = vpop.permute.xlu1 %345 }
 0x190   :  { %v4171_v8 = vadd.f32 %v346_v6, %v338_v5 }
 0x192   :  { %3692 = vtanh.f32 %v4171_v8 }
 0x198   :  { %v3693_v9 = vpop.eup %3692 }
 0x199   :  { %351 = vrot.lane.b32.xlu0 %v3693_v9, %s3986_s21 }
 0x1c6   :  { %v386_v11 = vpop.permute.xlu0 %385 }
 0x1c7   :  { %v4175_v12 = vadd.f32 %v386_v11, %v378_v10 }
 0x1c9   :  { %3694 = vtanh.f32 %v4175_v12 }
 0x1cf   :  { %v3695_v15 = vpop.eup %3694 }
 0x1d0   :  { %391 = vrot.lane.b32.xlu2 %v3695_v15, %s3986_s21 }
 0x20b   :  { %v352_v17 = vpop.permute.xlu0 %351 }
 0x20c   :  { %v4179_v18 = vmul.f32 %v352_v17, %v335_v52 }
 0x20e   :  { %v406_v22 = vpack.c.bf16 %v4179_v18, %v4179_v18 }
 0x210   :  { %412 = vrot.lane.b32.xlu1 %v406_v22, %s3987_s22 }
 0x22a   :  { %v392_v26 = vpop.permute.xlu2 %391 }
 0x22b   :  { %v4196_v28 = vmul.f32 %v392_v26, %v375_v3 }
 0x22d   :  { %v442_v29 = vpack.c.bf16 %v4196_v28, %v4196_v28 }
 0x22f   :  { %448 = vrot.lane.b32.xlu2 %v442_v29, %s3987_s22 }
 0x282   :  { %v413_v31 = vpop.permute.xlu1 %412 }
 0x283   :  { %3235 = vmatmul.msk.bf16.vlgmr.msrb.gmra.mxu2 %vm148_vm0, %v413_v31  ;;  %v3604_v31 = vld [vmem:[%s4969_s3 + $0x8] sm:$0xff] }
 0x284   :  { %599 = vmatpush.bf16.msra.mxu2 %v3604_v31 }
 0x289   :  { %v449_v33 = vpop.permute.xlu2 %448 }
 0x28a   :  { %3244 = vmatmul.msk.bf16.vlgmr.msrb.gmra.mxu3 %vm148_vm0, %v449_v33  ;;  %v3603_v33 = vld [vmem:[%s4969_s3] sm:$0xff] }
 0x28b   :  { %600 = vmatpush.bf16.msra.mxu2 %v3603_v33 }
 0x306   :  { %v438_v37 = vpop.f32.mrf.mxu2 }
 0x307   :  { %v480_v38 = vadd.f32 %v438_v37, %v173_v36 }
 0x309   :  { %3696 = vtanh.f32 %v480_v38  ;;  %v3245_v48 = vmul.f32 -1.442695, %v480_v38  ;;  %v3606_v38 = vld [vmem:[%s4970_s4 + $0x8] sm:$0xff] }
 0x30a   :  { %635 = vmatpush.bf16.msra.mxu3 %v3606_v38 }
 0x30d   :  { %v474_v39 = vpop.f32.mrf.mxu3 }
 0x30e   :  { %v520_v40 = vadd.f32 %v474_v39, %v4165_v34  ;;  %v440_v41 = vpop.f32.mrf.mxu2  ;;  %v3605_v39 = vld [vmem:[%s4970_s4] sm:$0xff] }
 0x30f   :  { %v3697_v42 = vpop.eup %3696  ;;  %636 = vmatpush.bf16.msra.mxu3 %v3605_v39 }
 0x310   :  { %3698 = vtanh.f32 %v520_v40  ;;  %503 = vrot.lane.b32.xlu1 %v3697_v42, %s3986_s21  ;;  %v3246_v45 = vmul.f32 -1.442695, %v520_v40  ;;  %v175_v42 = vpop.f32.mrf.mxu0 }
 0x312   :  { %3700 = vpow2.f32 %v3246_v45 }
 0x315   :  { %v476_v43 = vpop.f32.mrf.mxu3 }
 0x316   :  { %v3699_v44 = vpop.eup %3698  ;;  %v176_v43 = vadd.f32 %v4144_v14, %v175_v42 }
 0x317   :  { %543 = vrot.lane.b32.xlu2 %v3699_v44, %s3986_s21 }
 0x318   :  { %v3701_v46 = vpop.eup %3700 }
 0x319   :  { %v524_v47 = vadd.f32 1.0, %v3701_v46 }
 0x31b   :  { %3702 = vrcp.f32 %v524_v47  ;;  %v536_v55 = vand.u32 2147483648, %v524_v47  ;;  %vm530_vm10 = vweird.f32 %v524_v47  ;;  %v534_v56 = vand.u32 2147483647, %v524_v47 }
 0x31c   :  { %3704 = vpow2.f32 %v3245_v48 }
 0x31d   :  { %v537_v59 = vor.u32 1.1754944e-38, %v536_v55  ;;  %vm535_vm12 = vcmp.eq.f32.partialorder %v534_v56, 8.507059e+37 }
 0x321   :  { %v3703_v49 = vpop.eup %3702 }
 0x322   :  { %v526_v50 = vmul.f32 %v3703_v49, %v524_v47  ;;  %v3705_v51 = vpop.eup %3704  ;;  %vm531_vm9 = vweird.f32 %v3703_v49 }
 0x323   :  { %v484_v52 = vadd.f32 1.0, %v3705_v51  ;;  %vm532_vm11 = vmor %vm530_vm10, %vm531_vm9 }
 0x324   :  { %v527_v34 = vsub.f32 1.0, %v526_v50 }
 0x325   :  { %3706 = vrcp.f32 %v484_v52  ;;  %v496_v3 = vand.u32 2147483648, %v484_v52  ;;  %vm490_vm14 = vweird.f32 %v484_v52  ;;  %v494_v4 = vand.u32 2147483647, %v484_v52 }
 0x326   :  { %v528_v53 = vmul.f32 %v3703_v49, %v527_v34 }
 0x327   :  { %v497_v6 = vor.u32 1.1754944e-38, %v496_v3  ;;  %vm495_vm1 = vcmp.eq.f32.partialorder %v494_v4, 8.507059e+37 }
 0x328   :  { %v529_v54 = vadd.f32 %v3703_v49, %v528_v53 }
 0x32a   :  { %v533_v57 = vsel %vm532_vm11, %v3703_v49, %v529_v54 }
 0x32b   :  { %v3707_v58 = vpop.eup %3706  ;;  %v538_v61 = vsel %vm535_vm12, %v537_v59, %v533_v57 }
 0x32c   :  { %v486_v63 = vmul.f32 %v3707_v58, %v484_v52  ;;  %vm491_vm13 = vweird.f32 %v3707_v58  ;;  %v541_v20 = vmul.f32 %v538_v61, %v4175_v12 }
 0x32d   :  { %vm492_vm15 = vmor %vm490_vm14, %vm491_vm13 }
 0x32e   :  { %v487_v0 = vsub.f32 1.0, %v486_v63 }
 0x330   :  { %v488_v1 = vmul.f32 %v3707_v58, %v487_v0 }
 0x332   :  { %v489_v2 = vadd.f32 %v3707_v58, %v488_v1 }
 0x334   :  { %v493_v5 = vsel %vm492_vm15, %v3707_v58, %v489_v2 }
 0x335   :  { %v498_v10 = vsel %vm495_vm1, %v497_v6, %v493_v5 }
 0x336   :  { %v501_v15 = vmul.f32 %v498_v10, %v4171_v8 }
 0x371   :  { %v544_v60 = vpop.permute.xlu2 %543 }
 0x372   :  { %v546_v62 = vmul.f32 %v544_v60, %v538_v61 }
 0x374   :  { %548 = vrot.lane.b32.xlu0 %v546_v62, %s3987_s22 }
 0x382   :  { %v504_v9 = vpop.permute.xlu1 %503 }
 0x383   :  { %v506_v11 = vmul.f32 %v504_v9, %v498_v10 }
 0x385   :  { %508 = vrot.lane.b32.xlu2 %v506_v11, %s3987_s22 }
 0x3df   :  { %v509_v17 = vpop.permute.xlu2 %508 }
 0x3e0   :  { %v4210_v19 = vadd.f32 %v509_v17, %v501_v15 }
 0x3e2   :  { %3708 = vtanh.f32 %v4210_v19 }
 0x3e6   :  { %v549_v22 = vpop.permute.xlu0 %548 }
 0x3e7   :  { %v4214_v23 = vadd.f32 %v549_v22, %v541_v20 }
 0x3e8   :  { %v3709_v24 = vpop.eup %3708 }
 0x3e9   :  { %3710 = vtanh.f32 %v4214_v23  ;;  %514 = vrot.lane.b32.xlu2 %v3709_v24, %s3986_s21 }
 0x3ef   :  { %v3711_v26 = vpop.eup %3710 }
 0x3f0   :  { %554 = vrot.lane.b32.xlu0 %v3711_v26, %s3986_s21 }
 0x443   :  { %v515_v29 = vpop.permute.xlu2 %514 }
 0x444   :  { %v4219_v8 = vmul.f32 %v515_v29, %v498_v10 }
 0x446   :  { %v570_v12 = vpack.c.bf16 %v4219_v8, %v4219_v8 }
 0x448   :  { %576 = vrot.lane.b32.xlu0 %v570_v12, %s3987_s22 }
 0x462   :  { %v555_v35 = vpop.permute.xlu0 %554 }
 0x463   :  { %v4230_v36 = vmul.f32 %v555_v35, %v538_v61 }
 0x465   :  { %v606_v37 = vpack.c.bf16 %v4230_v36, %v4230_v36 }
 0x467   :  { %612 = vrot.lane.b32.xlu1 %v606_v37, %s3987_s22 }
 0x4ba   :  { %v577_v40 = vpop.permute.xlu0 %576 }
 0x4bb   :  { %3255 = vmatmul.msk.bf16.vlgmr.msra.gmra.mxu2 %vm148_vm0, %v577_v40  ;;  %v3608_v40 = vld [vmem:[%s4969_s3 + $0x8] sm:$0xff] }
 0x4bc   :  { %763 = vmatpush.bf16.msrb.mxu2 %v3608_v40 }
 0x4d9   :  { %v613_v41 = vpop.permute.xlu1 %612 }
 0x4da   :  { %3264 = vmatmul.msk.bf16.vlgmr.msra.gmra.mxu3 %vm148_vm0, %v613_v41  ;;  %v3607_v41 = vld [vmem:[%s4969_s3] sm:$0xff] }
 0x4db   :  { %764 = vmatpush.bf16.msrb.mxu2 %v3607_v41 }
 0x53e   :  { %v602_v44 = vpop.f32.mrf.mxu2 }
 0x53f   :  { %v644_v45 = vadd.f32 %v602_v44, %v176_v43 }
 0x541   :  { %3712 = vtanh.f32 %v644_v45  ;;  %v3265_v34 = vmul.f32 -1.442695, %v644_v45 }
 0x546   :  { %v604_v46 = vpop.f32.mrf.mxu2 }
 0x547   :  { %v3713_v47 = vpop.eup %3712 }
 0x548   :  { %667 = vrot.lane.b32.xlu0 %v3713_v47, %s3986_s21 }
 0x55d   :  { %v638_v48 = vpop.f32.mrf.mxu3 }
 0x55e   :  { %v684_v49 = vadd.f32 %v638_v48, %v4162_v32 }
 0x560   :  { %3714 = vtanh.f32 %v684_v49  ;;  %v3266_v56 = vmul.f32 -1.442695, %v684_v49 }
 0x561   :  { %3716 = vpow2.f32 %v3265_v34 }
 0x565   :  { %v640_v50 = vpop.f32.mrf.mxu3 }
 0x566   :  { %v3715_v51 = vpop.eup %3714  ;;  %v177_v50 = vpop.f32.mrf.mxu0 }
 0x567   :  { %707 = vrot.lane.b32.xlu1 %v3715_v51, %s3986_s21  ;;  %v3717_v52 = vpop.eup %3716  ;;  %v178_v51 = vadd.f32 %v4144_v14, %v177_v50  ;;  %v3614_v50 = vld [vmem:[%s4970_s4 + $0x8] sm:$0xff] }
 0x568   :  { %v648_v53 = vadd.f32 1.0, %v3717_v52  ;;  %963 = vmatpush.bf16.msrb.mxu1 %v3614_v50 }
 0x56a   :  { %3718 = vrcp.f32 %v648_v53  ;;  %v660_v32 = vand.u32 2147483648, %v648_v53  ;;  %vm654_vm3 = vweird.f32 %v648_v53  ;;  %v658_v61 = vand.u32 2147483647, %v648_v53 }
 0x56b   :  { %3720 = vpow2.f32 %v3266_v56 }
 0x56c   :  { %v661_v0 = vor.u32 1.1754944e-38, %v660_v32  ;;  %vm659_vm5 = vcmp.eq.f32.partialorder %v658_v61, 8.507059e+37 }
 0x570   :  { %v3719_v54 = vpop.eup %3718 }
 0x571   :  { %v650_v55 = vmul.f32 %v3719_v54, %v648_v53  ;;  %v3721_v59 = vpop.eup %3720  ;;  %vm655_vm2 = vweird.f32 %v3719_v54 }
 0x572   :  { %v688_v62 = vadd.f32 1.0, %v3721_v59  ;;  %vm656_vm4 = vmor %vm654_vm3, %vm655_vm2 }
 0x573   :  { %v651_v57 = vsub.f32 1.0, %v650_v55 }
 0x574   :  { %3722 = vrcp.f32 %v688_v62  ;;  %v700_v11 = vand.u32 2147483648, %v688_v62  ;;  %vm694_vm7 = vweird.f32 %v688_v62  ;;  %v698_v15 = vand.u32 2147483647, %v688_v62 }
 0x575   :  { %v652_v58 = vmul.f32 %v3719_v54, %v651_v57 }
 0x576   :  { %v701_v20 = vor.u32 1.1754944e-38, %v700_v11  ;;  %vm699_vm9 = vcmp.eq.f32.partialorder %v698_v15, 8.507059e+37 }
 0x577   :  { %v653_v60 = vadd.f32 %v3719_v54, %v652_v58 }
 0x579   :  { %v657_v63 = vsel %vm656_vm4, %v3719_v54, %v653_v60 }
 0x57a   :  { %v662_v2 = vsel %vm659_vm5, %v661_v0, %v657_v63  ;;  %v3723_v4 = vpop.eup %3722 }
 0x57b   :  { %v690_v5 = vmul.f32 %v3723_v4, %v688_v62  ;;  %vm695_vm6 = vweird.f32 %v3723_v4  ;;  %v665_v29 = vmul.f32 %v662_v2, %v4210_v19  ;;  %v3610_v19 = vld [vmem:[%s4970_s4 + $0x8] sm:$0xff] }
 0x57c   :  { %vm696_vm8 = vmor %vm694_vm7, %vm695_vm6  ;;  %799 = vmatpush.bf16.msrb.mxu3 %v3610_v19 }
 0x57d   :  { %v691_v6 = vsub.f32 1.0, %v690_v5 }
 0x57f   :  { %v692_v9 = vmul.f32 %v3723_v4, %v691_v6 }
 0x581   :  { %v693_v10 = vadd.f32 %v3723_v4, %v692_v9 }
 0x583   :  { %v697_v17 = vsel %vm696_vm8, %v3723_v4, %v693_v10 }
 0x584   :  { %v702_v24 = vsel %vm699_vm9, %v701_v20, %v697_v17 }
 0x585   :  { %v705_v33 = vmul.f32 %v702_v24, %v4214_v23  ;;  %v3609_v23 = vld [vmem:[%s4970_s4] sm:$0xff] }
 0x586   :  { %800 = vmatpush.bf16.msrb.mxu3 %v3609_v23 }
 0x5ba   :  { %v668_v1 = vpop.permute.xlu0 %667 }
 0x5bb   :  { %v670_v3 = vmul.f32 %v668_v1, %v662_v2 }
 0x5bd   :  { %672 = vrot.lane.b32.xlu1 %v670_v3, %s3987_s22 }
 0x5d9   :  { %v708_v22 = vpop.permute.xlu1 %707 }
 0x5da   :  { %v710_v26 = vmul.f32 %v708_v22, %v702_v24 }
 0x5dc   :  { %712 = vrot.lane.b32.xlu2 %v710_v26, %s3987_s22 }
 0x62f   :  { %v673_v31 = vpop.permute.xlu1 %672 }
 0x630   :  { %v4250_v12 = vadd.f32 %v673_v31, %v665_v29 }
 0x632   :  { %3724 = vtanh.f32 %v4250_v12 }
 0x636   :  { %v713_v35 = vpop.permute.xlu2 %712 }
 0x637   :  { %v4254_v37 = vadd.f32 %v713_v35, %v705_v33 }
 0x638   :  { %v3725_v38 = vpop.eup %3724 }
 0x639   :  { %3726 = vtanh.f32 %v4254_v37  ;;  %678 = vrot.lane.b32.xlu1 %v3725_v38, %s3986_s21 }
 0x63f   :  { %v3727_v39 = vpop.eup %3726 }
 0x640   :  { %718 = vrot.lane.b32.xlu2 %v3727_v39, %s3986_s21 }
 0x69a   :  { %v719_v42 = vpop.permute.xlu2 %718 }
 0x69b   :  { %v4271_v43 = vmul.f32 %v719_v42, %v702_v24 }
 0x69d   :  { %v770_v44 = vpack.c.bf16 %v4271_v43, %v4271_v43 }
 0x69f   :  { %776 = vrot.lane.b32.xlu0 %v770_v44, %s3987_s22 }
 0x6ab   :  { %v679_v45 = vpop.permute.xlu1 %678 }
 0x6ac   :  { %v4276_v46 = vmul.f32 %v679_v45, %v662_v2 }
 0x6ae   :  { %v734_v47 = vpack.c.bf16 %v4276_v46, %v4276_v46 }
 0x6b0   :  { %740 = vrot.lane.b32.xlu2 %v734_v47, %s3987_s22 }
 0x70a   :  { %v741_v48 = vpop.permute.xlu2 %740 }
 0x70b   :  { %3275 = vmatmul.msk.bf16.vlgmr.msrb.gmra.mxu2 %vm148_vm0, %v741_v48 }
 0x711   :  { %v777_v49 = vpop.permute.xlu0 %776 }
 0x712   :  { %3284 = vmatmul.msk.bf16.vlgmr.msrb.gmra.mxu3 %vm148_vm0, %v777_v49 }
 0x78e   :  { %v766_v34 = vpop.f32.mrf.mxu2 }
 0x78f   :  { %v808_v52 = vadd.f32 %v766_v34, %v178_v51  ;;  %v3612_v51 = vld [vmem:[%s4969_s3 + $0x8] sm:$0xff]  ;;  %v3613_v34 = vld [vmem:[%s4970_s4] sm:$0xff] }
 0x790   :  { %927 = vmatpush.bf16.msrb.mxu0 %v3612_v51  ;;  %964 = vmatpush.bf16.msrb.mxu1 %v3613_v34 }
 0x791   :  { %3728 = vtanh.f32 %v808_v52  ;;  %v3285_v59 = vmul.f32 -1.442695, %v808_v52  ;;  %v3611_v52 = vld [vmem:[%s4969_s3] sm:$0xff] }
 0x794   :  { %928 = vmatpush.bf16.msrb.mxu0 %v3611_v52 }
 0x795   :  { %v802_v53 = vpop.f32.mrf.mxu3 }
 0x796   :  { %v848_v54 = vadd.f32 %v802_v53, %v4159_v30  ;;  %v768_v55 = vpop.f32.mrf.mxu2 }
 0x797   :  { %v3729_v56 = vpop.eup %3728 }
 0x798   :  { %3730 = vtanh.f32 %v848_v54  ;;  %831 = vrot.lane.b32.xlu2 %v3729_v56, %s3986_s21  ;;  %v3286_v63 = vmul.f32 -1.442695, %v848_v54 }
 0x799   :  { %3732 = vpow2.f32 %v3285_v59 }
 0x79d   :  { %v804_v57 = vpop.f32.mrf.mxu3 }
 0x79e   :  { %v3731_v58 = vpop.eup %3730 }
 0x79f   :  { %871 = vrot.lane.b32.xlu0 %v3731_v58, %s3986_s21  ;;  %v3733_v60 = vpop.eup %3732  ;;  %v180_v58 = vpop.f32.mrf.mxu0 }
 0x7a0   :  { %v812_v32 = vadd.f32 1.0, %v3733_v60 }
 0x7a2   :  { %3734 = vrcp.f32 %v812_v32  ;;  %v824_v3 = vand.u32 2147483648, %v812_v32  ;;  %vm818_vm11 = vweird.f32 %v812_v32  ;;  %v822_v4 = vand.u32 2147483647, %v812_v32 }
 0x7a3   :  { %3736 = vpow2.f32 %v3286_v63 }
 0x7a4   :  { %v825_v9 = vor.u32 1.1754944e-38, %v824_v3  ;;  %vm823_vm13 = vcmp.eq.f32.partialorder %v822_v4, 8.507059e+37 }
 0x7a7   :  { %v4323_v59 = vpop.f32.mrf.mxu0 }
 0x7a8   :  { %v3735_v61 = vpop.eup %3734 }
 0x7a9   :  { %v814_v62 = vmul.f32 %v3735_v61, %v812_v32  ;;  %v3737_v1 = vpop.eup %3736  ;;  %vm819_vm10 = vweird.f32 %v3735_v61 }
 0x7aa   :  { %v852_v5 = vadd.f32 1.0, %v3737_v1  ;;  %vm820_vm12 = vmor %vm818_vm11, %vm819_vm10 }
 0x7ab   :  { %v815_v0 = vsub.f32 1.0, %v814_v62 }
 0x7ac   :  { %3738 = vrcp.f32 %v852_v5  ;;  %v864_v29 = vand.u32 2147483648, %v852_v5  ;;  %vm858_vm15 = vweird.f32 %v852_v5  ;;  %v862_v31 = vand.u32 2147483647, %v852_v5 }
 0x7ad   :  { %v816_v30 = vmul.f32 %v3735_v61, %v815_v0  ;;  %v235_v0 = vadd.f32 %v4139_v13, %v4156_v27 }
 0x7ae   :  { %v865_v35 = vor.u32 1.1754944e-38, %v864_v29  ;;  %vm863_vm2 = vcmp.eq.f32.partialorder %v862_v31, 8.507059e+37 }
 0x7af   :  { %v817_v2 = vadd.f32 %v3735_v61, %v816_v30  ;;  %v4325_v60 = vpop.f32.mrf.mxu0 }
 0x7b1   :  { %v821_v6 = vsel %vm820_vm12, %v3735_v61, %v817_v2  ;;  %v181_v61 = vadd.f32 %v4144_v14, %v180_v58 }
 0x7b2   :  { %v826_v11 = vsel %vm823_vm13, %v825_v9, %v821_v6  ;;  %v3739_v17 = vpop.eup %3738 }
 0x7b3   :  { %v854_v20 = vmul.f32 %v3739_v17, %v852_v5  ;;  %vm859_vm14 = vweird.f32 %v3739_v17  ;;  %v829_v40 = vmul.f32 %v826_v11, %v4250_v12 }
 0x7b4   :  { %vm860_vm1 = vmor %vm858_vm15, %vm859_vm14 }
 0x7b5   :  { %v855_v22 = vsub.f32 1.0, %v854_v20 }
 0x7b7   :  { %v856_v24 = vmul.f32 %v3739_v17, %v855_v22  ;;  %v4327_v32 = vpop.f32.mrf.mxu0 }
 0x7b9   :  { %v857_v26 = vadd.f32 %v3739_v17, %v856_v24 }
 0x7bb   :  { %v861_v33 = vsel %vm860_vm1, %v3739_v17, %v857_v26 }
 0x7bc   :  { %v866_v39 = vsel %vm863_vm2, %v865_v35, %v861_v33 }
 0x7bd   :  { %v869_v44 = vmul.f32 %v866_v39, %v4254_v37 }
 0x7f2   :  { %v832_v10 = vpop.permute.xlu2 %831 }
 0x7f3   :  { %v834_v15 = vmul.f32 %v832_v10, %v826_v11 }
 0x7f5   :  { %836 = vrot.lane.b32.xlu0 %v834_v15, %s3987_s22 }
 0x811   :  { %v872_v38 = vpop.permute.xlu0 %871 }
 0x812   :  { %v874_v19 = vmul.f32 %v872_v38, %v866_v39 }
 0x814   :  { %876 = vrot.lane.b32.xlu1 %v874_v19, %s3987_s22 }
 0x867   :  { %v837_v23 = vpop.permute.xlu0 %836 }
 0x868   :  { %v4290_v41 = vadd.f32 %v837_v23, %v829_v40 }
 0x86a   :  { %3740 = vtanh.f32 %v4290_v41 }
 0x870   :  { %v3741_v42 = vpop.eup %3740 }
 0x871   :  { %842 = vrot.lane.b32.xlu0 %v3741_v42, %s3986_s21 }
 0x886   :  { %v877_v45 = vpop.permute.xlu1 %876 }
 0x887   :  { %v4295_v47 = vadd.f32 %v877_v45, %v869_v44 }
 0x889   :  { %3742 = vtanh.f32 %v4295_v47 }
 0x88f   :  { %v3743_v48 = vpop.eup %3742 }
 0x890   :  { %882 = vrot.lane.b32.xlu1 %v3743_v48, %s3986_s21 }
 0x8e3   :  { %v843_v49 = vpop.permute.xlu0 %842 }
 0x8e4   :  { %v4299_v12 = vmul.f32 %v843_v49, %v826_v11 }
 0x8e6   :  { %v898_v37 = vpack.c.bf16 %v4299_v12, %v4299_v12 }
 0x8e8   :  { %904 = vrot.lane.b32.xlu1 %v898_v37, %s3987_s22 }
 0x902   :  { %v883_v53 = vpop.permute.xlu1 %882 }
 0x903   :  { %v4316_v54 = vmul.f32 %v883_v53, %v866_v39 }
 0x905   :  { %v934_v55 = vpack.c.bf16 %v4316_v54, %v4316_v54 }
 0x907   :  { %940 = vrot.lane.b32.xlu2 %v934_v55, %s3987_s22 }
 0x95a   :  { %v905_v56 = vpop.permute.xlu1 %904 }
 0x95b   :  { %3295 = vmatmul.msk.bf16.vlgmr.msrb.gmra.mxu0 %vm148_vm0, %v905_v56 }
 0x961   :  { %v941_v57 = vpop.permute.xlu2 %940 }
 0x962   :  { %3304 = vmatmul.msk.bf16.vlgmr.msrb.gmra.mxu1 %vm148_vm0, %v941_v57 }
 0x9d8   :  { %v930_v62 = vpop.f32.mrf.mxu0 }
 0x9d9   :  { %v972_v63 = vadd.f32 %v930_v62, %v181_v61 }
 0x9db   :  { %3744 = vtanh.f32 %v972_v63  ;;  %v3305_v11 = vmul.f32 -1.442695, %v972_v63 }
 0x9df   :  { %v966_v30 = vpop.f32.mrf.mxu1 }
 0x9e0   :  { %v1012_v1 = vadd.f32 %v966_v30, %v235_v0  ;;  %v932_v2 = vpop.f32.mrf.mxu0  ;;  %v3616_v0 = vld [vmem:[%s4969_s3 + $0x8] sm:$0xff]  ;;  %v3615_v30 = vld [vmem:[%s4969_s3] sm:$0xff] }
 0x9e1   :  { %v3745_v3 = vpop.eup %3744  ;;  %1091 = vmatpush.bf16.msra.mxu2 %v3616_v0 }
 0x9e2   :  { %3746 = vtanh.f32 %v1012_v1  ;;  %995 = vrot.lane.b32.xlu1 %v3745_v3, %s3986_s21  ;;  %v3306_v6 = vmul.f32 -1.442695, %v1012_v1 }
 0x9e4   :  { %3748 = vpow2.f32 %v3306_v6 }
 0x9e5   :  { %1092 = vmatpush.bf16.msra.mxu2 %v3615_v30 }
 0x9e7   :  { %v968_v4 = vpop.f32.mrf.mxu1 }
 0x9e8   :  { %v3747_v5 = vpop.eup %3746  ;;  %v3618_v4 = vld [vmem:[%s4970_s4 + $0x8] sm:$0xff] }
 0x9e9   :  { %1035 = vrot.lane.b32.xlu2 %v3747_v5, %s3986_s21  ;;  %1127 = vmatpush.bf16.msra.mxu3 %v3618_v4  ;;  %v3617_v5 = vld [vmem:[%s4970_s4] sm:$0xff] }
 0x9ea   :  { %v3749_v9 = vpop.eup %3748 }
 0x9eb   :  { %v1016_v10 = vadd.f32 1.0, %v3749_v9 }
 0x9ed   :  { %3750 = vrcp.f32 %v1016_v10  ;;  %v1028_v26 = vand.u32 2147483648, %v1016_v10  ;;  %vm1022_vm4 = vweird.f32 %v1016_v10  ;;  %v1026_v29 = vand.u32 2147483647, %v1016_v10  ;;  %1128 = vmatpush.bf16.msra.mxu3 %v3617_v5 }
 0x9ee   :  { %3752 = vpow2.f32 %v3305_v11 }
 0x9ef   :  { %v1029_v35 = vor.u32 1.1754944e-38, %v1028_v26  ;;  %vm1027_vm6 = vcmp.eq.f32.partialorder %v1026_v29, 8.507059e+37 }
 0x9f3   :  { %v3751_v15 = vpop.eup %3750 }
 0x9f4   :  { %v1018_v13 = vmul.f32 %v3751_v15, %v1016_v10  ;;  %v3753_v27 = vpop.eup %3752  ;;  %vm1023_vm3 = vweird.f32 %v3751_v15  ;;  %v183_v10 = vadd.f32 %v4144_v14, %v4323_v59 }
 0x9f5   :  { %v976_v20 = vadd.f32 1.0, %v3753_v27  ;;  %vm1024_vm5 = vmor %vm1022_vm4, %vm1023_vm3 }
 0x9f6   :  { %v1019_v17 = vsub.f32 1.0, %v1018_v13 }
 0x9f7   :  { %3754 = vrcp.f32 %v976_v20  ;;  %v988_v45 = vand.u32 2147483648, %v976_v20  ;;  %vm982_vm8 = vweird.f32 %v976_v20  ;;  %v986_v48 = vand.u32 2147483647, %v976_v20 }
 0x9f8   :  { %v1020_v22 = vmul.f32 %v3751_v15, %v1019_v17 }
 0x9f9   :  { %v989_v50 = vor.u32 1.1754944e-38, %v988_v45  ;;  %vm987_vm10 = vcmp.eq.f32.partialorder %v986_v48, 8.507059e+37 }
 0x9fa   :  { %v1021_v24 = vadd.f32 %v3751_v15, %v1020_v22 }
 0x9fc   :  { %v1025_v31 = vsel %vm1024_vm5, %v3751_v15, %v1021_v24 }
 0x9fd   :  { %v3755_v33 = vpop.eup %3754  ;;  %v1030_v39 = vsel %vm1027_vm6, %v1029_v35, %v1025_v31 }
 0x9fe   :  { %v978_v40 = vmul.f32 %v3755_v33, %v976_v20  ;;  %vm983_vm7 = vweird.f32 %v3755_v33  ;;  %v1033_v56 = vmul.f32 %v1030_v39, %v4295_v47 }
 0x9ff   :  { %vm984_vm9 = vmor %vm982_vm8, %vm983_vm7 }
 0xa00   :  { %v979_v23 = vsub.f32 1.0, %v978_v40 }
 0xa02   :  { %v980_v42 = vmul.f32 %v3755_v33, %v979_v23 }
 0xa04   :  { %v981_v44 = vadd.f32 %v3755_v33, %v980_v42 }
 0xa06   :  { %v985_v49 = vsel %vm984_vm9, %v3755_v33, %v981_v44 }
 0xa07   :  { %v990_v37 = vsel %vm987_vm10, %v989_v50, %v985_v49 }
 0xa08   :  { %v993_v52 = vmul.f32 %v990_v37, %v4290_v41 }
 0xa43   :  { %v1036_v38 = vpop.permute.xlu2 %1035 }
 0xa44   :  { %v1038_v19 = vmul.f32 %v1036_v38, %v1030_v39 }
 0xa46   :  { %1040 = vrot.lane.b32.xlu0 %v1038_v19, %s3987_s22 }
 0xa54   :  { %v996_v51 = vpop.permute.xlu1 %995 }
 0xa55   :  { %v998_v34 = vmul.f32 %v996_v51, %v990_v37 }
 0xa57   :  { %1000 = vrot.lane.b32.xlu2 %v998_v34, %s3987_s22 }
 0xab1   :  { %v1001_v53 = vpop.permute.xlu2 %1000 }
 0xab2   :  { %v4337_v55 = vadd.f32 %v1001_v53, %v993_v52 }
 0xab4   :  { %3756 = vtanh.f32 %v4337_v55 }
 0xab8   :  { %v1041_v57 = vpop.permute.xlu0 %1040 }
 0xab9   :  { %v4341_v58 = vadd.f32 %v1041_v57, %v1033_v56 }
 0xaba   :  { %v3757_v61 = vpop.eup %3756 }
 0xabb   :  { %3758 = vtanh.f32 %v4341_v58  ;;  %1006 = vrot.lane.b32.xlu2 %v3757_v61, %s3986_s21 }
 0xac1   :  { %v3759_v62 = vpop.eup %3758 }
 0xac2   :  { %1046 = vrot.lane.b32.xlu0 %v3759_v62, %s3986_s21 }
 0xb15   :  { %v1007_v63 = vpop.permute.xlu2 %1006 }
 0xb16   :  { %v4346_v41 = vmul.f32 %v1007_v63, %v990_v37 }
 0xb18   :  { %v1062_v47 = vpack.c.bf16 %v4346_v41, %v4346_v41 }
 0xb1a   :  { %1068 = vrot.lane.b32.xlu0 %v1062_v47, %s3987_s22 }
 0xb34   :  { %v1047_v1 = vpop.permute.xlu0 %1046 }
 0xb35   :  { %v4357_v2 = vmul.f32 %v1047_v1, %v1030_v39 }
 0xb37   :  { %v1098_v3 = vpack.c.bf16 %v4357_v2, %v4357_v2 }
 0xb39   :  { %1104 = vrot.lane.b32.xlu1 %v1098_v3, %s3987_s22 }
 0xb8c   :  { %v1069_v6 = vpop.permute.xlu0 %1068 }
 0xb8d   :  { %3315 = vmatmul.msk.bf16.vlgmr.msra.gmra.mxu2 %vm148_vm0, %v1069_v6 }
 0xbab   :  { %v1105_v9 = vpop.permute.xlu1 %1104 }
 0xbac   :  { %3324 = vmatmul.msk.bf16.vlgmr.msra.gmra.mxu3 %vm148_vm0, %v1105_v9 }
 0xc10   :  { %v1094_v11 = vpop.f32.mrf.mxu2 }
 0xc11   :  { %v1136_v15 = vadd.f32 %v1094_v11, %v183_v10  ;;  %v3620_v10 = vld [vmem:[%s4969_s3 + $0x8] sm:$0xff]  ;;  %v3619_v11 = vld [vmem:[%s4969_s3] sm:$0xff] }
 0xc12   :  { %1255 = vmatpush.bf16.msra.mxu0 %v3620_v10 }
 0xc13   :  { %3760 = vtanh.f32 %v1136_v15  ;;  %v3325_v26 = vmul.f32 -1.442695, %v1136_v15 }
 0xc16   :  { %1256 = vmatpush.bf16.msra.mxu0 %v3619_v11 }
 0xc18   :  { %v1096_v13 = vpop.f32.mrf.mxu2 }
 0xc19   :  { %v3761_v27 = vpop.eup %3760 }
 0xc1a   :  { %1159 = vrot.lane.b32.xlu0 %v3761_v27, %s3986_s21 }
 0xc2f   :  { %v1130_v17 = vpop.f32.mrf.mxu3 }
 0xc30   :  { %v1176_v20 = vadd.f32 %v1130_v17, %v4154_v25 }
 0xc32   :  { %3762 = vtanh.f32 %v1176_v20  ;;  %v3326_v33 = vmul.f32 -1.442695, %v1176_v20 }
 0xc33   :  { %3764 = vpow2.f32 %v3325_v26 }
 0xc37   :  { %v1132_v22 = vpop.f32.mrf.mxu3 }
 0xc38   :  { %v3763_v24 = vpop.eup %3762 }
 0xc39   :  { %1199 = vrot.lane.b32.xlu1 %v3763_v24, %s3986_s21  ;;  %v3765_v29 = vpop.eup %3764 }
 0xc3a   :  { %v1140_v31 = vadd.f32 1.0, %v3765_v29  ;;  %v4414_v29 = vld [vmem:[%s4971_s5] ss:$0 sm:$0xff] }
 0xc3c   :  { %3766 = vrcp.f32 %v1140_v31  ;;  %v1152_v25 = vand.u32 2147483648, %v1140_v31  ;;  %vm1146_vm12 = vweird.f32 %v1140_v31  ;;  %v1150_v40 = vand.u32 2147483647, %v1140_v31 }
 0xc3d   :  { %3768 = vpow2.f32 %v3326_v33  ;;  %v3905_v33 = vld [vmem:[#allocation8] ss:$0 sm:$0xff] }
 0xc3e   :  { %v1153_v44 = vor.u32 1.1754944e-38, %v1152_v25  ;;  %vm1151_vm14 = vcmp.eq.f32.partialorder %v1150_v40, 8.507059e+37 }
 0xc42   :  { %v3767_v14 = vpop.eup %3766 }
 0xc43   :  { %v1142_v59 = vmul.f32 %v3767_v14, %v1140_v31  ;;  %v3769_v39 = vpop.eup %3768  ;;  %vm1147_vm11 = vweird.f32 %v3767_v14  ;;  %v186_v31 = vadd.f32 %v4414_v29, %v4325_v60 }
 0xc44   :  { %v1180_v23 = vadd.f32 1.0, %v3769_v39  ;;  %vm1148_vm13 = vmor %vm1146_vm12, %vm1147_vm11 }
 0xc45   :  { %v1143_v35 = vsub.f32 1.0, %v1142_v59 }
 0xc46   :  { %3770 = vrcp.f32 %v1180_v23  ;;  %v1192_v53 = vand.u32 2147483648, %v1180_v23  ;;  %vm1186_vm1 = vweird.f32 %v1180_v23  ;;  %v1190_v56 = vand.u32 2147483647, %v1180_v23 }
 0xc47   :  { %v1144_v38 = vmul.f32 %v3767_v14, %v1143_v35  ;;  %v230_v35 = vadd.f32 %v3905_v33, %v4150_v21 }
 0xc48   :  { %v1193_v61 = vor.u32 1.1754944e-38, %v1192_v53  ;;  %vm1191_vm3 = vcmp.eq.f32.partialorder %v1190_v56, 8.507059e+37 }
 0xc49   :  { %v1145_v19 = vadd.f32 %v3767_v14, %v1144_v38 }
 0xc4b   :  { %v1149_v42 = vsel %vm1148_vm13, %v3767_v14, %v1145_v19 }
 0xc4c   :  { %v1154_v48 = vsel %vm1151_vm14, %v1153_v44, %v1149_v42  ;;  %v3771_v50 = vpop.eup %3770 }
 0xc4d   :  { %v1182_v51 = vmul.f32 %v3771_v50, %v1180_v23  ;;  %vm1187_vm15 = vweird.f32 %v3771_v50  ;;  %v1157_v47 = vmul.f32 %v1154_v48, %v4337_v55  ;;  %v3622_v55 = vld [vmem:[%s4970_s4 + $0x8] sm:$0xff] }
 0xc4e   :  { %vm1188_vm2 = vmor %vm1186_vm1, %vm1187_vm15  ;;  %1291 = vmatpush.bf16.msra.mxu1 %v3622_v55 }
 0xc4f   :  { %v1183_v37 = vsub.f32 1.0, %v1182_v51 }
 0xc51   :  { %v1184_v34 = vmul.f32 %v3771_v50, %v1183_v37 }
 0xc53   :  { %v1185_v52 = vadd.f32 %v3771_v50, %v1184_v34 }
 0xc55   :  { %v1189_v57 = vsel %vm1188_vm2, %v3771_v50, %v1185_v52 }
 0xc56   :  { %v1194_v63 = vsel %vm1191_vm3, %v1193_v61, %v1189_v57 }
 0xc57   :  { %v1197_v3 = vmul.f32 %v1194_v63, %v4341_v58  ;;  %v3621_v58 = vld [vmem:[%s4970_s4] sm:$0xff] }
 0xc58   :  { %1292 = vmatpush.bf16.msra.mxu1 %v3621_v58 }
 0xc8c   :  { %v1160_v45 = vpop.permute.xlu0 %1159 }
 0xc8d   :  { %v1162_v49 = vmul.f32 %v1160_v45, %v1154_v48 }
 0xc8f   :  { %1164 = vrot.lane.b32.xlu1 %v1162_v49, %s3987_s22 }
 0xcab   :  { %v1200_v62 = vpop.permute.xlu1 %1199 }
 0xcac   :  { %v1202_v0 = vmul.f32 %v1200_v62, %v1194_v63 }
 0xcae   :  { %1204 = vrot.lane.b32.xlu2 %v1202_v0, %s3987_s22 }
 0xd01   :  { %v1165_v30 = vpop.permute.xlu1 %1164 }
 0xd02   :  { %v4378_v1 = vadd.f32 %v1165_v30, %v1157_v47 }
 0xd04   :  { %3772 = vtanh.f32 %v4378_v1 }
 0xd08   :  { %v1205_v4 = vpop.permute.xlu2 %1204 }
 0xd09   :  { %v4382_v5 = vadd.f32 %v1205_v4, %v1197_v3 }
 0xd0a   :  { %v3773_v6 = vpop.eup %3772 }
 0xd0b   :  { %3774 = vtanh.f32 %v4382_v5  ;;  %1170 = vrot.lane.b32.xlu1 %v3773_v6, %s3986_s21 }
 0xd11   :  { %v3775_v9 = vpop.eup %3774 }
 0xd12   :  { %1210 = vrot.lane.b32.xlu2 %v3775_v9, %s3986_s21 }
 0xd6c   :  { %v1211_v15 = vpop.permute.xlu2 %1210 }
 0xd6d   :  { %v4399_v13 = vmul.f32 %v1211_v15, %v1194_v63 }
 0xd6f   :  { %v1262_v27 = vpack.c.bf16 %v4399_v13, %v4399_v13 }
 0xd71   :  { %1268 = vrot.lane.b32.xlu0 %v1262_v27, %s3987_s22 }
 0xd7d   :  { %v1171_v17 = vpop.permute.xlu1 %1170 }
 0xd7e   :  { %v4404_v20 = vmul.f32 %v1171_v17, %v1154_v48 }
 0xd80   :  { %v1226_v22 = vpack.c.bf16 %v4404_v20, %v4404_v20 }
 0xd82   :  { %1232 = vrot.lane.b32.xlu2 %v1226_v22, %s3987_s22 }
 0xddc   :  { %v1233_v24 = vpop.permute.xlu2 %1232 }
 0xddd   :  { %3335 = vmatmul.msk.bf16.vlgmr.msra.gmra.mxu0 %vm148_vm0, %v1233_v24 }
 0xde3   :  { %v1269_v26 = vpop.permute.xlu0 %1268 }
 0xde4   :  { %3344 = vmatmul.msk.bf16.vlgmr.msra.gmra.mxu1 %vm148_vm0, %v1269_v26 }
 0xe5a   :  { %v1258_v14 = vpop.f32.mrf.mxu0 }
 0xe5b   :  { %v1300_v59 = vadd.f32 %v1258_v14, %v186_v31 }
 0xe5d   :  { %3776 = vtanh.f32 %v1300_v59  ;;  %v3345_v42 = vmul.f32 -1.442695, %v1300_v59 }
 0xe61   :  { %v1294_v38 = vpop.f32.mrf.mxu1 }
 0xe62   :  { %v1340_v39 = vadd.f32 %v1294_v38, %v230_v35  ;;  %v1260_v19 = vpop.f32.mrf.mxu0  ;;  %v3626_v35 = vld [vmem:[%s4970_s4 + $0x8] sm:$0xff] }
 0xe63   :  { %v3777_v25 = vpop.eup %3776  ;;  %v3624_v38 = vld [vmem:[%s4969_s3 + $0x8] sm:$0xff]  ;;  %1455 = vmatpush.bf16.msrb.mxu3 %v3626_v35  ;;  %v3623_v19 = vld [vmem:[%s4969_s3] sm:$0xff] }
 0xe64   :  { %3778 = vtanh.f32 %v1340_v39  ;;  %1323 = vrot.lane.b32.xlu2 %v3777_v25, %s3986_s21  ;;  %v3346_v21 = vmul.f32 -1.442695, %v1340_v39  ;;  %1419 = vmatpush.bf16.msrb.mxu2 %v3624_v38  ;;  %v3625_v39 = vld [vmem:[%s4970_s4] sm:$0xff]  ;;  %v3628_v38 = vld [vmem:[%s4973_s7 + $0x8] sm:$0xff] }
 0xe65   :  { %3780 = vpow2.f32 %v3345_v42  ;;  %1667 = vmatpush.bf16.msrb.mxu1 %v3628_v38 }
 0xe67   :  { %1456 = vmatpush.bf16.msrb.mxu3 %v3625_v39  ;;  %v3627_v39 = vld [vmem:[%s4973_s7] sm:$0xff] }
 0xe68   :  { %1420 = vmatpush.bf16.msrb.mxu2 %v3623_v19  ;;  %v3631_v19 = vld [vmem:[%s4975_s9] sm:$0xff] }
 0xe69   :  { %v1296_v40 = vpop.f32.mrf.mxu1  ;;  %1668 = vmatpush.bf16.msrb.mxu1 %v3627_v39 }
 0xe6a   :  { %v3779_v23 = vpop.eup %3778 }
 0xe6b   :  { %1363 = vrot.lane.b32.xlu0 %v3779_v23, %s3986_s21  ;;  %v3781_v60 = vpop.eup %3780 }
 0xe6c   :  { %v1304_v44 = vadd.f32 1.0, %v3781_v60 }
 0xe6e   :  { %3782 = vrcp.f32 %v1304_v44  ;;  %v1316_v34 = vand.u32 2147483648, %v1304_v44  ;;  %vm1310_vm5 = vweird.f32 %v1304_v44  ;;  %v1314_v52 = vand.u32 2147483647, %v1304_v44 }
 0xe6f   :  { %3784 = vpow2.f32 %v3346_v21 }
 0xe70   :  { %v1317_v57 = vor.u32 1.1754944e-38, %v1316_v34  ;;  %vm1315_vm7 = vcmp.eq.f32.partialorder %v1314_v52, 8.507059e+37 }
 0xe74   :  { %v3783_v45 = vpop.eup %3782 }
 0xe75   :  { %v1306_v48 = vmul.f32 %v3783_v45, %v1304_v44  ;;  %v3785_v51 = vpop.eup %3784  ;;  %vm1311_vm4 = vweird.f32 %v3783_v45  ;;  %v188_v44 = vadd.f32 %v4414_v29, %v4327_v32 }
 0xe76   :  { %v1344_v53 = vadd.f32 1.0, %v3785_v51  ;;  %vm1312_vm6 = vmor %vm1310_vm5, %vm1311_vm4  ;;  %vm1702_vm5 = vcmask 785408  }
 0xe77   :  { %v1307_v49 = vsub.f32 1.0, %v1306_v48 }
 0xe78   :  { %3786 = vrcp.f32 %v1344_v53  ;;  %v1356_v6 = vand.u32 2147483648, %v1344_v53  ;;  %vm1350_vm9 = vweird.f32 %v1344_v53  ;;  %v1354_v9 = vand.u32 2147483647, %v1344_v53 }
 0xe79   :  { %v1308_v50 = vmul.f32 %v3783_v45, %v1307_v49 }
 0xe7a   :  { %v1357_v10 = vor.u32 1.1754944e-38, %v1356_v6  ;;  %vm1355_vm11 = vcmp.eq.f32.partialorder %v1354_v9, 8.507059e+37 }
 0xe7b   :  { %v1309_v37 = vadd.f32 %v3783_v45, %v1308_v50 }
 0xe7d   :  { %v1313_v56 = vsel %vm1312_vm6, %v3783_v45, %v1309_v37 }
 0xe7e   :  { %v1318_v62 = vsel %vm1315_vm7, %v1317_v57, %v1313_v56  ;;  %v3787_v0 = vpop.eup %3786 }
 0xe7f   :  { %v1346_v47 = vmul.f32 %v3787_v0, %v1344_v53  ;;  %vm1351_vm8 = vweird.f32 %v3787_v0  ;;  %v1321_v27 = vmul.f32 %v1318_v62, %v4378_v1 }
 0xe80   :  { %vm1352_vm10 = vmor %vm1350_vm9, %vm1351_vm8 }
 0xe81   :  { %v1347_v30 = vsub.f32 1.0, %v1346_v47 }
 0xe83   :  { %v1348_v3 = vmul.f32 %v3787_v0, %v1347_v30 }
 0xe85   :  { %v1349_v4 = vadd.f32 %v3787_v0, %v1348_v3 }
 0xe87   :  { %v1353_v55 = vsel %vm1352_vm10, %v3787_v0, %v1349_v4 }
 0xe88   :  { %v1358_v11 = vsel %vm1355_vm11, %v1357_v10, %v1353_v55 }
 0xe89   :  { %v1361_v26 = vmul.f32 %v1358_v11, %v4382_v5 }
 0xebe   :  { %v1324_v61 = vpop.permute.xlu2 %1323 }
 0xebf   :  { %v1326_v63 = vmul.f32 %v1324_v61, %v1318_v62 }
 0xec1   :  { %1328 = vrot.lane.b32.xlu0 %v1326_v63, %s3987_s22 }
 0xedd   :  { %v1364_v58 = vpop.permute.xlu0 %1363 }
 0xede   :  { %v1366_v15 = vmul.f32 %v1364_v58, %v1358_v11 }
 0xee0   :  { %1368 = vrot.lane.b32.xlu1 %v1366_v15, %s3987_s22 }
 0xf33   :  { %v1329_v17 = vpop.permute.xlu0 %1328 }
 0xf34   :  { %v4424_v22 = vadd.f32 %v1329_v17, %v1321_v27 }
 0xf36   :  { %3788 = vtanh.f32 %v4424_v22 }
 0xf3c   :  { %v3789_v24 = vpop.eup %3788 }
 0xf3d   :  { %1334 = vrot.lane.b32.xlu0 %v3789_v24, %s3986_s21 }
 0xf52   :  { %v1369_v31 = vpop.permute.xlu1 %1368 }
 0xf53   :  { %v4429_v14 = vadd.f32 %v1369_v31, %v1361_v26 }
 0xf55   :  { %3790 = vtanh.f32 %v4429_v14 }
 0xf5b   :  { %v3791_v59 = vpop.eup %3790 }
 0xf5c   :  { %1374 = vrot.lane.b32.xlu1 %v3791_v59, %s3986_s21 }
 0xfaf   :  { %v1335_v33 = vpop.permute.xlu0 %1334 }
 0xfb0   :  { %v4433_v1 = vmul.f32 %v1335_v33, %v1318_v62 }
 0xfb2   :  { %v1390_v5 = vpack.c.bf16 %v4433_v1, %v4433_v1 }
 0xfb4   :  { %1396 = vrot.lane.b32.xlu1 %v1390_v5, %s3987_s22  ;;  %v3632_v5 = vld [vmem:[%s4975_s9 + $0x8] sm:$0xff] }
 0xfb5   :  { %1778 = vmatpush.bf16.msra.mxu3 %v3632_v5 }
 0xfb9   :  { %1779 = vmatpush.bf16.msra.mxu3 %v3631_v19 }
 0xfce   :  { %v1375_v25 = vpop.permute.xlu1 %1374 }
 0xfcf   :  { %v4450_v40 = vmul.f32 %v1375_v25, %v1358_v11 }
 0xfd1   :  { %v1426_v23 = vpack.c.bf16 %v4450_v40, %v4450_v40 }
 0xfd3   :  { %1432 = vrot.lane.b32.xlu2 %v1426_v23, %s3987_s22 }
0x1026   :  { %v1397_v42 = vpop.permute.xlu1 %1396 }
0x1027   :  { %3355 = vmatmul.msk.bf16.vlgmr.msrb.gmra.mxu2 %vm148_vm0, %v1397_v42 }
0x102d   :  { %v1433_v60 = vpop.permute.xlu2 %1432 }
0x102e   :  { %3364 = vmatmul.msk.bf16.vlgmr.msrb.gmra.mxu3 %vm148_vm0, %v1433_v60 }
0x10aa   :  { %v1422_v45 = vpop.f32.mrf.mxu2 }
0x10ab   :  { %v1464_v48 = vadd.f32 %v1422_v45, %v188_v44 }
0x10ad   :  { %3792 = vtanh.f32 %v1464_v48  ;;  %v3365_v53 = vmul.f32 -1.442695, %v1464_v48 }
0x10b1   :  { %v1458_v21 = vpop.f32.mrf.mxu3 }
0x10b2   :  { %v1503_v49 = vadd.f32 %v1458_v21, %v4147_v16  ;;  %v1424_v50 = vpop.f32.mrf.mxu2 }
0x10b3   :  { %v3793_v51 = vpop.eup %3792 }
0x10b4   :  { %3794 = vtanh.f32 %v1503_v49  ;;  %1487 = vrot.lane.b32.xlu1 %v3793_v51, %s3986_s21  ;;  %v3366_v52 = vmul.f32 -1.442695, %v1503_v49 }
0x10b6   :  { %3796 = vpow2.f32 %v3366_v52  ;;  %v3634_v52 = vld [vmem:[%s4976_s10 + $0x8] sm:$0xff] }
0x10b7   :  { %1737 = vmatpush.bf16.msra.mxu2 %v3634_v52 }
0x10b9   :  { %v1460_v37 = vpop.f32.mrf.mxu3 }
0x10ba   :  { %v3795_v34 = vpop.eup %3794 }
0x10bb   :  { %1526 = vrot.lane.b32.xlu2 %v3795_v34, %s3986_s21 }
0x10bc   :  { %396 = vrot.lane.b32.xlu1 %v4179_v18, %s3987_s22  ;;  %v3797_v32 = vpop.eup %3796 }
0x10bd   :  { %v1507_v29 = vadd.f32 1.0, %v3797_v32  ;;  %v3633_v32 = vld [vmem:[%s4976_s10] sm:$0xff] }
0x10be   :  { %1738 = vmatpush.bf16.msra.mxu2 %v3633_v32 }
0x10bf   :  { %3798 = vrcp.f32 %v1507_v29  ;;  %v1519_v47 = vand.u32 2147483648, %v1507_v29  ;;  %vm1513_vm13 = vweird.f32 %v1507_v29  ;;  %v1517_v30 = vand.u32 2147483647, %v1507_v29 }
0x10c0   :  { %3800 = vpow2.f32 %v3365_v53 }
0x10c1   :  { %v1520_v4 = vor.u32 1.1754944e-38, %v1519_v47  ;;  %vm1518_vm15 = vcmp.eq.f32.partialorder %v1517_v30, 8.507059e+37 }
0x10c5   :  { %v3799_v56 = vpop.eup %3798 }
0x10c6   :  { %v1509_v16 = vmul.f32 %v3799_v56, %v1507_v29  ;;  %v3801_v57 = vpop.eup %3800  ;;  %vm1514_vm12 = vweird.f32 %v3799_v56  ;;  %v3636_v29 = vld [vmem:[%s4977_s11 + $0x8] sm:$0xff] }
0x10c7   :  { %v1468_v62 = vadd.f32 1.0, %v3801_v57  ;;  %vm1515_vm14 = vmor %vm1513_vm13, %vm1514_vm12 }
0x10c8   :  { %v1510_v61 = vsub.f32 1.0, %v1509_v16 }
0x10c9   :  { %3802 = vrcp.f32 %v1468_v62  ;;  %v1480_v27 = vand.u32 2147483648, %v1468_v62  ;;  %vm1474_vm2 = vweird.f32 %v1468_v62  ;;  %v1478_v17 = vand.u32 2147483647, %v1468_v62 }
0x10ca   :  { %v1511_v63 = vmul.f32 %v3799_v56, %v1510_v61 }
0x10cb   :  { %v1481_v26 = vor.u32 1.1754944e-38, %v1480_v27  ;;  %vm1479_vm4 = vcmp.eq.f32.partialorder %v1478_v17, 8.507059e+37 }
0x10cc   :  { %v1512_v0 = vadd.f32 %v3799_v56, %v1511_v63 }
0x10ce   :  { %v1516_v18 = vsel %vm1515_vm14, %v3799_v56, %v1512_v0  ;;  %v3637_v56 = vld [vmem:[%s4978_s12] sm:$0xff] }
0x10cf   :  { %v3803_v3 = vpop.eup %3802  ;;  %v4464_v9 = vsel %vm1518_vm15, %v1520_v4, %v1516_v18 }
0x10d0   :  { %v1470_v10 = vmul.f32 %v3803_v3, %v1468_v62  ;;  %vm1475_vm1 = vweird.f32 %v3803_v3  ;;  %v1524_v42 = vmul.f32 %v4464_v9, %v4429_v14 }
0x10d1   :  { %vm1476_vm3 = vmor %vm1474_vm2, %vm1475_vm1 }
0x10d2   :  { %v1471_v58 = vsub.f32 1.0, %v1470_v10 }
0x10d4   :  { %v1472_v11 = vmul.f32 %v3803_v3, %v1471_v58 }
0x10d6   :  { %v1473_v15 = vadd.f32 %v3803_v3, %v1472_v11 }
0x10d8   :  { %v1477_v24 = vsel %vm1476_vm3, %v3803_v3, %v1473_v15 }
0x10d9   :  { %v1482_v59 = vsel %vm1479_vm4, %v1481_v26, %v1477_v24  ;;  %v3676_v24 = vld [vmem:[%s4982_s16] ss:$0 sm:$0xff] }
0x10da   :  { %v3677_v26 = vld [vmem:[%s4981_s15] ss:$0 sm:$0xff]  ;;  %s3988_s15 = smov 96  }
0x1115   :  { %v1527_v6 = vpop.permute.xlu2 %1526 }
0x1116   :  { %v1529_v55 = vmul.f32 %v1527_v6, %v4464_v9 }
0x1118   :  { %1531 = vrot.lane.b32.xlu0 %v1529_v55, %s3987_s22 }
0x1126   :  { %v1488_v31 = vpop.permute.xlu1 %1487 }
0x1127   :  { %v1490_v33 = vmul.f32 %v1488_v31, %v1482_v59 }
0x1129   :  { %1492 = vrot.lane.b32.xlu2 %v1490_v33, %s3987_s22 }
0x112e   :  { %v397_v35 = vpop.permute.xlu1 %396 }
0x112f   :  { %399 = vst.msk [vmem:[#allocation4] sm:$0xff] %vm148_vm0, %v397_v35 }
0x1131   :  { %559 = vrot.lane.b32.xlu2 %v4219_v8, %s3987_s22  ;;  %v1485_v8 = vmul.f32 %v1482_v59, %v4424_v22 }
0x1136   :  { %v1552_v49 = vld [vmem:[#allocation4] sm:$0xff] }
0x1183   :  { %v1493_v25 = vpop.permute.xlu2 %1492 }
0x1184   :  { %v1495_v23 = vadd.f32 %v1493_v25, %v1485_v8  ;;  %v4581_v8 = vld [vmem:[#allocation10] ss:$0 sm:$0xff] }
0x1186   :  { %3804 = vtanh.f32 %v1495_v23 }
0x118a   :  { %v1532_v60 = vpop.permute.xlu0 %1531 }
0x118b   :  { %v1534_v44 = vadd.f32 %v1532_v60, %v1524_v42  ;;  %v560_v45 = vpop.permute.xlu2 %559 }
0x118c   :  { %v3805_v48 = vpop.eup %3804  ;;  %563 = vst.msk [vmem:[#allocation4 + $0x8] sm:$0xff] %vm148_vm0, %v560_v45 }
0x118d   :  { %3806 = vtanh.f32 %v1534_v44  ;;  %1498 = vrot.lane.b32.xlu2 %v3805_v48, %s3986_s21  ;;  %v4585_v44 = vld [vmem:[#allocation12] ss:$0 sm:$0xff] }
0x1193   :  { %v3807_v21 = vpop.eup %3806  ;;  %v1553_v22 = vld [vmem:[#allocation4 + $0x8] sm:$0xff] }
0x1194   :  { %1537 = vrot.lane.b32.xlu0 %v3807_v21, %s3986_s21  ;;  %v1560_v50 = vpack.c.bf16 %v1553_v22, %v1552_v49 }
0x1195   :  { %1057 = vrot.lane.b32.xlu2 %v4357_v2, %s3987_s22 }
0x1196   :  { %3387 = vmatmul.msk.bf16.vlgmr.msrb.gmra.mxu1 %vm148_vm0, %v1560_v50  ;;  %3411 = vmatmul.msk.bf16.vlgmr.msra.gmra.mxu3 %vm148_vm0, %v1560_v50 }
0x119c   :  { %1385 = vrot.lane.b32.xlu0 %v4450_v40, %s3987_s22 }
0x119d   :  { %893 = vrot.lane.b32.xlu2 %v4316_v54, %s3987_s22 }
0x11a4   :  { %723 = vrot.lane.b32.xlu0 %v4276_v46, %s3987_s22 }
0x11a5   :  { %401 = vrot.lane.b32.xlu2 %v4196_v28, %s3987_s22 }
0x11ac   :  { %1221 = vrot.lane.b32.xlu0 %v4399_v13, %s3987_s22 }
0x11b4   :  { %1051 = vrot.lane.b32.xlu0 %v4346_v41, %s3987_s22 }
0x11bc   :  { %565 = vrot.lane.b32.xlu0 %v4230_v36, %s3987_s22 }
0x11c4   :  { %1906 = vrot.lane.b32.xlu0 %v3677_v26, %s3986_s21 }
0x11e7   :  { %v1499_v2 = vpop.permute.xlu2 %1498 }
0x11e8   :  { %v1501_v14 = vmul.f32 %v1499_v2, %v1482_v59 }
0x11ea   :  { %1542 = vrot.lane.b32.xlu2 %v1501_v14, %s3987_s22 }
0x11ef   :  { %v1058_v54 = vpop.permute.xlu2 %1057 }
0x11f0   :  { %1061 = vst.msk [vmem:[#allocation5 + $0x18] sm:$0xff] %vm148_vm0, %v1058_v54 }
0x11f7   :  { %v894_v46 = vpop.permute.xlu2 %893  ;;  %v1567_v4 = vld [vmem:[#allocation5 + $0x18] sm:$0xff] }
0x11f8   :  { %897 = vst.msk [vmem:[#allocation5 + $0x20] sm:$0xff] %vm148_vm0, %v894_v46 }
0x11ff   :  { %v402_v28 = vpop.permute.xlu2 %401  ;;  %v1568_v27 = vld [vmem:[#allocation5 + $0x20] sm:$0xff] }
0x1200   :  { %405 = vst.msk [vmem:[#allocation5 + $0x38] sm:$0xff] %vm148_vm0, %v402_v28 }
0x1206   :  { %v1538_v13 = vpop.permute.xlu0 %1537 }
0x1207   :  { %v1540_v40 = vmul.f32 %v1538_v13, %v4464_v9  ;;  %v3635_v9 = vld [vmem:[%s4977_s11] sm:$0xff]  ;;  %v1571_v38 = vld [vmem:[#allocation5 + $0x38] sm:$0xff] }
0x1209   :  { %1548 = vrot.lane.b32.xlu1 %v1540_v40, %s3987_s22 }
0x120e   :  { %v1386_v41 = vpop.permute.xlu0 %1385 }
0x120f   :  { %1389 = vst.msk [vmem:[#allocation5 + $0x8] sm:$0xff] %vm148_vm0, %v1386_v41 }
0x1211   :  { %887 = vrot.lane.b32.xlu1 %v4299_v12, %s3987_s22 }
0x1213   :  { %v1670_v39 = vpop.f32.mrf.mxu1 }
0x1216   :  { %v724_v36 = vpop.permute.xlu0 %723  ;;  %v1565_v61 = vld [vmem:[#allocation5 + $0x8] sm:$0xff] }
0x1217   :  { %727 = vst.msk [vmem:[#allocation4 + $0x10] sm:$0xff] %vm148_vm0, %v724_v36 }
0x1219   :  { %729 = vrot.lane.b32.xlu1 %v4271_v43, %s3987_s22  ;;  %v3638_v43 = vld [vmem:[%s4978_s12 + $0x8] sm:$0xff]  ;;  %v1781_v19 = vpop.f32.mrf.mxu3 }
0x121a   :  { %1878 = vmatpush.bf16.msra.mxu1 %v3638_v43 }
0x121b   :  { %v1672_v25 = vpop.f32.mrf.mxu1 }
0x121e   :  { %v1222_v51 = vpop.permute.xlu0 %1221  ;;  %1879 = vmatpush.bf16.msra.mxu1 %v3637_v56  ;;  %v1554_v0 = vld [vmem:[#allocation4 + $0x10] sm:$0xff] }
0x121f   :  { %1225 = vst.msk [vmem:[#allocation5 + $0x10] sm:$0xff] %vm148_vm0, %v1222_v51 }
0x1221   :  { %1215 = vrot.lane.b32.xlu1 %v4404_v20, %s3987_s22  ;;  %v3630_v20 = vld [vmem:[%s4974_s8 + $0x8] sm:$0xff]  ;;  %v1783_v45 = vpop.f32.mrf.mxu3 }
0x1222   :  { %1614 = vmatpush.bf16.msrb.mxu0 %v3630_v20 }
0x1226   :  { %v1052_v37 = vpop.permute.xlu0 %1051  ;;  %v1566_v18 = vld [vmem:[#allocation5 + $0x10] sm:$0xff] }
0x1227   :  { %1055 = vst.msk [vmem:[#allocation4 + $0x20] sm:$0xff] %vm148_vm0, %v1052_v37  ;;  %v1573_v6 = vpack.c.bf16 %v1567_v4, %v1566_v18 }
0x1229   :  { %1379 = vrot.lane.b32.xlu1 %v4433_v1, %s3987_s22  ;;  %v3629_v1 = vld [vmem:[%s4974_s8] sm:$0xff] }
0x122a   :  { %1615 = vmatpush.bf16.msrb.mxu0 %v3629_v1 }
0x122e   :  { %v566_v34 = vpop.permute.xlu0 %565  ;;  %1849 = vmatpush.bf16.msra.mxu0 %v3636_v29  ;;  %v1556_v10 = vld [vmem:[#allocation4 + $0x20] sm:$0xff] }
0x122f   :  { %569 = vst.msk [vmem:[#allocation5 + $0x30] sm:$0xff] %vm148_vm0, %v566_v34 }
0x1231   :  { %1951 = vrot.lane.b32.xlu1 %v3676_v24, %s3986_s21 }
0x1232   :  { %1850 = vmatpush.bf16.msra.mxu0 %v3635_v9 }
0x1236   :  { %v1570_v35 = vld [vmem:[#allocation5 + $0x30] sm:$0xff] }
0x1237   :  { %v1575_v5 = vpack.c.bf16 %v1571_v38, %v1570_v35 }
0x1244   :  { %v1543_v12 = vpop.permute.xlu2 %1542 }
0x1245   :  { %1546 = vst.msk [vmem:[#allocation4 + $0x38] sm:$0xff] %vm148_vm0, %v1543_v12 }
0x124c   :  { %v1559_v59 = vld [vmem:[#allocation4 + $0x38] sm:$0xff] }
0x127b   :  { %v1549_v53 = vpop.permute.xlu1 %1548 }
0x127c   :  { %1551 = vst.msk [vmem:[#allocation5] sm:$0xff] %vm148_vm0, %v1549_v53 }
0x1283   :  { %v888_v16 = vpop.permute.xlu1 %887  ;;  %v1564_v57 = vld [vmem:[#allocation5] sm:$0xff] }
0x1284   :  { %891 = vst.msk [vmem:[#allocation4 + $0x18] sm:$0xff] %vm148_vm0, %v888_v16  ;;  %v1572_v62 = vpack.c.bf16 %v1565_v61, %v1564_v57 }
0x1286   :  { %3375 = vmatmul.msk.bf16.vlgmr.msrb.gmra.mxu0 %vm148_vm0, %v1572_v62  ;;  %3399 = vmatmul.msk.bf16.vlgmr.msra.gmra.mxu2 %vm148_vm0, %v1572_v62 }
0x128b   :  { %v730_v63 = vpop.permute.xlu1 %729  ;;  %v1555_v47 = vld [vmem:[#allocation4 + $0x18] sm:$0xff] }
0x128c   :  { %733 = vst.msk [vmem:[#allocation5 + $0x28] sm:$0xff] %vm148_vm0, %v730_v63  ;;  %v1561_v30 = vpack.c.bf16 %v1555_v47, %v1554_v0 }
0x128e   :  { %3388 = vmatmul.msk.bf16.gmra.mxu1 %vm148_vm0, %v1561_v30  ;;  %3412 = vmatmul.msk.bf16.gmra.mxu3 %vm148_vm0, %v1561_v30 }
0x1293   :  { %v1216_v3 = vpop.permute.xlu1 %1215  ;;  %v1569_v15 = vld [vmem:[#allocation5 + $0x28] sm:$0xff] }
0x1294   :  { %1219 = vst.msk [vmem:[#allocation4 + $0x28] sm:$0xff] %vm148_vm0, %v1216_v3  ;;  %v1574_v17 = vpack.c.bf16 %v1569_v15, %v1568_v27 }
0x1296   :  { %3376 = vmatmul.msk.bf16.gmra.mxu0 %vm148_vm0, %v1573_v6  ;;  %3400 = vmatmul.msk.bf16.gmra.mxu2 %vm148_vm0, %v1573_v6 }
0x129b   :  { %v1380_v55 = vpop.permute.xlu1 %1379  ;;  %v1557_v58 = vld [vmem:[#allocation4 + $0x28] sm:$0xff] }
0x129c   :  { %1383 = vst.msk [vmem:[#allocation4 + $0x30] sm:$0xff] %vm148_vm0, %v1380_v55  ;;  %v1562_v11 = vpack.c.bf16 %v1557_v58, %v1556_v10 }
0x129e   :  { %3389 = vmatmul.msk.bf16.gmra.mxu1 %vm148_vm0, %v1562_v11  ;;  %3413 = vmatmul.msk.bf16.gmra.mxu3 %vm148_vm0, %v1562_v11 }
0x12a3   :  { %v1558_v31 = vld [vmem:[#allocation4 + $0x30] sm:$0xff]  ;;  %v4611_v26 = vpop.permute.xlu1 %1951 }
0x12a4   :  { %v1563_v33 = vpack.c.bf16 %v1559_v59, %v1558_v31 }
0x12a6   :  { %3377 = vmatmul.msk.bf16.gmra.mxu0 %vm148_vm0, %v1574_v17  ;;  %3401 = vmatmul.msk.bf16.gmra.mxu2 %vm148_vm0, %v1574_v17 }
0x12ae   :  { %3390 = vmatmul.msk.bf16.gmra.mxu1 %vm148_vm0, %v1563_v33  ;;  %3414 = vmatmul.msk.bf16.gmra.mxu3 %vm148_vm0, %v1563_v33 }
0x12b6   :  { %3378 = vmatmul.msk.bf16.gmra.mxu0 %vm148_vm0, %v1575_v5  ;;  %3402 = vmatmul.msk.bf16.gmra.mxu2 %vm148_vm0, %v1575_v5 }
0x12be   :  { %1880 = vmatmul.bf16.vlgmr.msra.gmra.mxu1 %v3985_v7 }
0x12c6   :  { %1851 = vmatmul.bf16.vlgmr.msra.gmra.mxu0 %v3985_v7 }
0x1303   :  { %v1617_v23 = vpop.f32.mrf.mxu0 }
0x1304   :  { %v1671_v42 = vadd.f32 %v1670_v39, %v1617_v23 }
0x1306   :  { %v1694_v60 = vadd.f32 %v4581_v8, %v1671_v42 }
0x1308   :  { %1703 = vst.msk [vmem:[#allocation6] sm:$0xff] %vm1702_vm5, %v1694_v60 }
0x1309   :  { %v1740_v48 = vpop.f32.mrf.mxu2 }
0x130a   :  { %v1782_v21 = vadd.f32 %v1781_v19, %v1740_v48  ;;  %v4619_v19 = vpop.permute.xlu0 %1906 }
0x130b   :  { %v1619_v49 = vpop.f32.mrf.mxu0  ;;  %v1675_v22 = vpop.f32.mrf.mxu1 }
0x130c   :  { %v1805_v7 = vadd.f32 %v4585_v44, %v1782_v21  ;;  %v1673_v50 = vadd.f32 %v1672_v25, %v1619_v49 }
0x130e   :  { %1813 = vst.msk [vmem:[#allocation7] sm:$0xff] %vm1702_vm5, %v1805_v7  ;;  %v1695_v2 = vadd.f32 %v4581_v8, %v1673_v50 }
0x130f   :  { %v1885_v49 = vld [vmem:[#allocation6] sm:$0xff] }
0x1310   :  { %1704 = vst.msk [vmem:[#allocation6 + $0x8] sm:$0xff] %vm1702_vm5, %v1695_v2 }
0x1311   :  { %v1742_v14 = vpop.f32.mrf.mxu2  ;;  %v1786_v54 = vpop.f32.mrf.mxu3 }
0x1312   :  { %v1784_v46 = vadd.f32 %v1783_v45, %v1742_v14 }
0x1313   :  { %v1622_v28 = vpop.f32.mrf.mxu0  ;;  %v1677_v13 = vpop.f32.mrf.mxu1 }
0x1314   :  { %v1806_v40 = vadd.f32 %v4585_v44, %v1784_v46  ;;  %v1676_v41 = vadd.f32 %v1675_v22, %v1622_v28 }
0x1316   :  { %1814 = vst.msk [vmem:[#allocation7 + $0x8] sm:$0xff] %vm1702_vm5, %v1806_v40  ;;  %v1696_v36 = vadd.f32 %v4581_v8, %v1676_v41 }
0x1318   :  { %1705 = vst.msk [vmem:[#allocation6 + $0x10] sm:$0xff] %vm1702_vm5, %v1696_v36 }
0x1319   :  { %v1745_v51 = vpop.f32.mrf.mxu2  ;;  %v1788_v37 = vpop.f32.mrf.mxu3 }
0x131a   :  { %v1787_v34 = vadd.f32 %v1786_v54, %v1745_v51 }
0x131b   :  { %v1624_v12 = vpop.f32.mrf.mxu0  ;;  %v1680_v43 = vpop.f32.mrf.mxu1 }
0x131c   :  { %v1807_v20 = vadd.f32 %v4585_v44, %v1787_v34  ;;  %v1678_v52 = vadd.f32 %v1677_v13, %v1624_v12 }
0x131e   :  { %1815 = vst.msk [vmem:[#allocation7 + $0x10] sm:$0xff] %vm1702_vm5, %v1807_v20  ;;  %v1697_v1 = vadd.f32 %v4581_v8, %v1678_v52 }
0x1320   :  { %1706 = vst.msk [vmem:[#allocation6 + $0x18] sm:$0xff] %vm1702_vm5, %v1697_v1 }
0x1321   :  { %v1747_v32 = vpop.f32.mrf.mxu2  ;;  %v1791_v53 = vpop.f32.mrf.mxu3 }
0x1322   :  { %v1789_v29 = vadd.f32 %v1788_v37, %v1747_v32 }
0x1323   :  { %v1627_v56 = vpop.f32.mrf.mxu0  ;;  %v1682_v16 = vpop.f32.mrf.mxu1 }
0x1324   :  { %v1808_v57 = vadd.f32 %v4585_v44, %v1789_v29  ;;  %v1681_v61 = vadd.f32 %v1680_v43, %v1627_v56 }
0x1326   :  { %1816 = vst.msk [vmem:[#allocation7 + $0x18] sm:$0xff] %vm1702_vm5, %v1808_v57  ;;  %v1698_v62 = vadd.f32 %v4581_v8, %v1681_v61 }
0x1328   :  { %1707 = vst.msk [vmem:[#allocation6 + $0x20] sm:$0xff] %vm1702_vm5, %v1698_v62 }
0x1329   :  { %v1750_v63 = vpop.f32.mrf.mxu2  ;;  %v1793_v4 = vpop.f32.mrf.mxu3 }
0x132a   :  { %v1792_v0 = vadd.f32 %v1791_v53, %v1750_v63 }
0x132b   :  { %v1629_v47 = vpop.f32.mrf.mxu0  ;;  %v1685_v30 = vpop.f32.mrf.mxu1 }
0x132c   :  { %v1809_v18 = vadd.f32 %v4585_v44, %v1792_v0  ;;  %v1683_v3 = vadd.f32 %v1682_v16, %v1629_v47 }
0x132e   :  { %1817 = vst.msk [vmem:[#allocation7 + $0x20] sm:$0xff] %vm1702_vm5, %v1809_v18  ;;  %v1699_v6 = vadd.f32 %v4581_v8, %v1683_v3 }
0x1330   :  { %1708 = vst.msk [vmem:[#allocation6 + $0x28] sm:$0xff] %vm1702_vm5, %v1699_v6 }
0x1331   :  { %v1752_v9 = vpop.f32.mrf.mxu2  ;;  %v1796_v17 = vpop.f32.mrf.mxu3 }
0x1332   :  { %v1794_v55 = vadd.f32 %v1793_v4, %v1752_v9 }
0x1333   :  { %v1632_v10 = vpop.f32.mrf.mxu0  ;;  %v1687_v58 = vpop.f32.mrf.mxu1 }
0x1334   :  { %v1810_v11 = vadd.f32 %v4585_v44, %v1794_v55  ;;  %v1686_v15 = vadd.f32 %v1685_v30, %v1632_v10  ;;  %v3640_v10 = vld [vmem:[%s4977_s11 + $0x8] sm:$0xff] }
0x1335   :  { %2014 = vmatpush.bf16.msrb.mxu2 %v3640_v10 }
0x1336   :  { %1818 = vst.msk [vmem:[#allocation7 + $0x28] sm:$0xff] %vm1702_vm5, %v1810_v11  ;;  %v1700_v27 = vadd.f32 %v4581_v8, %v1686_v15  ;;  %v3639_v11 = vld [vmem:[%s4977_s11] sm:$0xff] }
0x1337   :  { %v3641_v15 = vld [vmem:[%s4978_s12] sm:$0xff] }
0x1338   :  { %1709 = vst.msk [vmem:[#allocation6 + $0x30] sm:$0xff] %vm1702_vm5, %v1700_v27 }
0x1339   :  { %v1755_v24 = vpop.f32.mrf.mxu2  ;;  %v1798_v25 = vpop.f32.mrf.mxu3  ;;  %2015 = vmatpush.bf16.msrb.mxu2 %v3639_v11  ;;  %v3646_v11 = vld [vmem:[%s4978_s12 + $0x8] sm:$0xff] }
0x133a   :  { %v1797_v31 = vadd.f32 %v1796_v17, %v1755_v24  ;;  %2218 = vmatpush.bf16.msrb.mxu1 %v3646_v11 }
0x133b   :  { %v1634_v59 = vpop.f32.mrf.mxu0  ;;  %v1881_v33 = vpop.f32.mrf.mxu1 }
0x133c   :  { %v1811_v35 = vadd.f32 %v4585_v44, %v1797_v31  ;;  %v1688_v38 = vadd.f32 %v1687_v58, %v1634_v59  ;;  %v1954_v5 = vadd.f32 %v4611_v26, %v1881_v33  ;;  %v3642_v58 = vld [vmem:[%s4978_s12 + $0x8] sm:$0xff] }
0x133d   :  { %2050 = vmatpush.bf16.msrb.mxu3 %v3642_v58 }
0x133e   :  { %1819 = vst.msk [vmem:[#allocation7 + $0x30] sm:$0xff] %vm1702_vm5, %v1811_v35  ;;  %v1701_v39 = vadd.f32 %v4581_v8, %v1688_v38  ;;  %1956 = vrot.lane.b32.xlu0 %v1954_v5, %s3986_s21 }
0x1340   :  { %1710 = vst.msk [vmem:[#allocation6 + $0x38] sm:$0xff] %vm1702_vm5, %v1701_v39 }
0x1341   :  { %v1757_v23 = vpop.f32.mrf.mxu2  ;;  %2051 = vmatpush.bf16.msrb.mxu3 %v3641_v15  ;;  %v3645_v15 = vld [vmem:[%s4978_s12] sm:$0xff] }
0x1342   :  { %v1799_v42 = vadd.f32 %v1798_v25, %v1757_v23  ;;  %2219 = vmatpush.bf16.msrb.mxu1 %v3645_v15 }
0x1343   :  { %v1852_v60 = vpop.f32.mrf.mxu0  ;;  %v1883_v45 = vpop.f32.mrf.mxu1 }
0x1344   :  { %v1812_v48 = vadd.f32 %v4585_v44, %v1799_v42  ;;  %v1909_v21 = vadd.f32 %v4619_v19, %v1852_v60  ;;  %v1886_v22 = vadd.f32 %v1885_v49, %v1852_v60 }
0x1346   :  { %1820 = vst.msk [vmem:[#allocation7 + $0x38] sm:$0xff] %vm1702_vm5, %v1812_v48  ;;  %1911 = vrot.lane.b32.xlu2 %v1909_v21, %s3986_s21  ;;  %v3431_v7 = vmul.f32 -1.442695, %v1886_v22 }
0x1348   :  { %3808 = vpow2.f32 %v3431_v7  ;;  %v2100_v7 = vld [vmem:[#allocation7 + $0x30] sm:$0xff] }
0x134b   :  { %v1854_v8 = vpop.f32.mrf.mxu0 }
0x134d   :  { %v1930_v50 = vld [vmem:[#allocation7 + $0x38] sm:$0xff] }
0x134e   :  { %v3809_v2 = vpop.eup %3808  ;;  %v1931_v14 = vadd.f32 %v1930_v50, %v1881_v33 }
0x134f   :  { %v1890_v54 = vadd.f32 1.0, %v3809_v2 }
0x1350   :  { %v3432_v46 = vmul.f32 -1.442695, %v1931_v14  ;;  %v2058_v14 = vld [vmem:[#allocation6 + $0x8] sm:$0xff] }
0x1351   :  { %3810 = vrcp.f32 %v1890_v54  ;;  %v1902_v34 = vand.u32 2147483648, %v1890_v54  ;;  %vm1896_vm7 = vweird.f32 %v1890_v54  ;;  %v1900_v12 = vand.u32 2147483647, %v1890_v54 }
0x1352   :  { %3812 = vpow2.f32 %v3432_v46 }
0x1353   :  { %v1903_v52 = vor.u32 1.1754944e-38, %v1902_v34  ;;  %vm1901_vm9 = vcmp.eq.f32.partialorder %v1900_v12, 8.507059e+37 }
0x1357   :  { %v3811_v28 = vpop.eup %3810 }
0x1358   :  { %v3813_v44 = vpop.eup %3812  ;;  %v1892_v13 = vmul.f32 %v3811_v28, %v1890_v54  ;;  %vm1897_vm6 = vweird.f32 %v3811_v28 }
0x1359   :  { %v1935_v40 = vadd.f32 1.0, %v3813_v44  ;;  %vm1898_vm8 = vmor %vm1896_vm7, %vm1897_vm6 }
0x135a   :  { %v1893_v41 = vsub.f32 1.0, %v1892_v13 }
0x135b   :  { %3814 = vrcp.f32 %v1935_v40  ;;  %v1947_v57 = vand.u32 2147483648, %v1935_v40  ;;  %vm1941_vm11 = vweird.f32 %v1935_v40  ;;  %v1945_v61 = vand.u32 2147483647, %v1935_v40 }
0x135c   :  { %v1894_v36 = vmul.f32 %v3811_v28, %v1893_v41 }
0x135d   :  { %v1948_v63 = vor.u32 1.1754944e-38, %v1947_v57  ;;  %vm1946_vm13 = vcmp.eq.f32.partialorder %v1945_v61, 8.507059e+37 }
0x135e   :  { %v1895_v51 = vadd.f32 %v3811_v28, %v1894_v36 }
0x1360   :  { %v1899_v43 = vsel %vm1898_vm8, %v3811_v28, %v1895_v51 }
0x1361   :  { %v3815_v37 = vpop.eup %3814  ;;  %v1904_v1 = vsel %vm1901_vm9, %v1903_v52, %v1899_v43 }
0x1362   :  { %v1937_v20 = vmul.f32 %v3815_v37, %v1935_v40  ;;  %vm1942_vm10 = vweird.f32 %v3815_v37  ;;  %v1921_v35 = vsub.f32 1.0, %v1904_v1  ;;  %v1927_v5 = vmul.f32 0.0, %v1904_v1 }
0x1363   :  { %vm1943_vm12 = vmor %vm1941_vm11, %vm1942_vm10 }
0x1364   :  { %v1938_v53 = vsub.f32 1.0, %v1937_v20 }
0x1366   :  { %v1939_v56 = vmul.f32 %v3815_v37, %v1938_v53 }
0x1368   :  { %v1940_v16 = vadd.f32 %v3815_v37, %v1939_v56 }
0x136a   :  { %v1944_v62 = vsel %vm1943_vm12, %v3815_v37, %v1940_v16 }
0x136b   :  { %v1949_v47 = vsel %vm1946_vm13, %v1948_v63, %v1944_v62 }
0x136c   :  { %v1966_v27 = vsub.f32 1.0, %v1949_v47  ;;  %v1972_v24 = vmul.f32 0.0, %v1949_v47 }
0x13a0   :  { %v1912_v32 = vpop.permute.xlu2 %1911 }
0x13a1   :  { %v1914_v29 = vmul.f32 %v1912_v32, %v1904_v1 }
0x13a3   :  { %1916 = vrot.lane.b32.xlu1 %v1914_v29, %s3986_s21 }
0x13b0   :  { %v1957_v0 = vpop.permute.xlu0 %1956 }
0x13b1   :  { %v1959_v30 = vmul.f32 %v1957_v0, %v1949_v47 }
0x13b3   :  { %1961 = vrot.lane.b32.xlu2 %v1959_v30, %s3986_s21 }
0x140d   :  { %v1962_v18 = vpop.permute.xlu2 %1961 }
0x140e   :  { %v1964_v3 = vadd.f32 %v1962_v18, %v1930_v50 }
0x1410   :  { %3816 = vtanh.f32 %v1964_v3 }
0x1415   :  { %v1917_v4 = vpop.permute.xlu1 %1916 }
0x1416   :  { %v3817_v6 = vpop.eup %3816  ;;  %v1919_v9 = vadd.f32 %v1917_v4, %v1885_v49 }
0x1417   :  { %1968 = vrot.lane.b32.xlu1 %v3817_v6, %s3988_s15 }
0x1418   :  { %3818 = vtanh.f32 %v1919_v9 }
0x141e   :  { %v3819_v55 = vpop.eup %3818 }
0x141f   :  { %1923 = vrot.lane.b32.xlu0 %v3819_v55, %s3988_s15 }
0x1489   :  { %v1969_v17 = vpop.permute.xlu1 %1968 }
0x148a   :  { %v1971_v31 = vmul.f32 %v1969_v17, %v1966_v27 }
0x148c   :  { %v4641_v59 = vadd.f32 %v1972_v24, %v1971_v31 }
0x148e   :  { %v2021_v33 = vpack.c.bf16 %v4641_v59, %v4641_v59 }
0x1490   :  { %2027 = vrot.lane.b32.xlu0 %v2021_v33, %s3988_s15 }
0x1491   :  { %v1924_v38 = vpop.permute.xlu0 %1923 }
0x1492   :  { %v1926_v39 = vmul.f32 %v1924_v38, %v1921_v35 }
0x1494   :  { %v4646_v25 = vadd.f32 %v1927_v5, %v1926_v39 }
0x1496   :  { %v1985_v23 = vpack.c.bf16 %v4646_v25, %v4646_v25 }
0x1498   :  { %1991 = vrot.lane.b32.xlu2 %v1985_v23, %s3988_s15 }
0x14f2   :  { %v1992_v42 = vpop.permute.xlu2 %1991 }
0x14f3   :  { %3442 = vmatmul.msk.bf16.vlgmr.msrb.gmra.mxu2 %vm148_vm0, %v1992_v42 }
0x1502   :  { %v2028_v60 = vpop.permute.xlu0 %2027 }
0x1503   :  { %3451 = vmatmul.msk.bf16.vlgmr.msrb.gmra.mxu3 %vm148_vm0, %v2028_v60 }
0x1576   :  { %v2017_v45 = vpop.f32.mrf.mxu2 }
0x1577   :  { %v2079_v48 = vadd.f32 %v2017_v45, %v4619_v19  ;;  %v2059_v54 = vadd.f32 %v2058_v14, %v2017_v45  ;;  %v3644_v45 = vld [vmem:[%s4977_s11 + $0x8] sm:$0xff] }
0x1578   :  { %2182 = vmatpush.bf16.msrb.mxu0 %v3644_v45 }
0x1579   :  { %2081 = vrot.lane.b32.xlu1 %v2079_v48, %s3986_s21  ;;  %v3452_v46 = vmul.f32 -1.442695, %v2059_v54  ;;  %v3643_v48 = vld [vmem:[%s4977_s11] sm:$0xff]  ;;  %v2268_v54 = vld [vmem:[#allocation7 + $0x28] sm:$0xff] }
0x157c   :  { %2183 = vmatpush.bf16.msrb.mxu0 %v3643_v48 }
0x157e   :  { %v2019_v21 = vpop.f32.mrf.mxu2 }
0x1586   :  { %v2053_v8 = vpop.f32.mrf.mxu3 }
0x1587   :  { %v2121_v49 = vadd.f32 %v2053_v8, %v4611_v26  ;;  %v2101_v50 = vadd.f32 %v2100_v7, %v2053_v8 }
0x1589   :  { %2123 = vrot.lane.b32.xlu2 %v2121_v49, %s3986_s21  ;;  %v3453_v2 = vmul.f32 -1.442695, %v2101_v50 }
0x158b   :  { %3820 = vpow2.f32 %v3453_v2 }
0x158c   :  { %3822 = vpow2.f32 %v3452_v46 }
0x158e   :  { %v2055_v22 = vpop.f32.mrf.mxu3 }
0x1591   :  { %v3821_v28 = vpop.eup %3820 }
0x1592   :  { %v2105_v44 = vadd.f32 1.0, %v3821_v28  ;;  %v3823_v13 = vpop.eup %3822 }
0x1593   :  { %v2063_v40 = vadd.f32 1.0, %v3823_v13 }
0x1594   :  { %3824 = vrcp.f32 %v2105_v44  ;;  %v2117_v52 = vand.u32 2147483648, %v2105_v44  ;;  %vm2111_vm15 = vweird.f32 %v2105_v44  ;;  %v2115_v1 = vand.u32 2147483647, %v2105_v44 }
0x1595   :  { %3826 = vrcp.f32 %v2063_v40  ;;  %v2075_v62 = vand.u32 2147483648, %v2063_v40  ;;  %vm2069_vm4 = vweird.f32 %v2063_v40  ;;  %v2073_v63 = vand.u32 2147483647, %v2063_v40 }
0x1596   :  { %v2118_v53 = vor.u32 1.1754944e-38, %v2117_v52  ;;  %vm2116_vm2 = vcmp.eq.f32.partialorder %v2115_v1, 8.507059e+37 }
0x1597   :  { %v2076_v47 = vor.u32 1.1754944e-38, %v2075_v62  ;;  %vm2074_vm6 = vcmp.eq.f32.partialorder %v2073_v63, 8.507059e+37 }
0x159a   :  { %v3825_v41 = vpop.eup %3824 }
0x159b   :  { %v2107_v36 = vmul.f32 %v3825_v41, %v2105_v44  ;;  %v3827_v37 = vpop.eup %3826  ;;  %vm2112_vm14 = vweird.f32 %v3825_v41  ;;  %v2226_v44 = vld [vmem:[#allocation6 + $0x10] sm:$0xff] }
0x159c   :  { %v2065_v12 = vmul.f32 %v3827_v37, %v2063_v40  ;;  %vm2113_vm1 = vmor %vm2111_vm15, %vm2112_vm14  ;;  %vm2070_vm3 = vweird.f32 %v3827_v37 }
0x159d   :  { %v2108_v51 = vsub.f32 1.0, %v2107_v36  ;;  %vm2071_vm5 = vmor %vm2069_vm4, %vm2070_vm3 }
0x159e   :  { %v2066_v20 = vsub.f32 1.0, %v2065_v12 }
0x159f   :  { %v2109_v34 = vmul.f32 %v3825_v41, %v2108_v51 }
0x15a0   :  { %v2067_v29 = vmul.f32 %v3827_v37, %v2066_v20 }
0x15a1   :  { %v2110_v43 = vadd.f32 %v3825_v41, %v2109_v34 }
0x15a2   :  { %v2068_v61 = vadd.f32 %v3827_v37, %v2067_v29 }
0x15a3   :  { %v2114_v32 = vsel %vm2113_vm1, %v3825_v41, %v2110_v43 }
0x15a4   :  { %v2119_v56 = vsel %vm2116_vm2, %v2118_v53, %v2114_v32  ;;  %v2072_v0 = vsel %vm2071_vm5, %v3827_v37, %v2068_v61 }
0x15a5   :  { %v2077_v18 = vsel %vm2074_vm6, %v2076_v47, %v2072_v0  ;;  %v2133_v38 = vsub.f32 1.0, %v2119_v56  ;;  %v2139_v39 = vmul.f32 %v2119_v56, %v4641_v59 }
0x15a6   :  { %v2091_v27 = vsub.f32 1.0, %v2077_v18  ;;  %v2097_v24 = vmul.f32 %v2077_v18, %v4646_v25 }
0x15e3   :  { %v2124_v16 = vpop.permute.xlu2 %2123 }
0x15e4   :  { %v2126_v57 = vmul.f32 %v2124_v16, %v2119_v56 }
0x15e6   :  { %2128 = vrot.lane.b32.xlu1 %v2126_v57, %s3986_s21 }
0x15eb   :  { %v2082_v30 = vpop.permute.xlu1 %2081 }
0x15ec   :  { %v2084_v3 = vmul.f32 %v2082_v30, %v2077_v18 }
0x15ee   :  { %2086 = vrot.lane.b32.xlu0 %v2084_v3, %s3986_s21 }
0x1658   :  { %v2129_v4 = vpop.permute.xlu1 %2128 }
0x1659   :  { %v2131_v6 = vadd.f32 %v2129_v4, %v2100_v7 }
0x165b   :  { %3828 = vtanh.f32 %v2131_v6 }
0x1660   :  { %v2087_v9 = vpop.permute.xlu0 %2086 }
0x1661   :  { %v3829_v55 = vpop.eup %3828  ;;  %v2089_v10 = vadd.f32 %v2087_v9, %v2058_v14 }
0x1662   :  { %2135 = vrot.lane.b32.xlu0 %v3829_v55, %s3988_s15 }
0x1663   :  { %3830 = vtanh.f32 %v2089_v10 }
0x1669   :  { %v3831_v58 = vpop.eup %3830 }
0x166a   :  { %2093 = vrot.lane.b32.xlu2 %v3831_v58, %s3988_s15 }
0x16c4   :  { %v2094_v17 = vpop.permute.xlu2 %2093 }
0x16c5   :  { %v2096_v31 = vmul.f32 %v2094_v17, %v2091_v27 }
0x16c7   :  { %v4668_v33 = vadd.f32 %v2097_v24, %v2096_v31  ;;  %v3650_v24 = vld [vmem:[%s4978_s12 + $0x8] sm:$0xff]  ;;  %v3649_v31 = vld [vmem:[%s4978_s12] sm:$0xff] }
0x16c8   :  { %2386 = vmatpush.bf16.msra.mxu3 %v3650_v24 }
0x16c9   :  { %v2153_v35 = vpack.c.bf16 %v4668_v33, %v4668_v33 }
0x16cb   :  { %2159 = vrot.lane.b32.xlu1 %v2153_v35, %s3988_s15 }
0x16cc   :  { %2387 = vmatpush.bf16.msra.mxu3 %v3649_v31 }
0x16d4   :  { %v2136_v5 = vpop.permute.xlu0 %2135 }
0x16d5   :  { %v2138_v23 = vmul.f32 %v2136_v5, %v2133_v38 }
0x16d7   :  { %v4674_v42 = vadd.f32 %v2139_v39, %v2138_v23 }
0x16d9   :  { %v2189_v60 = vpack.c.bf16 %v4674_v42, %v4674_v42 }
0x16db   :  { %2195 = vrot.lane.b32.xlu2 %v2189_v60, %s3988_s15 }
0x1735   :  { %v2196_v21 = vpop.permute.xlu2 %2195 }
0x1736   :  { %3473 = vmatmul.msk.bf16.vlgmr.msrb.gmra.mxu1 %vm148_vm0, %v2196_v21 }
0x173d   :  { %v2160_v8 = vpop.permute.xlu1 %2159 }
0x173e   :  { %3464 = vmatmul.msk.bf16.vlgmr.msrb.gmra.mxu0 %vm148_vm0, %v2160_v8 }
0x17b3   :  { %v2221_v49 = vpop.f32.mrf.mxu1 }
0x17b4   :  { %v2289_v22 = vadd.f32 %v2221_v49, %v4611_v26  ;;  %v2269_v46 = vadd.f32 %v2268_v54, %v2221_v49 }
0x17b6   :  { %2291 = vrot.lane.b32.xlu1 %v2289_v22, %s3986_s21  ;;  %v3475_v28 = vmul.f32 -1.442695, %v2269_v46 }
0x17b8   :  { %3832 = vpow2.f32 %v3475_v28 }
0x17bb   :  { %v2185_v7 = vpop.f32.mrf.mxu0  ;;  %v2223_v50 = vpop.f32.mrf.mxu1 }
0x17bc   :  { %v2247_v2 = vadd.f32 %v2185_v7, %v4619_v19  ;;  %v2227_v13 = vadd.f32 %v2226_v44, %v2185_v7  ;;  %v3648_v7 = vld [vmem:[%s4977_s11 + $0x8] sm:$0xff]  ;;  %v3647_v50 = vld [vmem:[%s4977_s11] sm:$0xff] }
0x17bd   :  { %2350 = vmatpush.bf16.msra.mxu2 %v3648_v7 }
0x17be   :  { %2249 = vrot.lane.b32.xlu0 %v2247_v2, %s3986_s21  ;;  %v3474_v40 = vmul.f32 -1.442695, %v2227_v13  ;;  %v3833_v41 = vpop.eup %3832 }
0x17bf   :  { %v2273_v36 = vadd.f32 1.0, %v3833_v41  ;;  %v2394_v41 = vld [vmem:[#allocation6 + $0x18] sm:$0xff] }
0x17c0   :  { %3834 = vpow2.f32 %v3474_v40 }
0x17c1   :  { %3836 = vrcp.f32 %v2273_v36  ;;  %v2285_v53 = vand.u32 2147483648, %v2273_v36  ;;  %vm2279_vm8 = vweird.f32 %v2273_v36  ;;  %v2283_v56 = vand.u32 2147483647, %v2273_v36  ;;  %2351 = vmatpush.bf16.msra.mxu2 %v3647_v50 }
0x17c3   :  { %v2187_v14 = vpop.f32.mrf.mxu0  ;;  %v2286_v61 = vor.u32 1.1754944e-38, %v2285_v53  ;;  %vm2284_vm10 = vcmp.eq.f32.partialorder %v2283_v56, 8.507059e+37 }
0x17c6   :  { %v3835_v51 = vpop.eup %3834 }
0x17c7   :  { %v2231_v37 = vadd.f32 1.0, %v3835_v51  ;;  %v3837_v34 = vpop.eup %3836 }
0x17c8   :  { %v2275_v12 = vmul.f32 %v3837_v34, %v2273_v36  ;;  %vm2280_vm7 = vweird.f32 %v3837_v34 }
0x17c9   :  { %3838 = vrcp.f32 %v2231_v37  ;;  %vm2281_vm9 = vmor %vm2279_vm8, %vm2280_vm7  ;;  %v2243_v30 = vand.u32 2147483648, %v2231_v37  ;;  %vm2237_vm12 = vweird.f32 %v2231_v37  ;;  %v2241_v18 = vand.u32 2147483647, %v2231_v37 }
0x17ca   :  { %v2276_v43 = vsub.f32 1.0, %v2275_v12 }
0x17cb   :  { %v2244_v4 = vor.u32 1.1754944e-38, %v2243_v30  ;;  %vm2242_vm14 = vcmp.eq.f32.partialorder %v2241_v18, 8.507059e+37 }
0x17cc   :  { %v2277_v52 = vmul.f32 %v3837_v34, %v2276_v43 }
0x17ce   :  { %v2278_v32 = vadd.f32 %v3837_v34, %v2277_v52 }
0x17cf   :  { %v3839_v20 = vpop.eup %3838 }
0x17d0   :  { %v2233_v1 = vmul.f32 %v3839_v20, %v2231_v37  ;;  %v2282_v16 = vsel %vm2281_vm9, %v3837_v34, %v2278_v32  ;;  %vm2238_vm11 = vweird.f32 %v3839_v20  ;;  %v2436_v34 = vld [vmem:[#allocation7 + $0x20] sm:$0xff] }
0x17d1   :  { %v2287_v63 = vsel %vm2284_vm10, %v2286_v61, %v2282_v16  ;;  %vm2239_vm13 = vmor %vm2237_vm12, %vm2238_vm11 }
0x17d2   :  { %v2234_v29 = vsub.f32 1.0, %v2233_v1  ;;  %v2301_v35 = vsub.f32 1.0, %v2287_v63  ;;  %v2307_v5 = vmul.f32 %v2287_v63, %v4674_v42 }
0x17d4   :  { %v2235_v57 = vmul.f32 %v3839_v20, %v2234_v29 }
0x17d6   :  { %v2236_v47 = vadd.f32 %v3839_v20, %v2235_v57 }
0x17d8   :  { %v2240_v3 = vsel %vm2239_vm13, %v3839_v20, %v2236_v47 }
0x17d9   :  { %v2245_v9 = vsel %vm2242_vm14, %v2244_v4, %v2240_v3 }
0x17da   :  { %v2259_v45 = vsub.f32 1.0, %v2245_v9  ;;  %v2265_v21 = vmul.f32 %v2245_v9, %v4668_v33 }
0x1828   :  { %v2292_v62 = vpop.permute.xlu1 %2291 }
0x1829   :  { %v2294_v0 = vmul.f32 %v2292_v62, %v2287_v63 }
0x182b   :  { %2296 = vrot.lane.b32.xlu0 %v2294_v0, %s3986_s21 }
0x1830   :  { %v2250_v6 = vpop.permute.xlu0 %2249 }
0x1831   :  { %v2252_v55 = vmul.f32 %v2250_v6, %v2245_v9 }
0x1833   :  { %2254 = vrot.lane.b32.xlu2 %v2252_v55, %s3986_s21 }
0x188d   :  { %v2255_v10 = vpop.permute.xlu2 %2254 }
0x188e   :  { %v2257_v58 = vadd.f32 %v2255_v10, %v2226_v44 }
0x1890   :  { %3840 = vtanh.f32 %v2257_v58 }
0x1896   :  { %v3841_v11 = vpop.eup %3840 }
0x1897   :  { %2261 = vrot.lane.b32.xlu1 %v3841_v11, %s3988_s15 }
0x189d   :  { %v2297_v15 = vpop.permute.xlu0 %2296 }
0x189e   :  { %v2299_v27 = vadd.f32 %v2297_v15, %v2268_v54 }
0x18a0   :  { %3842 = vtanh.f32 %v2299_v27 }
0x18a6   :  { %v3843_v17 = vpop.eup %3842 }
0x18a7   :  { %2303 = vrot.lane.b32.xlu2 %v3843_v17, %s3988_s15 }
0x1901   :  { %v2304_v38 = vpop.permute.xlu2 %2303 }
0x1902   :  { %v2306_v39 = vmul.f32 %v2304_v38, %v2301_v35 }
0x1904   :  { %v4702_v23 = vadd.f32 %v2307_v5, %v2306_v39 }
0x1906   :  { %v2357_v60 = vpack.c.bf16 %v4702_v23, %v4702_v23 }
0x1908   :  { %2363 = vrot.lane.b32.xlu1 %v2357_v60, %s3988_s15  ;;  %v3652_v60 = vld [vmem:[%s4977_s11 + $0x8] sm:$0xff] }
0x1909   :  { %v2262_v48 = vpop.permute.xlu1 %2261  ;;  %2518 = vmatpush.bf16.msra.mxu0 %v3652_v60 }
0x190a   :  { %v2264_v8 = vmul.f32 %v2262_v48, %v2259_v45  ;;  %v3651_v45 = vld [vmem:[%s4977_s11] sm:$0xff] }
0x190c   :  { %v4708_v49 = vadd.f32 %v2265_v21, %v2264_v8 }
0x190d   :  { %2519 = vmatpush.bf16.msra.mxu0 %v3651_v45 }
0x190e   :  { %v2321_v22 = vpack.c.bf16 %v4708_v49, %v4708_v49 }
0x1910   :  { %2327 = vrot.lane.b32.xlu0 %v2321_v22, %s3988_s15 }
0x197a   :  { %v2364_v2 = vpop.permute.xlu1 %2363 }
0x197b   :  { %3495 = vmatmul.msk.bf16.vlgmr.msra.gmra.mxu3 %vm148_vm0, %v2364_v2 }
0x1982   :  { %v2328_v14 = vpop.permute.xlu0 %2327 }
0x1983   :  { %3486 = vmatmul.msk.bf16.vlgmr.msra.gmra.mxu2 %vm148_vm0, %v2328_v14 }
0x19fe   :  { %v2389_v54 = vpop.f32.mrf.mxu3 }
0x19ff   :  { %v2457_v46 = vadd.f32 %v2389_v54, %v4611_v26  ;;  %v2437_v12 = vadd.f32 %v2436_v34, %v2389_v54 }
0x1a01   :  { %2459 = vrot.lane.b32.xlu0 %v2457_v46, %s3986_s21  ;;  %v3497_v20 = vmul.f32 -1.442695, %v2437_v12 }
0x1a06   :  { %v2353_v28 = vpop.f32.mrf.mxu2  ;;  %v2391_v44 = vpop.f32.mrf.mxu3 }
0x1a07   :  { %v2415_v13 = vadd.f32 %v2353_v28, %v4619_v19  ;;  %v2395_v36 = vadd.f32 %v2394_v41, %v2353_v28 }
0x1a09   :  { %2417 = vrot.lane.b32.xlu2 %v2415_v13, %s3986_s21  ;;  %v3496_v51 = vmul.f32 -1.442695, %v2395_v36  ;;  %v3654_v13 = vld [vmem:[%s4978_s12 + $0x8] sm:$0xff] }
0x1a0a   :  { %2554 = vmatpush.bf16.msra.mxu1 %v3654_v13 }
0x1a0b   :  { %3844 = vpow2.f32 %v3496_v51 }
0x1a0e   :  { %v2355_v40 = vpop.f32.mrf.mxu2 }
0x1a0f   :  { %v3653_v40 = vld [vmem:[%s4978_s12] sm:$0xff] }
0x1a10   :  { %2555 = vmatpush.bf16.msra.mxu1 %v3653_v40 }
0x1a11   :  { %v3845_v37 = vpop.eup %3844 }
0x1a12   :  { %v2399_v43 = vadd.f32 1.0, %v3845_v37 }
0x1a14   :  { %3846 = vrcp.f32 %v2399_v43  ;;  %v2411_v61 = vand.u32 2147483648, %v2399_v43  ;;  %vm2405_vm1 = vweird.f32 %v2399_v43  ;;  %v2409_v62 = vand.u32 2147483647, %v2399_v43 }
0x1a15   :  { %3848 = vpow2.f32 %v3497_v20 }
0x1a16   :  { %v2412_v47 = vor.u32 1.1754944e-38, %v2411_v61  ;;  %vm2410_vm3 = vcmp.eq.f32.partialorder %v2409_v62, 8.507059e+37 }
0x1a1a   :  { %v3847_v52 = vpop.eup %3846 }
0x1a1b   :  { %v3849_v1 = vpop.eup %3848  ;;  %v2401_v32 = vmul.f32 %v3847_v52, %v2399_v43  ;;  %vm2406_vm15 = vweird.f32 %v3847_v52 }
0x1a1c   :  { %v2441_v29 = vadd.f32 1.0, %v3849_v1  ;;  %vm2407_vm2 = vmor %vm2405_vm1, %vm2406_vm15 }
0x1a1d   :  { %v2402_v53 = vsub.f32 1.0, %v2401_v32 }
0x1a1e   :  { %3850 = vrcp.f32 %v2441_v29  ;;  %v2453_v55 = vand.u32 2147483648, %v2441_v29  ;;  %vm2447_vm5 = vweird.f32 %v2441_v29  ;;  %v2451_v10 = vand.u32 2147483647, %v2441_v29 }
0x1a1f   :  { %v2403_v56 = vmul.f32 %v3847_v52, %v2402_v53 }
0x1a20   :  { %v2454_v11 = vor.u32 1.1754944e-38, %v2453_v55  ;;  %vm2452_vm7 = vcmp.eq.f32.partialorder %v2451_v10, 8.507059e+37 }
0x1a21   :  { %v2404_v16 = vadd.f32 %v3847_v52, %v2403_v56 }
0x1a23   :  { %v2408_v63 = vsel %vm2407_vm2, %v3847_v52, %v2404_v16  ;;  %v2604_v52 = vld [vmem:[#allocation7 + $0x18] sm:$0xff] }
0x1a24   :  { %v3851_v57 = vpop.eup %3850  ;;  %v2413_v30 = vsel %vm2410_vm3, %v2412_v47, %v2408_v63 }
0x1a25   :  { %v2443_v0 = vmul.f32 %v3851_v57, %v2441_v29  ;;  %vm2448_vm4 = vweird.f32 %v3851_v57  ;;  %v2427_v2 = vsub.f32 1.0, %v2413_v30  ;;  %v2433_v54 = vmul.f32 %v2413_v30, %v4708_v49  ;;  %v2562_v29 = vld [vmem:[#allocation6 + $0x20] sm:$0xff] }
0x1a26   :  { %vm2449_vm6 = vmor %vm2447_vm5, %vm2448_vm4 }
0x1a27   :  { %v2444_v4 = vsub.f32 1.0, %v2443_v0 }
0x1a29   :  { %v2445_v6 = vmul.f32 %v3851_v57, %v2444_v4 }
0x1a2b   :  { %v2446_v9 = vadd.f32 %v3851_v57, %v2445_v6 }
0x1a2d   :  { %v2450_v58 = vsel %vm2449_vm6, %v3851_v57, %v2446_v9 }
0x1a2e   :  { %v2455_v27 = vsel %vm2452_vm7, %v2454_v11, %v2450_v58 }
0x1a2f   :  { %v2469_v48 = vsub.f32 1.0, %v2455_v27  ;;  %v2475_v8 = vmul.f32 %v2455_v27, %v4702_v23 }
0x1a63   :  { %v2418_v18 = vpop.permute.xlu2 %2417 }
0x1a64   :  { %v2420_v3 = vmul.f32 %v2418_v18, %v2413_v30 }
0x1a66   :  { %2422 = vrot.lane.b32.xlu1 %v2420_v3, %s3986_s21 }
0x1a73   :  { %v2460_v15 = vpop.permute.xlu0 %2459 }
0x1a74   :  { %v2462_v17 = vmul.f32 %v2460_v15, %v2455_v27 }
0x1a76   :  { %2464 = vrot.lane.b32.xlu2 %v2462_v17, %s3986_s21 }
0x1ad0   :  { %v2465_v24 = vpop.permute.xlu2 %2464 }
0x1ad1   :  { %v2467_v31 = vadd.f32 %v2465_v24, %v2436_v34 }
0x1ad3   :  { %3852 = vtanh.f32 %v2467_v31 }
0x1ad8   :  { %v2423_v35 = vpop.permute.xlu1 %2422 }
0x1ad9   :  { %v3853_v38 = vpop.eup %3852  ;;  %v2425_v5 = vadd.f32 %v2423_v35, %v2394_v41 }
0x1ada   :  { %2471 = vrot.lane.b32.xlu1 %v3853_v38, %s3988_s15 }
0x1adb   :  { %3854 = vtanh.f32 %v2425_v5 }
0x1ae1   :  { %v3855_v39 = vpop.eup %3854 }
0x1ae2   :  { %2429 = vrot.lane.b32.xlu0 %v3855_v39, %s3988_s15 }
0x1b4c   :  { %v2472_v21 = vpop.permute.xlu1 %2471 }
0x1b4d   :  { %v2474_v22 = vmul.f32 %v2472_v21, %v2469_v48 }
0x1b4f   :  { %v4736_v7 = vadd.f32 %v2475_v8, %v2474_v22 }
0x1b51   :  { %v2525_v50 = vpack.c.bf16 %v4736_v7, %v4736_v7 }
0x1b53   :  { %2531 = vrot.lane.b32.xlu0 %v2525_v50, %s3988_s15 }
0x1b54   :  { %v2430_v14 = vpop.permute.xlu0 %2429 }
0x1b55   :  { %v2432_v46 = vmul.f32 %v2430_v14, %v2427_v2  ;;  %v3658_v14 = vld [vmem:[%s4978_s12 + $0x8] sm:$0xff] }
0x1b56   :  { %2722 = vmatpush.bf16.msrb.mxu3 %v3658_v14 }
0x1b57   :  { %v4742_v28 = vadd.f32 %v2433_v54, %v2432_v46  ;;  %v3657_v54 = vld [vmem:[%s4978_s12] sm:$0xff] }
0x1b59   :  { %v2489_v44 = vpack.c.bf16 %v4742_v28, %v4742_v28 }
0x1b5a   :  { %2723 = vmatpush.bf16.msrb.mxu3 %v3657_v54 }
0x1b5b   :  { %2495 = vrot.lane.b32.xlu2 %v2489_v44, %s3988_s15 }
0x1bb5   :  { %v2496_v41 = vpop.permute.xlu2 %2495 }
0x1bb6   :  { %3508 = vmatmul.msk.bf16.vlgmr.msra.gmra.mxu0 %vm148_vm0, %v2496_v41 }
0x1bc5   :  { %v2532_v36 = vpop.permute.xlu0 %2531 }
0x1bc6   :  { %3517 = vmatmul.msk.bf16.vlgmr.msra.gmra.mxu1 %vm148_vm0, %v2532_v36 }
0x1c33   :  { %v2521_v51 = vpop.f32.mrf.mxu0 }
0x1c34   :  { %v2583_v37 = vadd.f32 %v2521_v51, %v4619_v19  ;;  %v2563_v53 = vadd.f32 %v2562_v29, %v2521_v51 }
0x1c36   :  { %2585 = vrot.lane.b32.xlu1 %v2583_v37, %s3986_s21  ;;  %v3518_v56 = vmul.f32 -1.442695, %v2563_v53 }
0x1c3b   :  { %v2523_v34 = vpop.f32.mrf.mxu0 }
0x1c43   :  { %v2557_v12 = vpop.f32.mrf.mxu1 }
0x1c44   :  { %v2625_v43 = vadd.f32 %v2557_v12, %v4611_v26  ;;  %v2605_v1 = vadd.f32 %v2604_v52, %v2557_v12 }
0x1c46   :  { %2627 = vrot.lane.b32.xlu2 %v2625_v43, %s3986_s21  ;;  %v3519_v32 = vmul.f32 -1.442695, %v2605_v1  ;;  %v3655_v1 = vld [vmem:[%s4977_s11] sm:$0xff] }
0x1c48   :  { %3856 = vpow2.f32 %v3519_v32 }
0x1c49   :  { %3858 = vpow2.f32 %v3518_v56 }
0x1c4b   :  { %v2559_v20 = vpop.f32.mrf.mxu1 }
0x1c4e   :  { %v3857_v16 = vpop.eup %3856 }
0x1c4f   :  { %v2609_v57 = vadd.f32 1.0, %v3857_v16  ;;  %v3859_v61 = vpop.eup %3858 }
0x1c50   :  { %v2567_v62 = vadd.f32 1.0, %v3859_v61 }
0x1c51   :  { %3860 = vrcp.f32 %v2609_v57  ;;  %v2621_v9 = vand.u32 2147483648, %v2609_v57  ;;  %vm2615_vm9 = vweird.f32 %v2609_v57  ;;  %v2619_v55 = vand.u32 2147483647, %v2609_v57 }
0x1c52   :  { %3862 = vrcp.f32 %v2567_v62  ;;  %v2579_v31 = vand.u32 2147483648, %v2567_v62  ;;  %vm2573_vm13 = vweird.f32 %v2567_v62  ;;  %v2577_v35 = vand.u32 2147483647, %v2567_v62 }
0x1c53   :  { %v2622_v11 = vor.u32 1.1754944e-38, %v2621_v9  ;;  %vm2620_vm11 = vcmp.eq.f32.partialorder %v2619_v55, 8.507059e+37 }
0x1c54   :  { %v2580_v5 = vor.u32 1.1754944e-38, %v2579_v31  ;;  %vm2578_vm15 = vcmp.eq.f32.partialorder %v2577_v35, 8.507059e+37 }
0x1c57   :  { %v3861_v63 = vpop.eup %3860 }
0x1c58   :  { %v2611_v0 = vmul.f32 %v3861_v63, %v2609_v57  ;;  %v3863_v30 = vpop.eup %3862  ;;  %vm2616_vm8 = vweird.f32 %v3861_v63 }
0x1c59   :  { %v2569_v3 = vmul.f32 %v3863_v30, %v2567_v62  ;;  %vm2617_vm10 = vmor %vm2615_vm9, %vm2616_vm8  ;;  %vm2574_vm12 = vweird.f32 %v3863_v30 }
0x1c5a   :  { %v2612_v47 = vsub.f32 1.0, %v2611_v0  ;;  %vm2575_vm14 = vmor %vm2573_vm13, %vm2574_vm12 }
0x1c5b   :  { %v2570_v6 = vsub.f32 1.0, %v2569_v3 }
0x1c5c   :  { %v2613_v18 = vmul.f32 %v3861_v63, %v2612_v47 }
0x1c5d   :  { %v2571_v58 = vmul.f32 %v3863_v30, %v2570_v6 }
0x1c5e   :  { %v2614_v4 = vadd.f32 %v3861_v63, %v2613_v18 }
0x1c5f   :  { %v2572_v24 = vadd.f32 %v3863_v30, %v2571_v58 }
0x1c60   :  { %v2618_v10 = vsel %vm2617_vm10, %v3861_v63, %v2614_v4  ;;  %v2772_v63 = vld [vmem:[#allocation7 + $0x10] sm:$0xff] }
0x1c61   :  { %v2623_v15 = vsel %vm2620_vm11, %v2622_v11, %v2618_v10  ;;  %v2576_v38 = vsel %vm2575_vm14, %v3863_v30, %v2572_v24  ;;  %v2730_v30 = vld [vmem:[#allocation6 + $0x28] sm:$0xff] }
0x1c62   :  { %v2581_v60 = vsel %vm2578_vm15, %v2580_v5, %v2576_v38  ;;  %v2637_v51 = vsub.f32 1.0, %v2623_v15  ;;  %v2643_v34 = vmul.f32 %v2623_v15, %v4736_v7 }
0x1c63   :  { %v2595_v46 = vsub.f32 1.0, %v2581_v60  ;;  %v2601_v13 = vmul.f32 %v2581_v60, %v4742_v28 }
0x1ca0   :  { %v2628_v27 = vpop.permute.xlu2 %2627 }
0x1ca1   :  { %v2630_v17 = vmul.f32 %v2628_v27, %v2623_v15 }
0x1ca3   :  { %2632 = vrot.lane.b32.xlu1 %v2630_v17, %s3986_s21 }
0x1ca8   :  { %v2586_v39 = vpop.permute.xlu1 %2585 }
0x1ca9   :  { %v2588_v45 = vmul.f32 %v2586_v39, %v2581_v60 }
0x1cab   :  { %2590 = vrot.lane.b32.xlu0 %v2588_v45, %s3986_s21 }
0x1d15   :  { %v2633_v48 = vpop.permute.xlu1 %2632 }
0x1d16   :  { %v2635_v21 = vadd.f32 %v2633_v48, %v2604_v52  ;;  %v3656_v52 = vld [vmem:[%s4977_s11 + $0x8] sm:$0xff] }
0x1d17   :  { %2686 = vmatpush.bf16.msrb.mxu2 %v3656_v52 }
0x1d18   :  { %3864 = vtanh.f32 %v2635_v21 }
0x1d1b   :  { %2687 = vmatpush.bf16.msrb.mxu2 %v3655_v1 }
0x1d1d   :  { %v2591_v8 = vpop.permute.xlu0 %2590 }
0x1d1e   :  { %v3865_v22 = vpop.eup %3864  ;;  %v2593_v50 = vadd.f32 %v2591_v8, %v2562_v29 }
0x1d1f   :  { %2639 = vrot.lane.b32.xlu0 %v3865_v22, %s3988_s15 }
0x1d20   :  { %3866 = vtanh.f32 %v2593_v50 }
0x1d26   :  { %v3867_v2 = vpop.eup %3866 }
0x1d27   :  { %2597 = vrot.lane.b32.xlu2 %v3867_v2, %s3988_s15 }
0x1d81   :  { %v2598_v44 = vpop.permute.xlu2 %2597 }
0x1d82   :  { %v2600_v40 = vmul.f32 %v2598_v44, %v2595_v46 }
0x1d84   :  { %v4770_v41 = vadd.f32 %v2601_v13, %v2600_v40 }
0x1d86   :  { %v2657_v36 = vpack.c.bf16 %v4770_v41, %v4770_v41 }
0x1d88   :  { %2663 = vrot.lane.b32.xlu1 %v2657_v36, %s3988_s15 }
0x1d91   :  { %v2640_v37 = vpop.permute.xlu0 %2639 }
0x1d92   :  { %v2642_v12 = vmul.f32 %v2640_v37, %v2637_v51 }
0x1d94   :  { %v4776_v43 = vadd.f32 %v2643_v34, %v2642_v12  ;;  %v3662_v12 = vld [vmem:[%s4978_s12 + $0x8] sm:$0xff] }
0x1d95   :  { %2890 = vmatpush.bf16.msrb.mxu1 %v3662_v12 }
0x1d96   :  { %v2693_v20 = vpack.c.bf16 %v4776_v43, %v4776_v43 }
0x1d98   :  { %2699 = vrot.lane.b32.xlu2 %v2693_v20, %s3988_s15  ;;  %v3661_v20 = vld [vmem:[%s4978_s12] sm:$0xff] }
0x1d99   :  { %2891 = vmatpush.bf16.msrb.mxu1 %v3661_v20 }
0x1df2   :  { %v2700_v32 = vpop.permute.xlu2 %2699 }
0x1df3   :  { %3539 = vmatmul.msk.bf16.vlgmr.msrb.gmra.mxu3 %vm148_vm0, %v2700_v32 }
0x1dfa   :  { %v2664_v29 = vpop.permute.xlu1 %2663 }
0x1dfb   :  { %3530 = vmatmul.msk.bf16.vlgmr.msrb.gmra.mxu2 %vm148_vm0, %v2664_v29 }
0x1e76   :  { %v2725_v53 = vpop.f32.mrf.mxu3 }
0x1e77   :  { %v2793_v56 = vadd.f32 %v2725_v53, %v4611_v26  ;;  %v2773_v0 = vadd.f32 %v2772_v63, %v2725_v53 }
0x1e79   :  { %2795 = vrot.lane.b32.xlu1 %v2793_v56, %s3986_s21  ;;  %v3541_v47 = vmul.f32 -1.442695, %v2773_v0 }
0x1e7b   :  { %3868 = vpow2.f32 %v3541_v47  ;;  %v3660_v47 = vld [vmem:[%s4977_s11 + $0x8] sm:$0xff] }
0x1e7c   :  { %2854 = vmatpush.bf16.msrb.mxu0 %v3660_v47  ;;  %v3664_v47 = vld [vmem:[%s4977_s11 + $0x8] sm:$0xff] }
0x1e7d   :  { %3022 = vmatpush.bf16.msra.mxu2 %v3664_v47 }
0x1e7e   :  { %v2689_v16 = vpop.f32.mrf.mxu2  ;;  %v2727_v57 = vpop.f32.mrf.mxu3 }
0x1e7f   :  { %v2751_v61 = vadd.f32 %v2689_v16, %v4619_v19  ;;  %v2731_v18 = vadd.f32 %v2730_v30, %v2689_v16 }
0x1e81   :  { %2753 = vrot.lane.b32.xlu0 %v2751_v61, %s3986_s21  ;;  %v3540_v3 = vmul.f32 -1.442695, %v2731_v18  ;;  %v3869_v4 = vpop.eup %3868 }
0x1e82   :  { %v2777_v6 = vadd.f32 1.0, %v3869_v4 }
0x1e83   :  { %3870 = vpow2.f32 %v3540_v3 }
0x1e84   :  { %3872 = vrcp.f32 %v2777_v6  ;;  %v2789_v35 = vand.u32 2147483648, %v2777_v6  ;;  %vm2783_vm2 = vweird.f32 %v2777_v6  ;;  %v2787_v38 = vand.u32 2147483647, %v2777_v6 }
0x1e86   :  { %v2691_v62 = vpop.f32.mrf.mxu2  ;;  %v2790_v60 = vor.u32 1.1754944e-38, %v2789_v35  ;;  %vm2788_vm4 = vcmp.eq.f32.partialorder %v2787_v38, 8.507059e+37 }
0x1e89   :  { %v3871_v9 = vpop.eup %3870 }
0x1e8a   :  { %v2735_v55 = vadd.f32 1.0, %v3871_v9  ;;  %v3873_v10 = vpop.eup %3872 }
0x1e8b   :  { %v2779_v58 = vmul.f32 %v3873_v10, %v2777_v6  ;;  %vm2784_vm1 = vweird.f32 %v3873_v10 }
0x1e8c   :  { %3874 = vrcp.f32 %v2735_v55  ;;  %vm2785_vm3 = vmor %vm2783_vm2, %vm2784_vm1  ;;  %v2747_v22 = vand.u32 2147483648, %v2735_v55  ;;  %vm2741_vm6 = vweird.f32 %v2735_v55  ;;  %v2745_v50 = vand.u32 2147483647, %v2735_v55 }
0x1e8d   :  { %v2780_v11 = vsub.f32 1.0, %v2779_v58 }
0x1e8e   :  { %v2748_v14 = vor.u32 1.1754944e-38, %v2747_v22  ;;  %vm2746_vm8 = vcmp.eq.f32.partialorder %v2745_v50, 8.507059e+37 }
0x1e8f   :  { %v2781_v27 = vmul.f32 %v3873_v10, %v2780_v11  ;;  %v2898_v11 = vld [vmem:[#allocation6 + $0x30] sm:$0xff] }
0x1e91   :  { %v2782_v24 = vadd.f32 %v3873_v10, %v2781_v27 }
0x1e92   :  { %v3875_v15 = vpop.eup %3874 }
0x1e93   :  { %v2737_v17 = vmul.f32 %v3875_v15, %v2735_v55  ;;  %v2786_v5 = vsel %vm2785_vm3, %v3873_v10, %v2782_v24  ;;  %vm2742_vm5 = vweird.f32 %v3875_v15  ;;  %v2940_v24 = vld [vmem:[#allocation7 + $0x8] sm:$0xff] }
0x1e94   :  { %v2791_v48 = vsel %vm2788_vm4, %v2790_v60, %v2786_v5  ;;  %vm2743_vm7 = vmor %vm2741_vm6, %vm2742_vm5 }
0x1e95   :  { %v2738_v31 = vsub.f32 1.0, %v2737_v17  ;;  %v2805_v52 = vsub.f32 1.0, %v2791_v48  ;;  %v2811_v32 = vmul.f32 %v2791_v48, %v4776_v43 }
0x1e97   :  { %v2739_v39 = vmul.f32 %v3875_v15, %v2738_v31 }
0x1e99   :  { %v2740_v8 = vadd.f32 %v3875_v15, %v2739_v39 }
0x1e9b   :  { %v2744_v2 = vsel %vm2743_vm7, %v3875_v15, %v2740_v8 }
0x1e9c   :  { %v2749_v46 = vsel %vm2746_vm8, %v2748_v14, %v2744_v2 }
0x1e9d   :  { %v2763_v16 = vsub.f32 1.0, %v2749_v46  ;;  %v2769_v61 = vmul.f32 %v2749_v46, %v4770_v41 }
0x1eeb   :  { %v2796_v45 = vpop.permute.xlu1 %2795 }
0x1eec   :  { %v2798_v21 = vmul.f32 %v2796_v45, %v2791_v48 }
0x1eee   :  { %2800 = vrot.lane.b32.xlu0 %v2798_v21, %s3986_s21 }
0x1ef3   :  { %v2754_v54 = vpop.permute.xlu0 %2753 }
0x1ef4   :  { %v2756_v44 = vmul.f32 %v2754_v54, %v2749_v46 }
0x1ef6   :  { %2758 = vrot.lane.b32.xlu2 %v2756_v44, %s3986_s21 }
0x1f50   :  { %v2759_v13 = vpop.permute.xlu2 %2758 }
0x1f51   :  { %v2761_v40 = vadd.f32 %v2759_v13, %v2730_v30  ;;  %v3659_v30 = vld [vmem:[%s4977_s11] sm:$0xff] }
0x1f52   :  { %2855 = vmatpush.bf16.msrb.mxu0 %v3659_v30  ;;  %v3663_v30 = vld [vmem:[%s4977_s11] sm:$0xff] }
0x1f53   :  { %3876 = vtanh.f32 %v2761_v40  ;;  %3023 = vmatpush.bf16.msra.mxu2 %v3663_v30 }
0x1f59   :  { %v3877_v36 = vpop.eup %3876 }
0x1f5a   :  { %2765 = vrot.lane.b32.xlu1 %v3877_v36, %s3988_s15 }
0x1f60   :  { %v2801_v51 = vpop.permute.xlu0 %2800 }
0x1f61   :  { %v2803_v37 = vadd.f32 %v2801_v51, %v2772_v63 }
0x1f63   :  { %3878 = vtanh.f32 %v2803_v37 }
0x1f69   :  { %v3879_v34 = vpop.eup %3878 }
0x1f6a   :  { %2807 = vrot.lane.b32.xlu2 %v3879_v34, %s3988_s15 }
0x1fc4   :  { %v2808_v1 = vpop.permute.xlu2 %2807 }
0x1fc5   :  { %v2810_v29 = vmul.f32 %v2808_v1, %v2805_v52 }
0x1fc7   :  { %v4804_v53 = vadd.f32 %v2811_v32, %v2810_v29 }
0x1fc9   :  { %v2861_v56 = vpack.c.bf16 %v4804_v53, %v4804_v53 }
0x1fcb   :  { %2867 = vrot.lane.b32.xlu1 %v2861_v56, %s3988_s15 }
0x1fcc   :  { %v2766_v57 = vpop.permute.xlu1 %2765 }
0x1fcd   :  { %v2768_v62 = vmul.f32 %v2766_v57, %v2763_v16 }
0x1fcf   :  { %v4810_v63 = vadd.f32 %v2769_v61, %v2768_v62 }
0x1fd1   :  { %v2825_v0 = vpack.c.bf16 %v4810_v63, %v4810_v63 }
0x1fd3   :  { %2831 = vrot.lane.b32.xlu0 %v2825_v0, %s3988_s15 }
0x203d   :  { %v2868_v18 = vpop.permute.xlu1 %2867 }
0x203e   :  { %3561 = vmatmul.msk.bf16.vlgmr.msrb.gmra.mxu1 %vm148_vm0, %v2868_v18 }
0x2045   :  { %v2832_v3 = vpop.permute.xlu0 %2831 }
0x2046   :  { %3552 = vmatmul.msk.bf16.vlgmr.msrb.gmra.mxu0 %vm148_vm0, %v2832_v3 }
0x20bb   :  { %v2893_v4 = vpop.f32.mrf.mxu1 }
0x20bc   :  { %v2961_v6 = vadd.f32 %v2893_v4, %v4611_v26  ;;  %v2941_v31 = vadd.f32 %v2940_v24, %v2893_v4 }
0x20be   :  { %2963 = vrot.lane.b32.xlu0 %v2961_v6, %s3986_s21  ;;  %v3563_v38 = vmul.f32 -1.442695, %v2941_v31  ;;  %v3665_v31 = vld [vmem:[%s4978_s12] sm:$0xff] }
0x20c3   :  { %v2857_v9 = vpop.f32.mrf.mxu0  ;;  %v2895_v55 = vpop.f32.mrf.mxu1 }
0x20c4   :  { %v2919_v10 = vadd.f32 %v2857_v9, %v4619_v19  ;;  %v2899_v15 = vadd.f32 %v2898_v11, %v2857_v9 }
0x20c6   :  { %2921 = vrot.lane.b32.xlu2 %v2919_v10, %s3986_s21  ;;  %v3562_v27 = vmul.f32 -1.442695, %v2899_v15 }
0x20c8   :  { %3880 = vpow2.f32 %v3562_v27 }
0x20cb   :  { %v2859_v58 = vpop.f32.mrf.mxu0 }
0x20ce   :  { %v3881_v17 = vpop.eup %3880 }
0x20cf   :  { %v2903_v35 = vadd.f32 1.0, %v3881_v17 }
0x20d1   :  { %3882 = vrcp.f32 %v2903_v35  ;;  %v2915_v50 = vand.u32 2147483648, %v2903_v35  ;;  %vm2909_vm10 = vweird.f32 %v2903_v35  ;;  %v2913_v2 = vand.u32 2147483647, %v2903_v35 }
0x20d2   :  { %3884 = vpow2.f32 %v3563_v38 }
0x20d3   :  { %v2916_v46 = vor.u32 1.1754944e-38, %v2915_v50  ;;  %vm2914_vm12 = vcmp.eq.f32.partialorder %v2913_v2, 8.507059e+37  ;;  %v3066_v2 = vld [vmem:[#allocation6 + $0x38] sm:$0xff] }
0x20d7   :  { %v3883_v5 = vpop.eup %3882 }
0x20d8   :  { %v3885_v39 = vpop.eup %3884  ;;  %v2905_v60 = vmul.f32 %v3883_v5, %v2903_v35  ;;  %vm2910_vm9 = vweird.f32 %v3883_v5 }
0x20d9   :  { %v2945_v45 = vadd.f32 1.0, %v3885_v39  ;;  %vm2911_vm11 = vmor %vm2909_vm10, %vm2910_vm9 }
0x20da   :  { %v2906_v48 = vsub.f32 1.0, %v2905_v60 }
0x20db   :  { %3886 = vrcp.f32 %v2945_v45  ;;  %v2957_v34 = vand.u32 2147483648, %v2945_v45  ;;  %vm2951_vm14 = vweird.f32 %v2945_v45  ;;  %v2955_v12 = vand.u32 2147483647, %v2945_v45 }
0x20dc   :  { %v2907_v21 = vmul.f32 %v3883_v5, %v2906_v48 }
0x20dd   :  { %v2958_v52 = vor.u32 1.1754944e-38, %v2957_v34  ;;  %vm2956_vm1 = vcmp.eq.f32.partialorder %v2955_v12, 8.507059e+37 }
0x20de   :  { %v2908_v8 = vadd.f32 %v3883_v5, %v2907_v21 }
0x20e0   :  { %v2912_v14 = vsel %vm2911_vm11, %v3883_v5, %v2908_v8  ;;  %v3107_v8 = vld [vmem:[#allocation7] sm:$0xff] }
0x20e1   :  { %v3887_v22 = vpop.eup %3886  ;;  %v2917_v44 = vsel %vm2914_vm12, %v2916_v46, %v2912_v14 }
0x20e2   :  { %v2947_v54 = vmul.f32 %v3887_v22, %v2945_v45  ;;  %vm2952_vm13 = vweird.f32 %v3887_v22  ;;  %v2931_v10 = vsub.f32 1.0, %v2917_v44 }
0x20e3   :  { %vm2953_vm15 = vmor %vm2951_vm14, %vm2952_vm13 }
0x20e4   :  { %v2948_v36 = vsub.f32 1.0, %v2947_v54 }
0x20e6   :  { %v2949_v51 = vmul.f32 %v3887_v22, %v2948_v36 }
0x20e8   :  { %v2950_v37 = vadd.f32 %v3887_v22, %v2949_v51 }
0x20ea   :  { %v2954_v20 = vsel %vm2953_vm15, %v3887_v22, %v2950_v37 }
0x20eb   :  { %v2959_v32 = vsel %vm2956_vm1, %v2958_v52, %v2954_v20 }
0x20ec   :  { %v2973_v18 = vsub.f32 1.0, %v2959_v32  ;;  %v2979_v4 = vmul.f32 %v2959_v32, %v4804_v53 }
0x2120   :  { %v2922_v13 = vpop.permute.xlu2 %2921 }
0x2121   :  { %v2924_v40 = vmul.f32 %v2922_v13, %v2917_v44 }
0x2123   :  { %2926 = vrot.lane.b32.xlu1 %v2924_v40, %s3986_s21 }
0x2130   :  { %v2964_v1 = vpop.permute.xlu0 %2963 }
0x2131   :  { %v2966_v29 = vmul.f32 %v2964_v1, %v2959_v32 }
0x2133   :  { %2968 = vrot.lane.b32.xlu2 %v2966_v29, %s3986_s21 }
0x218d   :  { %v2969_v56 = vpop.permute.xlu2 %2968 }
0x218e   :  { %v2971_v16 = vadd.f32 %v2969_v56, %v2940_v24  ;;  %v3666_v24 = vld [vmem:[%s4978_s12 + $0x8] sm:$0xff] }
0x218f   :  { %3058 = vmatpush.bf16.msra.mxu3 %v3666_v24 }
0x2190   :  { %3888 = vtanh.f32 %v2971_v16 }
0x2193   :  { %3059 = vmatpush.bf16.msra.mxu3 %v3665_v31 }
0x2195   :  { %v2927_v57 = vpop.permute.xlu1 %2926 }
0x2196   :  { %v3889_v61 = vpop.eup %3888  ;;  %v2929_v62 = vadd.f32 %v2927_v57, %v2898_v11  ;;  %v2937_v11 = vmul.f32 %v2917_v44, %v4810_v63 }
0x2197   :  { %2975 = vrot.lane.b32.xlu1 %v3889_v61, %s3988_s15 }
0x2198   :  { %3890 = vtanh.f32 %v2929_v62 }
0x219e   :  { %v3891_v0 = vpop.eup %3890 }
0x219f   :  { %2933 = vrot.lane.b32.xlu0 %v3891_v0, %s3988_s15 }
0x2209   :  { %v2976_v3 = vpop.permute.xlu1 %2975 }
0x220a   :  { %v2978_v6 = vmul.f32 %v2976_v3, %v2973_v18 }
0x220c   :  { %v4838_v9 = vadd.f32 %v2979_v4, %v2978_v6 }
0x220e   :  { %v3029_v55 = vpack.c.bf16 %v4838_v9, %v4838_v9 }
0x2210   :  { %3035 = vrot.lane.b32.xlu0 %v3029_v55, %s3988_s15 }
0x2211   :  { %v2934_v58 = vpop.permute.xlu0 %2933 }
0x2212   :  { %v2936_v15 = vmul.f32 %v2934_v58, %v2931_v10 }
0x2214   :  { %v4844_v27 = vadd.f32 %v2937_v11, %v2936_v15 }
0x2216   :  { %v2993_v17 = vpack.c.bf16 %v4844_v27, %v4844_v27 }
0x2218   :  { %2999 = vrot.lane.b32.xlu2 %v2993_v17, %s3988_s15 }
0x2272   :  { %v3000_v35 = vpop.permute.xlu2 %2999 }
0x2273   :  { %3574 = vmatmul.msk.bf16.vlgmr.msra.gmra.mxu2 %vm148_vm0, %v3000_v35 }
0x2282   :  { %v3036_v38 = vpop.permute.xlu0 %3035 }
0x2283   :  { %3583 = vmatmul.msk.bf16.vlgmr.msra.gmra.mxu3 %vm148_vm0, %v3036_v38 }
0x22f6   :  { %v3025_v5 = vpop.f32.mrf.mxu2 }
0x22f7   :  { %v3087_v39 = vadd.f32 %v3025_v5, %v4619_v19  ;;  %v3067_v14 = vadd.f32 %v3066_v2, %v3025_v5 }
0x22f9   :  { %3089 = vrot.lane.b32.xlu1 %v3087_v39, %s3986_s21  ;;  %v3584_v54 = vmul.f32 -1.442695, %v3067_v14 }
0x22fe   :  { %v3027_v60 = vpop.f32.mrf.mxu2 }
0x2306   :  { %v3061_v45 = vpop.f32.mrf.mxu3 }
0x2307   :  { %v3128_v48 = vadd.f32 %v3061_v45, %v4611_v26  ;;  %v3108_v22 = vadd.f32 %v3107_v8, %v3061_v45 }
0x2309   :  { %3130 = vrot.lane.b32.xlu2 %v3128_v48, %s3986_s21  ;;  %v3585_v50 = vmul.f32 -1.442695, %v3108_v22 }
0x230b   :  { %3892 = vpow2.f32 %v3585_v50 }
0x230c   :  { %3894 = vpow2.f32 %v3584_v54 }
0x230e   :  { %v3063_v21 = vpop.f32.mrf.mxu3 }
0x2311   :  { %v3893_v46 = vpop.eup %3892 }
0x2312   :  { %v3112_v44 = vadd.f32 1.0, %v3893_v46  ;;  %v3895_v19 = vpop.eup %3894 }
0x2313   :  { %v3071_v13 = vadd.f32 1.0, %v3895_v19 }
0x2314   :  { %3896 = vrcp.f32 %v3112_v44  ;;  %v3124_v52 = vand.u32 2147483648, %v3112_v44  ;;  %vm3118_vm3 = vweird.f32 %v3112_v44  ;;  %v3122_v1 = vand.u32 2147483647, %v3112_v44 }
0x2315   :  { %3898 = vrcp.f32 %v3071_v13  ;;  %v3083_v0 = vand.u32 2147483648, %v3071_v13  ;;  %vm3077_vm7 = vweird.f32 %v3071_v13  ;;  %v3081_v47 = vand.u32 2147483647, %v3071_v13 }
0x2316   :  { %v3125_v56 = vor.u32 1.1754944e-38, %v3124_v52  ;;  %vm3123_vm5 = vcmp.eq.f32.partialorder %v3122_v1, 8.507059e+37 }
0x2317   :  { %v3084_v18 = vor.u32 1.1754944e-38, %v3083_v0  ;;  %vm3082_vm9 = vcmp.eq.f32.partialorder %v3081_v47, 8.507059e+37 }
0x231a   :  { %v3897_v40 = vpop.eup %3896 }
0x231b   :  { %v3114_v36 = vmul.f32 %v3897_v40, %v3112_v44  ;;  %v3899_v51 = vpop.eup %3898  ;;  %vm3119_vm2 = vweird.f32 %v3897_v40 }
0x231c   :  { %v3073_v34 = vmul.f32 %v3899_v51, %v3071_v13  ;;  %vm3120_vm4 = vmor %vm3118_vm3, %vm3119_vm2  ;;  %vm3078_vm6 = vweird.f32 %v3899_v51 }
0x231d   :  { %v3115_v26 = vsub.f32 1.0, %v3114_v36  ;;  %vm3079_vm8 = vmor %vm3077_vm7, %vm3078_vm6 }
0x231e   :  { %v3074_v20 = vsub.f32 1.0, %v3073_v34 }
0x231f   :  { %v3116_v37 = vmul.f32 %v3897_v40, %v3115_v26 }
0x2320   :  { %v3075_v29 = vmul.f32 %v3899_v51, %v3074_v20 }
0x2321   :  { %v3117_v12 = vadd.f32 %v3897_v40, %v3116_v37 }
0x2322   :  { %v3076_v62 = vadd.f32 %v3899_v51, %v3075_v29 }
0x2323   :  { %v3121_v32 = vsel %vm3120_vm4, %v3897_v40, %v3117_v12 }
0x2324   :  { %v4861_v16 = vsel %vm3123_vm5, %v3125_v56, %v3121_v32  ;;  %v3080_v30 = vsel %vm3079_vm8, %v3899_v51, %v3076_v62 }
0x2325   :  { %v3085_v4 = vsel %vm3082_vm9, %v3084_v18, %v3080_v30  ;;  %v3146_v35 = vmul.f32 %v4861_v16, %v4838_v9 }
0x2363   :  { %v3131_v57 = vpop.permute.xlu2 %3130 }
0x2364   :  { %v3133_v61 = vmul.f32 %v3131_v57, %v4861_v16 }
0x2366   :  { %3135 = vrot.lane.b32.xlu1 %v3133_v61, %s3986_s21 }
0x236b   :  { %v3090_v3 = vpop.permute.xlu1 %3089 }
0x236c   :  { %v3092_v6 = vmul.f32 %v3090_v3, %v3085_v4 }
0x236e   :  { %3094 = vrot.lane.b32.xlu0 %v3092_v6, %s3986_s21  ;;  %1975 = vrot.lane.b32.xlu1 %v4646_v25, %s3988_s15 }
0x2376   :  { %2148 = vrot.lane.b32.xlu1 %v4674_v42, %s3988_s15 }
0x237e   :  { %2478 = vrot.lane.b32.xlu1 %v4742_v28, %s3988_s15 }
0x2386   :  { %2652 = vrot.lane.b32.xlu1 %v4776_v43, %s3988_s15 }
0x238e   :  { %2982 = vrot.lane.b32.xlu1 %v4844_v27, %s3988_s15 }
0x23d8   :  { %v3136_v55 = vpop.permute.xlu1 %3135 }
0x23d9   :  { %v3138_v10 = vadd.f32 %v3136_v55, %v3107_v8 }
0x23db   :  { %3900 = vtanh.f32 %v3138_v10 }
0x23e0   :  { %v3095_v58 = vpop.permute.xlu0 %3094  ;;  %v1976_v11 = vpop.permute.xlu1 %1975 }
0x23e1   :  { %v3901_v15 = vpop.eup %3900  ;;  %v3097_v17 = vadd.f32 %v3095_v58, %v3066_v2  ;;  %1978 = vst.msk [vmem:[%s4983_s17] sm:$0xff] %vm148_vm0, %v1976_v11 }
0x23e2   :  { %3142 = vrot.lane.b32.xlu0 %v3901_v15, %s3988_s15 }
0x23e3   :  { %3902 = vtanh.f32 %v3097_v17 }
0x23e8   :  { %v2149_v25 = vpop.permute.xlu1 %2148 }
0x23e9   :  { %v3903_v42 = vpop.eup %3902  ;;  %3455 = vst.msk [vmem:[%s4984_s18 + $0x30] sm:$0xff] %vm148_vm0, %v2149_v25 }
0x23ea   :  { %3101 = vrot.lane.b32.xlu2 %v3903_v42, %s3988_s15  ;;  %2142 = vrot.lane.b32.xlu0 %v4668_v33, %s3988_s15 }
0x23f0   :  { %v2479_v28 = vpop.permute.xlu1 %2478 }
0x23f1   :  { %3498 = vst.msk [vmem:[%s4983_s17 + $0x18] sm:$0xff] %vm148_vm0, %v2479_v28 }
0x23f2   :  { %1980 = vrot.lane.b32.xlu2 %v4641_v59, %s3988_s15  ;;  %2316 = vrot.lane.b32.xlu0 %v4702_v23, %s3988_s15  ;;  %v3099_v59 = vsub.f32 1.0, %v3085_v4 }
0x23f8   :  { %v2653_v43 = vpop.permute.xlu1 %2652 }
0x23f9   :  { %3521 = vst.msk [vmem:[%s4984_s18 + $0x18] sm:$0xff] %vm148_vm0, %v2653_v43 }
0x23fa   :  { %2310 = vrot.lane.b32.xlu2 %v4708_v49, %s3988_s15  ;;  %2646 = vrot.lane.b32.xlu0 %v4770_v41, %s3988_s15  ;;  %v3105_v49 = vmul.f32 %v3085_v4, %v4844_v27 }
0x2400   :  { %v2983_v33 = vpop.permute.xlu1 %2982 }
0x2401   :  { %3564 = vst.msk [vmem:[%s4983_s17 + $0x30] sm:$0xff] %vm148_vm0, %v2983_v33 }
0x2402   :  { %2484 = vrot.lane.b32.xlu2 %v4736_v7, %s3988_s15  ;;  %2820 = vrot.lane.b32.xlu0 %v4804_v53, %s3988_s15  ;;  %v3140_v7 = vsub.f32 1.0, %v4861_v16 }
0x240a   :  { %2814 = vrot.lane.b32.xlu2 %v4810_v63, %s3988_s15 }
0x2412   :  { %2988 = vrot.lane.b32.xlu2 %v4838_v9, %s3988_s15 }
0x2444   :  { %v3102_v23 = vpop.permute.xlu2 %3101 }
0x2445   :  { %v3104_v41 = vmul.f32 %v3102_v23, %v3099_v59 }
0x2447   :  { %v3106_v24 = vadd.f32 %v3105_v49, %v3104_v41 }
0x2449   :  { %3149 = vrot.lane.b32.xlu0 %v3106_v24, %s3988_s15 }
0x244c   :  { %v1981_v31 = vpop.permute.xlu2 %1980 }
0x244d   :  { %3433 = vst.msk [vmem:[%s4984_s18 + $0x38] sm:$0xff] %vm148_vm0, %v1981_v31 }
0x2454   :  { %v3143_v53 = vpop.permute.xlu0 %3142  ;;  %v2311_v63 = vpop.permute.xlu2 %2310 }
0x2455   :  { %v3145_v38 = vmul.f32 %v3143_v53, %v3140_v7  ;;  %3476 = vst.msk [vmem:[%s4983_s17 + $0x10] sm:$0xff] %vm148_vm0, %v2311_v63 }
0x2457   :  { %v3147_v27 = vadd.f32 %v3146_v35, %v3145_v38 }
0x2459   :  { %3155 = vrot.lane.b32.xlu1 %v3147_v27, %s3988_s15 }
0x245c   :  { %v2143_v5 = vpop.permute.xlu0 %2142  ;;  %v2485_v39 = vpop.permute.xlu2 %2484 }
0x245d   :  { %3454 = vst.msk [vmem:[%s4983_s17 + $0x8] sm:$0xff] %vm148_vm0, %v2143_v5 }
0x245e   :  { %3499 = vst.msk [vmem:[%s4984_s18 + $0x20] sm:$0xff] %vm148_vm0, %v2485_v39 }
0x2464   :  { %v2317_v9 = vpop.permute.xlu0 %2316  ;;  %v2815_v60 = vpop.permute.xlu2 %2814 }
0x2465   :  { %3477 = vst.msk [vmem:[%s4984_s18 + $0x28] sm:$0xff] %vm148_vm0, %v2317_v9 }
0x2466   :  { %3542 = vst.msk [vmem:[%s4983_s17 + $0x28] sm:$0xff] %vm148_vm0, %v2815_v60 }
0x246c   :  { %v2647_v45 = vpop.permute.xlu0 %2646  ;;  %v2989_v48 = vpop.permute.xlu2 %2988 }
0x246d   :  { %3520 = vst.msk [vmem:[%s4983_s17 + $0x20] sm:$0xff] %vm148_vm0, %v2647_v45 }
0x246e   :  { %3565 = vst.msk [vmem:[%s4984_s18 + $0x8] sm:$0xff] %vm148_vm0, %v2989_v48 }
0x2474   :  { %v2821_v21 = vpop.permute.xlu0 %2820 }
0x2475   :  { %3543 = vst.msk [vmem:[%s4984_s18 + $0x10] sm:$0xff] %vm148_vm0, %v2821_v21 }
0x24bb   :  { %v3150_v8 = vpop.permute.xlu0 %3149 }
0x24bc   :  { %3586 = vst.msk [vmem:[%s4983_s17 + $0x38] sm:$0xff] %vm148_vm0, %v3150_v8 }
0x24cb   :  { %v3156_v22 = vpop.permute.xlu1 %3155 }
0x24cc   :  { %3158 = vst.msk [vmem:[%s4984_s18] sm:$0xff] %vm148_vm0, %v3156_v22 }
0x24cd   :  { %3167 = vsyncpa [#allocation9], 1 }
0x24ce   :  { %3168 = vsyncpa [#allocation11], 1 }

</bundles_post_ra>
